<compile_context>
chip_gen: v6e
topology: v6e:2x2x1
jax: 0.10.0
libtpu: 0.0.40
codegen_flags: <defaults>
</compile_context>

<pallas_src>
import functools

import jax
import jax.numpy as jnp
from jax.experimental import pallas as pl
from jax.experimental.pallas import tpu as pltpu


def _efficient_msa_kernel(x_ref, wkv_ref, bkv_ref, wq_ref, bq_ref, wo_ref, bo_ref,
                          out_ref, xln_ref, kv_ref, *, n_heads, n_taps, eps, q_tile):
    """Fused EfficientMSA forward.

    Grid = (batch, query_tile).  Refs (batch dim squeezed away):
      x_ref  : (Lq, C) f32   tap-major permuted input rows, resident per batch
      wkv_ref: (P*C, 2C) bf16  folded conv->K/V-projection weight (im2col rows)
      bkv_ref: (1, 2C) f32     folded bias
      wq_ref : (C, C) bf16     Wq * 1/sqrt(hd)     bq_ref: (1, C) f32
      wo_ref : (C, C) bf16     output projection   bo_ref: (1, C) f32
      out_ref: (q_tile, C) f32
      xln_ref: (Lq, C) bf16    scratch: LayerNorm'ed x (persists across q tiles)
      kv_ref : (Lk, 2C) bf16   scratch: projected K | V (persists across q tiles)
    """
    Lq, C = x_ref.shape
    Lk = kv_ref.shape[0]
    hd = C // n_heads
    qi = pl.program_id(1)

    # ---- per-batch prologue: LayerNorm + fused (patch-conv -> K/V projection) ----
    @pl.when(qi == 0)
    def _prologue():
        x = x_ref[...]                                           # (Lq, C) f32
        mean = jnp.mean(x, axis=-1, keepdims=True)
        d = x - mean                                             # two-pass variance
        var = jnp.mean(d * d, axis=-1, keepdims=True)
        xln = (d * jax.lax.rsqrt(var + eps)).astype(jnp.bfloat16)
        xln_ref[...] = xln
        # Rows are tap-major: tap p occupies rows [p*Lk, (p+1)*Lk) -> im2col slab.
        slab = jnp.concatenate(
            [xln[p * Lk:(p + 1) * Lk, :] for p in range(n_taps)], axis=-1)  # (Lk, P*C)
        kv = jnp.dot(slab, wkv_ref[...],
                     preferred_element_type=jnp.float32) + bkv_ref[...]     # (Lk, 2C)
        kv_ref[...] = kv.astype(jnp.bfloat16)

    # ---- per-query-tile attention ----
    row0 = pl.multiple_of(qi * q_tile, q_tile)
    q_ln = xln_ref[pl.ds(row0, q_tile), :]                       # (TQ, C) bf16
    # 1/sqrt(hd) is already folded into wq/bq on the host.
    qp = jnp.dot(q_ln, wq_ref[...],
                 preferred_element_type=jnp.float32) + bq_ref[...]          # (TQ, C) f32

    acc = jnp.zeros((q_tile, C), jnp.float32)
    # NOTE: hd=32 head windows are sub-vreg lane slices; a batched heads-axis
    # dot_general would avoid them but needs an in-kernel (L,C)->(heads,L,hd)
    # relayout — kept as a static 2-D head loop for robust lowering, with the
    # output projection distributed over heads (no concatenate, no extra scratch).
    for h in range(n_heads):
        sl = slice(h * hd, (h + 1) * hd)
        qh = qp[:, sl].astype(jnp.bfloat16)                      # (TQ, hd)
        kh = kv_ref[:, sl]                                       # (Lk, hd) bf16
        vh = kv_ref[:, C + h * hd:C + (h + 1) * hd]              # (Lk, hd) bf16
        s = jax.lax.dot_general(qh, kh, (((1,), (1,)), ((), ())),
                                preferred_element_type=jnp.float32)          # (TQ, Lk)
        m = jnp.max(s, axis=-1, keepdims=True)
        e = jnp.exp(s - m)                                       # f32 softmax math
        denom = jnp.sum(e, axis=-1, keepdims=True)
        p = (e * pl.reciprocal(denom, approx=True)).astype(jnp.bfloat16)
        oh = jnp.dot(p, vh, preferred_element_type=jnp.float32)              # (TQ, hd)
        acc = acc + jnp.dot(oh.astype(jnp.bfloat16), wo_ref[sl, :],
                            preferred_element_type=jnp.float32)              # (TQ, C)
    out_ref[...] = acc + bo_ref[...]                             # lane-dense store


def efficient_msa(x_nchw, params, *, n_heads, reduction_ratio, eps=1e-5, q_tile=128):
    """EfficientMSA.forward: NCHW in, NCHW out (matches the PyTorch module)."""
    wck, bck, wcv, bcv, wq, bq, wk, bk, wv, bv, wo, bo = params
    B, C, H, W = x_nchw.shape
    r = reduction_ratio
    P = r * r
    Hk, Wk = H // r, W // r
    Lq, Lk = H * W, Hk * Wk
    hd = C // n_heads
    assert H % r == 0 and W % r == 0 and C % n_heads == 0
    q_tile = min(q_tile, Lq)
    assert Lq % q_tile == 0 and Lk % 8 == 0
    nq = Lq // q_tile

    # ---- host-side weight folding (f32, one-time) ----
    # kp = (slab@Wck + bck)@Wk + bk  ==  slab@(Wck@Wk) + (bck@Wk + bk); same for V.
    with jax.default_matmul_precision("highest"):
        w_kf = wck @ wk
        b_kf = bck @ wk + bk
        w_vf = wcv @ wv
        b_vf = bcv @ wv + bv
    w_kv = jnp.concatenate([w_kf, w_vf], axis=1).astype(jnp.bfloat16)    # (P*C, 2C)
    b_kv = jnp.concatenate([b_kf, b_vf])[None, :]                        # (1, 2C) f32
    scale = float(hd) ** -0.5
    wq_s = (wq * scale).astype(jnp.bfloat16)
    bq_s = (bq * scale)[None, :]
    wo_bf = wo.astype(jnp.bfloat16)
    bo2 = bo[None, :]

    # NCHW -> tap-major permuted sequence: a single transpose (one HBM pass of x).
    # Row ((di*r+dj)*Hk + i)*Wk + j  holds  x[b, :, i*r+di, j*r+dj], so the same
    # array serves as both the (permuted) query rows and the r*r conv taps.
    x_perm = jnp.transpose(x_nchw.reshape(B, C, Hk, r, Wk, r),
                           (0, 3, 5, 2, 4, 1)).reshape(B, Lq, C)

    kernel = functools.partial(_efficient_msa_kernel, n_heads=n_heads,
                               n_taps=P, eps=eps, q_tile=q_tile)
    const = lambda b, qi: (0, 0)

    out_perm = pl.pallas_call(
        kernel,
        out_shape=jax.ShapeDtypeStruct((B, Lq, C), jnp.float32),
        grid=(B, nq),
        in_specs=[
            # x: resident per batch (block index constant across the q-tile axis).
            pl.BlockSpec((None, Lq, C), lambda b, qi: (b, 0, 0)),
            pl.BlockSpec((P * C, 2 * C), const),                  # folded conv∘K/V weight
            pl.BlockSpec((1, 2 * C), const),                      # folded K/V bias
            pl.BlockSpec((C, C), const), pl.BlockSpec((1, C), const),   # Wq*s, bq*s
            pl.BlockSpec((C, C), const), pl.BlockSpec((1, C), const),   # Wo, bo
        ],
        out_specs=pl.BlockSpec((None, q_tile, C), lambda b, qi: (b, qi, 0)),
        scratch_shapes=[pltpu.VMEM((Lq, C), jnp.bfloat16),        # LayerNorm'ed x
                        pltpu.VMEM((Lk, 2 * C), jnp.bfloat16)],   # projected K | V
        compiler_params=pltpu.CompilerParams(
            dimension_semantics=("parallel", "arbitrary"),
            vmem_limit_bytes=32 * 1024 * 1024),
    )(x_perm, w_kv, b_kv, wq_s, bq_s, wo_bf, bo2)

    # tap-major permuted order -> 'b (h w) c -> b c h w'  (single transpose).
    return jnp.transpose(out_perm.reshape(B, r, r, Hk, Wk, C),
                         (0, 5, 3, 1, 4, 2)).reshape(B, C, H, W)


# ---------------- pure-JAX reference (independent, un-folded formulation) ----------------
def _ref_efficient_msa(x_nchw, params, *, n_heads, reduction_ratio, eps=1e-5):
    wck, bck, wcv, bcv, wq, bq, wk, bk, wv, bv, wo, bo = params
    B, C, H, W = x_nchw.shape
    r = reduction_ratio
    with jax.default_matmul_precision("highest"):
        x = jnp.transpose(x_nchw, (0, 2, 3, 1))                        # NHWC
        mean = x.mean(axis=-1, keepdims=True)
        var = jnp.square(x - mean).mean(axis=-1, keepdims=True)
        xn = (x - mean) * jax.lax.rsqrt(var + eps)

        # im2col-layout conv weights -> HWIO for lax.conv
        w_k = wck.reshape(r, r, C, C)
        w_v = wcv.reshape(r, r, C, C)
        k_map = jax.lax.conv_general_dilated(
            xn, w_k, window_strides=(r, r), padding="VALID",
            dimension_numbers=("NHWC", "HWIO", "NHWC")) + bck
        v_map = jax.lax.conv_general_dilated(
            xn, w_v, window_strides=(r, r), padding="VALID",
            dimension_numbers=("NHWC", "HWIO", "NHWC")) + bcv

        Lq, Lk = H * W, (H // r) * (W // r)
        q = xn.reshape(B, Lq, C)
        k = k_map.reshape(B, Lk, C)
        v = v_map.reshape(B, Lk, C)

        hd = C // n_heads
        qp = (q @ wq + bq).reshape(B, Lq, n_heads, hd)
        kp = (k @ wk + bk).reshape(B, Lk, n_heads, hd)
        vp = (v @ wv + bv).reshape(B, Lk, n_heads, hd)
        logits = jnp.einsum("bqhd,bkhd->bhqk", qp, kp) / (hd ** 0.5)
        attn = jax.nn.softmax(logits, axis=-1)
        o = jnp.einsum("bhqk,bkhd->bqhd", attn, vp).reshape(B, Lq, C)
        o = o @ wo + bo
        return jnp.transpose(o.reshape(B, H, W, C), (0, 3, 1, 2))


if __name__ == "__main__":
    # EfficientMSA(dim=128, n_heads=4, reduction_ratio=2) on a (2, 128, 16, 16) input.
    # dim=128 keeps every block lane-dense (C maps exactly onto the 128-lane axis).
    B, C, H, W = 2, 128, 16, 16
    n_heads, r = 4, 2
    P = r * r

    key = jax.random.PRNGKey(0)
    ks = jax.random.split(key, 13)
    sw = 0.05
    x = jax.random.normal(ks[0], (B, C, H, W), jnp.float32)            # NCHW like PyTorch

    wck = jax.random.normal(ks[1], (P * C, C), jnp.float32) * sw       # K patch conv (im2col)
    bck = jax.random.normal(ks[2], (C,), jnp.float32) * sw
    wcv = jax.random.normal(ks[3], (P * C, C), jnp.float32) * sw       # V patch conv (im2col)
    bcv = jax.random.normal(ks[4], (C,), jnp.float32) * sw
    wq = jax.random.normal(ks[5], (C, C), jnp.float32) * sw
    bq = jax.random.normal(ks[6], (C,), jnp.float32) * sw
    wk = jax.random.normal(ks[7], (C, C), jnp.float32) * sw
    bk = jax.random.normal(ks[8], (C,), jnp.float32) * sw
    wv = jax.random.normal(ks[9], (C, C), jnp.float32) * sw
    bv = jax.random.normal(ks[10], (C,), jnp.float32) * sw
    wo = jax.random.normal(ks[11], (C, C), jnp.float32) * sw
    bo = jax.random.normal(ks[12], (C,), jnp.float32) * sw
    params = (wck, bck, wcv, bcv, wq, bq, wk, bk, wv, bv, wo, bo)

    out = jax.block_until_ready(
        efficient_msa(x, params, n_heads=n_heads, reduction_ratio=r))
    ref = jax.block_until_ready(
        _ref_efficient_msa(x, params, n_heads=n_heads, reduction_ratio=r))

    assert out.shape == (B, C, H, W), out.shape
    # Tolerance covers bf16 MXU operands + approx softmax reciprocal + host-side
    # weight folding vs the f32 'highest'-precision reference; any structural bug
    # (tap/head/LN mis-indexing) produces errors orders of magnitude larger.
    max_err = float(jnp.max(jnp.abs(out - ref)))
    assert bool(jnp.allclose(out, ref, atol=1e-2, rtol=1e-2)), max_err
    print("KERNEL_OK")
</pallas_src>

<mosaic_0001>
module attributes {stable_mosaic.version = 11 : i64} {
  func.func @_efficient_msa_kernel(%arg0: i32, %arg1: i32, %arg2: memref<1x256x128xf32, #tpu.memory_space<vmem>>, %arg3: memref<512x256xbf16, #tpu.memory_space<vmem>>, %arg4: memref<1x256xf32, #tpu.memory_space<vmem>>, %arg5: memref<128x128xbf16, #tpu.memory_space<vmem>>, %arg6: memref<1x128xf32, #tpu.memory_space<vmem>>, %arg7: memref<128x128xbf16, #tpu.memory_space<vmem>>, %arg8: memref<1x128xf32, #tpu.memory_space<vmem>>, %arg9: memref<1x128x128xf32, #tpu.memory_space<vmem>>, %arg10: memref<256x128xbf16, #tpu.memory_space<vmem>>, %arg11: memref<64x256xbf16, #tpu.memory_space<vmem>>) attributes {dimension_semantics = [#tpu.dimension_semantics<parallel>, #tpu.dimension_semantics<arbitrary>], iteration_bounds = array<i64: 2, 2>, scalar_prefetch = 0 : i64, scratch_operands = 2 : i64, tpu.core_type = #tpu.core_type<tc>, window_params = [{transform_indices = @transform_0, window_bounds = array<i64: 1, 256, 128>}, {pipeline_mode = #tpu.pipeline_mode<synchronous>, transform_indices = @transform_1, window_bounds = array<i64: 512, 256>}, {pipeline_mode = #tpu.pipeline_mode<synchronous>, transform_indices = @transform_2, window_bounds = array<i64: 1, 256>}, {pipeline_mode = #tpu.pipeline_mode<synchronous>, transform_indices = @transform_3, window_bounds = array<i64: 128, 128>}, {pipeline_mode = #tpu.pipeline_mode<synchronous>, transform_indices = @transform_4, window_bounds = array<i64: 1, 128>}, {pipeline_mode = #tpu.pipeline_mode<synchronous>, transform_indices = @transform_5, window_bounds = array<i64: 128, 128>}, {pipeline_mode = #tpu.pipeline_mode<synchronous>, transform_indices = @transform_6, window_bounds = array<i64: 1, 128>}, {transform_indices = @transform_7, window_bounds = array<i64: 1, 128, 128>}]} {
    %c0_i32 = arith.constant 0 : i32
    %0 = arith.cmpi eq, %arg1, %c0_i32 : i32
    %1 = arith.extui %0 : i1 to i32
    %c0_i32_0 = arith.constant 0 : i32
    %2 = arith.cmpi ne, %1, %c0_i32_0 : i32
    scf.if %2 {
      %c0_48 = arith.constant 0 : index
      %c0_49 = arith.constant 0 : index
      %c0_50 = arith.constant 0 : index
      %103 = vector.load %arg2[%c0_48, %c0_49, %c0_50] : memref<1x256x128xf32, #tpu.memory_space<vmem>>, vector<1x256x128xf32>
      %104 = vector.shape_cast %103 : vector<1x256x128xf32> to vector<256x128xf32>
      %cst_51 = arith.constant dense<0.000000e+00> : vector<256xf32>
      %105 = vector.multi_reduction <add>, %104, %cst_51 [1] : vector<256x128xf32> to vector<256xf32>
      %106 = vector.shape_cast %105 : vector<256xf32> to vector<256x1xf32>
      %cst_52 = arith.constant 1.280000e+02 : f32
      %107 = vector.broadcast %cst_52 : f32 to vector<256x1xf32>
      %108 = arith.divf %106, %107 : vector<256x1xf32>
      %109 = vector.broadcast %108 : vector<256x1xf32> to vector<256x128xf32>
      %110 = arith.subf %104, %109 : vector<256x128xf32>
      %111 = arith.mulf %110, %110 : vector<256x128xf32>
      %cst_53 = arith.constant dense<0.000000e+00> : vector<256xf32>
      %112 = vector.multi_reduction <add>, %111, %cst_53 [1] : vector<256x128xf32> to vector<256xf32>
      %113 = vector.shape_cast %112 : vector<256xf32> to vector<256x1xf32>
      %cst_54 = arith.constant 1.280000e+02 : f32
      %114 = vector.broadcast %cst_54 : f32 to vector<256x1xf32>
      %115 = arith.divf %113, %114 : vector<256x1xf32>
      %cst_55 = arith.constant 9.99999974E-6 : f32
      %116 = vector.broadcast %cst_55 : f32 to vector<256x1xf32>
      %117 = arith.addf %115, %116 : vector<256x1xf32>
      %118 = math.rsqrt %117 : vector<256x1xf32>
      %119 = vector.broadcast %118 : vector<256x1xf32> to vector<256x128xf32>
      %120 = arith.mulf %110, %119 : vector<256x128xf32>
      %121 = arith.truncf %120 : vector<256x128xf32> to vector<256x128xbf16>
      %c0_56 = arith.constant 0 : index
      %c0_57 = arith.constant 0 : index
      %122 = vector.load %arg10[%c0_56, %c0_57] : memref<256x128xbf16, #tpu.memory_space<vmem>>, vector<256x128xbf16>
      tpu.vector_store %arg10[%c0_56, %c0_57], %121 {strides = array<i32>} : memref<256x128xbf16, #tpu.memory_space<vmem>>, vector<256x128xbf16>,
      %123 = vector.extract_strided_slice %121 {offsets = [0, 0], sizes = [64, 128], strides = [1, 1]} : vector<256x128xbf16> to vector<64x128xbf16>
      %124 = vector.extract_strided_slice %121 {offsets = [64, 0], sizes = [64, 128], strides = [1, 1]} : vector<256x128xbf16> to vector<64x128xbf16>
      %125 = vector.extract_strided_slice %121 {offsets = [128, 0], sizes = [64, 128], strides = [1, 1]} : vector<256x128xbf16> to vector<64x128xbf16>
      %126 = vector.extract_strided_slice %121 {offsets = [192, 0], sizes = [64, 128], strides = [1, 1]} : vector<256x128xbf16> to vector<64x128xbf16>
      %127 = tpu.concatenate %123, %124, %125, %126 in 1 : vector<64x128xbf16>, vector<64x128xbf16>, vector<64x128xbf16>, vector<64x128xbf16> -> vector<64x512xbf16>
      %c0_58 = arith.constant 0 : index
      %c0_59 = arith.constant 0 : index
      %128 = vector.load %arg3[%c0_58, %c0_59] : memref<512x256xbf16, #tpu.memory_space<vmem>>, vector<512x256xbf16>
      %cst_60 = arith.constant dense<0.000000e+00> : vector<64x256xf32>
      %129 = tpu.matmul %127, %128, %cst_60 {dimension_numbers = #tpu.dot_dimension_numbers<[1], [0], [0], [1], [0, 0, 1, 1], [], []>} : vector<64x512xbf16>, vector<512x256xbf16>, vector<64x256xf32> -> vector<64x256xf32>
      %c0_61 = arith.constant 0 : index
      %c0_62 = arith.constant 0 : index
      %130 = vector.load %arg4[%c0_61, %c0_62] : memref<1x256xf32, #tpu.memory_space<vmem>>, vector<1x256xf32>
      %131 = vector.broadcast %130 : vector<1x256xf32> to vector<64x256xf32>
      %132 = arith.addf %129, %131 : vector<64x256xf32>
      %133 = arith.truncf %132 : vector<64x256xf32> to vector<64x256xbf16>
      %c0_63 = arith.constant 0 : index
      %c0_64 = arith.constant 0 : index
      %134 = vector.load %arg11[%c0_63, %c0_64] : memref<64x256xbf16, #tpu.memory_space<vmem>>, vector<64x256xbf16>
      tpu.vector_store %arg11[%c0_63, %c0_64], %133 {strides = array<i32>} : memref<64x256xbf16, #tpu.memory_space<vmem>>, vector<64x256xbf16>,
    } else {
    }
    %c128_i32 = arith.constant 128 : i32
    %3 = arith.muli %arg1, %c128_i32 : i32
    %4 = tpu.assume_multiple %3, 128 : i32
    %5 = arith.index_cast %4 : i32 to index
    %c0 = arith.constant 0 : index
    %6 = vector.load %arg10[%5, %c0] : memref<256x128xbf16, #tpu.memory_space<vmem>>, vector<128x128xbf16>
    %c0_1 = arith.constant 0 : index
    %c0_2 = arith.constant 0 : index
    %7 = vector.load %arg5[%c0_1, %c0_2] : memref<128x128xbf16, #tpu.memory_space<vmem>>, vector<128x128xbf16>
    %cst = arith.constant dense<0.000000e+00> : vector<128x128xf32>
    %8 = tpu.matmul %6, %7, %cst {dimension_numbers = #tpu.dot_dimension_numbers<[1], [0], [0], [1], [0, 0, 1, 1], [], []>} : vector<128x128xbf16>, vector<128x128xbf16>, vector<128x128xf32> -> vector<128x128xf32>
    %c0_3 = arith.constant 0 : index
    %c0_4 = arith.constant 0 : index
    %9 = vector.load %arg6[%c0_3, %c0_4] : memref<1x128xf32, #tpu.memory_space<vmem>>, vector<1x128xf32>
    %10 = vector.broadcast %9 : vector<1x128xf32> to vector<128x128xf32>
    %11 = arith.addf %8, %10 : vector<128x128xf32>
    %cst_5 = arith.constant 0.000000e+00 : f32
    %12 = vector.broadcast %cst_5 : f32 to vector<128x128xf32>
    %13 = vector.extract_strided_slice %11 {offsets = [0, 0], sizes = [128, 32], strides = [1, 1]} : vector<128x128xf32> to vector<128x32xf32>
    %14 = arith.truncf %13 : vector<128x32xf32> to vector<128x32xbf16>
    %c0_6 = arith.constant 0 : index
    %c0_7 = arith.constant 0 : index
    %15 = vector.load %arg11[%c0_6, %c0_7] : memref<64x256xbf16, #tpu.memory_space<vmem>>, vector<64x32xbf16>
    %c0_8 = arith.constant 0 : index
    %c128 = arith.constant 128 : index
    %16 = vector.load %arg11[%c0_8, %c128] : memref<64x256xbf16, #tpu.memory_space<vmem>>, vector<64x32xbf16>
    %cst_9 = arith.constant dense<0.000000e+00> : vector<128x64xf32>
    %17 = tpu.matmul %14, %15, %cst_9 {dimension_numbers = #tpu.dot_dimension_numbers<[1], [1], [0], [0], [0, 0, 1, 0], [], []>} : vector<128x32xbf16>, vector<64x32xbf16>, vector<128x64xf32> -> vector<128x64xf32>
    %cst_10 = arith.constant dense<0xFF800000> : vector<128xf32>
    %18 = vector.multi_reduction <maximumf>, %17, %cst_10 [1] : vector<128x64xf32> to vector<128xf32>
    %19 = vector.shape_cast %18 : vector<128xf32> to vector<128x1xf32>
    %20 = vector.broadcast %19 : vector<128x1xf32> to vector<128x64xf32>
    %21 = arith.subf %17, %20 : vector<128x64xf32>
    %22 = math.exp %21 : vector<128x64xf32>
    %cst_11 = arith.constant dense<0.000000e+00> : vector<128xf32>
    %23 = vector.multi_reduction <add>, %22, %cst_11 [1] : vector<128x64xf32> to vector<128xf32>
    %24 = vector.shape_cast %23 : vector<128xf32> to vector<128x1xf32>
    %25 = tpu.reciprocal %24 {approx = true} : vector<128x1xf32> -> vector<128x1xf32>
    %26 = vector.broadcast %25 : vector<128x1xf32> to vector<128x64xf32>
    %27 = arith.mulf %22, %26 : vector<128x64xf32>
    %28 = arith.truncf %27 : vector<128x64xf32> to vector<128x64xbf16>
    %cst_12 = arith.constant dense<0.000000e+00> : vector<128x32xf32>
    %29 = tpu.matmul %28, %16, %cst_12 {dimension_numbers = #tpu.dot_dimension_numbers<[1], [0], [0], [1], [0, 0, 1, 1], [], []>} : vector<128x64xbf16>, vector<64x32xbf16>, vector<128x32xf32> -> vector<128x32xf32>
    %30 = arith.truncf %29 : vector<128x32xf32> to vector<128x32xbf16>
    %c0_13 = arith.constant 0 : index
    %c0_14 = arith.constant 0 : index
    %31 = vector.load %arg7[%c0_13, %c0_14] : memref<128x128xbf16, #tpu.memory_space<vmem>>, vector<32x128xbf16>
    %cst_15 = arith.constant dense<0.000000e+00> : vector<128x128xf32>
    %32 = tpu.matmul %30, %31, %cst_15 {dimension_numbers = #tpu.dot_dimension_numbers<[1], [0], [0], [1], [0, 0, 1, 1], [], []>} : vector<128x32xbf16>, vector<32x128xbf16>, vector<128x128xf32> -> vector<128x128xf32>
    %33 = arith.addf %12, %32 : vector<128x128xf32>
    %34 = vector.extract_strided_slice %11 {offsets = [0, 32], sizes = [128, 32], strides = [1, 1]} : vector<128x128xf32> to vector<128x32xf32>
    %35 = arith.truncf %34 : vector<128x32xf32> to vector<128x32xbf16>
    %c0_16 = arith.constant 0 : index
    %c32 = arith.constant 32 : index
    %36 = vector.load %arg11[%c0_16, %c32] : memref<64x256xbf16, #tpu.memory_space<vmem>>, vector<64x32xbf16>
    %c0_17 = arith.constant 0 : index
    %c160 = arith.constant 160 : index
    %37 = vector.load %arg11[%c0_17, %c160] : memref<64x256xbf16, #tpu.memory_space<vmem>>, vector<64x32xbf16>
    %cst_18 = arith.constant dense<0.000000e+00> : vector<128x64xf32>
    %38 = tpu.matmul %35, %36, %cst_18 {dimension_numbers = #tpu.dot_dimension_numbers<[1], [1], [0], [0], [0, 0, 1, 0], [], []>} : vector<128x32xbf16>, vector<64x32xbf16>, vector<128x64xf32> -> vector<128x64xf32>
    %cst_19 = arith.constant dense<0xFF800000> : vector<128xf32>
    %39 = vector.multi_reduction <maximumf>, %38, %cst_19 [1] : vector<128x64xf32> to vector<128xf32>
    %40 = vector.shape_cast %39 : vector<128xf32> to vector<128x1xf32>
    %41 = vector.broadcast %40 : vector<128x1xf32> to vector<128x64xf32>
    %42 = arith.subf %38, %41 : vector<128x64xf32>
    %43 = math.exp %42 : vector<128x64xf32>
    %cst_20 = arith.constant dense<0.000000e+00> : vector<128xf32>
    %44 = vector.multi_reduction <add>, %43, %cst_20 [1] : vector<128x64xf32> to vector<128xf32>
    %45 = vector.shape_cast %44 : vector<128xf32> to vector<128x1xf32>
    %46 = tpu.reciprocal %45 {approx = true} : vector<128x1xf32> -> vector<128x1xf32>
    %47 = vector.broadcast %46 : vector<128x1xf32> to vector<128x64xf32>
    %48 = arith.mulf %43, %47 : vector<128x64xf32>
    %49 = arith.truncf %48 : vector<128x64xf32> to vector<128x64xbf16>
    %cst_21 = arith.constant dense<0.000000e+00> : vector<128x32xf32>
    %50 = tpu.matmul %49, %37, %cst_21 {dimension_numbers = #tpu.dot_dimension_numbers<[1], [0], [0], [1], [0, 0, 1, 1], [], []>} : vector<128x64xbf16>, vector<64x32xbf16>, vector<128x32xf32> -> vector<128x32xf32>
    %51 = arith.truncf %50 : vector<128x32xf32> to vector<128x32xbf16>
    %c32_22 = arith.constant 32 : index
    %c0_23 = arith.constant 0 : index
    %52 = vector.load %arg7[%c32_22, %c0_23] : memref<128x128xbf16, #tpu.memory_space<vmem>>, vector<32x128xbf16>
    %cst_24 = arith.constant dense<0.000000e+00> : vector<128x128xf32>
    %53 = tpu.matmul %51, %52, %cst_24 {dimension_numbers = #tpu.dot_dimension_numbers<[1], [0], [0], [1], [0, 0, 1, 1], [], []>} : vector<128x32xbf16>, vector<32x128xbf16>, vector<128x128xf32> -> vector<128x128xf32>
    %54 = arith.addf %33, %53 : vector<128x128xf32>
    %55 = vector.extract_strided_slice %11 {offsets = [0, 64], sizes = [128, 32], strides = [1, 1]} : vector<128x128xf32> to vector<128x32xf32>
    %56 = arith.truncf %55 : vector<128x32xf32> to vector<128x32xbf16>
    %c0_25 = arith.constant 0 : index
    %c64 = arith.constant 64 : index
    %57 = vector.load %arg11[%c0_25, %c64] : memref<64x256xbf16, #tpu.memory_space<vmem>>, vector<64x32xbf16>
    %c0_26 = arith.constant 0 : index
    %c192 = arith.constant 192 : index
    %58 = vector.load %arg11[%c0_26, %c192] : memref<64x256xbf16, #tpu.memory_space<vmem>>, vector<64x32xbf16>
    %cst_27 = arith.constant dense<0.000000e+00> : vector<128x64xf32>
    %59 = tpu.matmul %56, %57, %cst_27 {dimension_numbers = #tpu.dot_dimension_numbers<[1], [1], [0], [0], [0, 0, 1, 0], [], []>} : vector<128x32xbf16>, vector<64x32xbf16>, vector<128x64xf32> -> vector<128x64xf32>
    %cst_28 = arith.constant dense<0xFF800000> : vector<128xf32>
    %60 = vector.multi_reduction <maximumf>, %59, %cst_28 [1] : vector<128x64xf32> to vector<128xf32>
    %61 = vector.shape_cast %60 : vector<128xf32> to vector<128x1xf32>
    %62 = vector.broadcast %61 : vector<128x1xf32> to vector<128x64xf32>
    %63 = arith.subf %59, %62 : vector<128x64xf32>
    %64 = math.exp %63 : vector<128x64xf32>
    %cst_29 = arith.constant dense<0.000000e+00> : vector<128xf32>
    %65 = vector.multi_reduction <add>, %64, %cst_29 [1] : vector<128x64xf32> to vector<128xf32>
    %66 = vector.shape_cast %65 : vector<128xf32> to vector<128x1xf32>
    %67 = tpu.reciprocal %66 {approx = true} : vector<128x1xf32> -> vector<128x1xf32>
    %68 = vector.broadcast %67 : vector<128x1xf32> to vector<128x64xf32>
    %69 = arith.mulf %64, %68 : vector<128x64xf32>
    %70 = arith.truncf %69 : vector<128x64xf32> to vector<128x64xbf16>
    %cst_30 = arith.constant dense<0.000000e+00> : vector<128x32xf32>
    %71 = tpu.matmul %70, %58, %cst_30 {dimension_numbers = #tpu.dot_dimension_numbers<[1], [0], [0], [1], [0, 0, 1, 1], [], []>} : vector<128x64xbf16>, vector<64x32xbf16>, vector<128x32xf32> -> vector<128x32xf32>
    %72 = arith.truncf %71 : vector<128x32xf32> to vector<128x32xbf16>
    %c64_31 = arith.constant 64 : index
    %c0_32 = arith.constant 0 : index
    %73 = vector.load %arg7[%c64_31, %c0_32] : memref<128x128xbf16, #tpu.memory_space<vmem>>, vector<32x128xbf16>
    %cst_33 = arith.constant dense<0.000000e+00> : vector<128x128xf32>
    %74 = tpu.matmul %72, %73, %cst_33 {dimension_numbers = #tpu.dot_dimension_numbers<[1], [0], [0], [1], [0, 0, 1, 1], [], []>} : vector<128x32xbf16>, vector<32x128xbf16>, vector<128x128xf32> -> vector<128x128xf32>
    %75 = arith.addf %54, %74 : vector<128x128xf32>
    %76 = vector.extract_strided_slice %11 {offsets = [0, 96], sizes = [128, 32], strides = [1, 1]} : vector<128x128xf32> to vector<128x32xf32>
    %77 = arith.truncf %76 : vector<128x32xf32> to vector<128x32xbf16>
    %c0_34 = arith.constant 0 : index
    %c96 = arith.constant 96 : index
    %78 = vector.load %arg11[%c0_34, %c96] : memref<64x256xbf16, #tpu.memory_space<vmem>>, vector<64x32xbf16>
    %c0_35 = arith.constant 0 : index
    %c224 = arith.constant 224 : index
    %79 = vector.load %arg11[%c0_35, %c224] : memref<64x256xbf16, #tpu.memory_space<vmem>>, vector<64x32xbf16>
    %cst_36 = arith.constant dense<0.000000e+00> : vector<128x64xf32>
    %80 = tpu.matmul %77, %78, %cst_36 {dimension_numbers = #tpu.dot_dimension_numbers<[1], [1], [0], [0], [0, 0, 1, 0], [], []>} : vector<128x32xbf16>, vector<64x32xbf16>, vector<128x64xf32> -> vector<128x64xf32>
    %cst_37 = arith.constant dense<0xFF800000> : vector<128xf32>
    %81 = vector.multi_reduction <maximumf>, %80, %cst_37 [1] : vector<128x64xf32> to vector<128xf32>
    %82 = vector.shape_cast %81 : vector<128xf32> to vector<128x1xf32>
    %83 = vector.broadcast %82 : vector<128x1xf32> to vector<128x64xf32>
    %84 = arith.subf %80, %83 : vector<128x64xf32>
    %85 = math.exp %84 : vector<128x64xf32>
    %cst_38 = arith.constant dense<0.000000e+00> : vector<128xf32>
    %86 = vector.multi_reduction <add>, %85, %cst_38 [1] : vector<128x64xf32> to vector<128xf32>
    %87 = vector.shape_cast %86 : vector<128xf32> to vector<128x1xf32>
    %88 = tpu.reciprocal %87 {approx = true} : vector<128x1xf32> -> vector<128x1xf32>
    %89 = vector.broadcast %88 : vector<128x1xf32> to vector<128x64xf32>
    %90 = arith.mulf %85, %89 : vector<128x64xf32>
    %91 = arith.truncf %90 : vector<128x64xf32> to vector<128x64xbf16>
    %cst_39 = arith.constant dense<0.000000e+00> : vector<128x32xf32>
    %92 = tpu.matmul %91, %79, %cst_39 {dimension_numbers = #tpu.dot_dimension_numbers<[1], [0], [0], [1], [0, 0, 1, 1], [], []>} : vector<128x64xbf16>, vector<64x32xbf16>, vector<128x32xf32> -> vector<128x32xf32>
    %93 = arith.truncf %92 : vector<128x32xf32> to vector<128x32xbf16>
    %c96_40 = arith.constant 96 : index
    %c0_41 = arith.constant 0 : index
    %94 = vector.load %arg7[%c96_40, %c0_41] : memref<128x128xbf16, #tpu.memory_space<vmem>>, vector<32x128xbf16>
    %cst_42 = arith.constant dense<0.000000e+00> : vector<128x128xf32>
    %95 = tpu.matmul %93, %94, %cst_42 {dimension_numbers = #tpu.dot_dimension_numbers<[1], [0], [0], [1], [0, 0, 1, 1], [], []>} : vector<128x32xbf16>, vector<32x128xbf16>, vector<128x128xf32> -> vector<128x128xf32>
    %96 = arith.addf %75, %95 : vector<128x128xf32>
    %c0_43 = arith.constant 0 : index
    %c0_44 = arith.constant 0 : index
    %97 = vector.load %arg8[%c0_43, %c0_44] : memref<1x128xf32, #tpu.memory_space<vmem>>, vector<1x128xf32>
    %98 = vector.broadcast %97 : vector<1x128xf32> to vector<128x128xf32>
    %99 = arith.addf %96, %98 : vector<128x128xf32>
    %c0_45 = arith.constant 0 : index
    %c0_46 = arith.constant 0 : index
    %c0_47 = arith.constant 0 : index
    %100 = vector.load %arg9[%c0_45, %c0_46, %c0_47] : memref<1x128x128xf32, #tpu.memory_space<vmem>>, vector<1x128x128xf32>
    %101 = vector.shape_cast %100 : vector<1x128x128xf32> to vector<128x128xf32>
    %102 = vector.shape_cast %99 : vector<128x128xf32> to vector<1x128x128xf32>
    tpu.vector_store %arg9[%c0_45, %c0_46, %c0_47], %102 {strides = array<i32>} : memref<1x128x128xf32, #tpu.memory_space<vmem>>, vector<1x128x128xf32>,
    return
  }
  func.func @transform_0(%arg0: i32, %arg1: i32) -> (i32, i32, i32) {
    %c0_i32 = arith.constant 0 : i32
    %c0_i32_0 = arith.constant 0 : i32
    %c0_i32_1 = arith.constant 0 : i32
    return %arg0, %c0_i32, %c0_i32_0 : i32, i32, i32
  }
  func.func @transform_1(%arg0: i32, %arg1: i32) -> (i32, i32) {
    %c0_i32 = arith.constant 0 : i32
    %c0_i32_0 = arith.constant 0 : i32
    %c0_i32_1 = arith.constant 0 : i32
    return %c0_i32, %c0_i32_0 : i32, i32
  }
  func.func @transform_2(%arg0: i32, %arg1: i32) -> (i32, i32) {
    %c0_i32 = arith.constant 0 : i32
    %c0_i32_0 = arith.constant 0 : i32
    %c0_i32_1 = arith.constant 0 : i32
    return %c0_i32, %c0_i32_0 : i32, i32
  }
  func.func @transform_3(%arg0: i32, %arg1: i32) -> (i32, i32) {
    %c0_i32 = arith.constant 0 : i32
    %c0_i32_0 = arith.constant 0 : i32
    %c0_i32_1 = arith.constant 0 : i32
    return %c0_i32, %c0_i32_0 : i32, i32
  }
  func.func @transform_4(%arg0: i32, %arg1: i32) -> (i32, i32) {
    %c0_i32 = arith.constant 0 : i32
    %c0_i32_0 = arith.constant 0 : i32
    %c0_i32_1 = arith.constant 0 : i32
    return %c0_i32, %c0_i32_0 : i32, i32
  }
  func.func @transform_5(%arg0: i32, %arg1: i32) -> (i32, i32) {
    %c0_i32 = arith.constant 0 : i32
    %c0_i32_0 = arith.constant 0 : i32
    %c0_i32_1 = arith.constant 0 : i32
    return %c0_i32, %c0_i32_0 : i32, i32
  }
  func.func @transform_6(%arg0: i32, %arg1: i32) -> (i32, i32) {
    %c0_i32 = arith.constant 0 : i32
    %c0_i32_0 = arith.constant 0 : i32
    %c0_i32_1 = arith.constant 0 : i32
    return %c0_i32, %c0_i32_0 : i32, i32
  }
  func.func @transform_7(%arg0: i32, %arg1: i32) -> (i32, i32, i32) {
    %c0_i32 = arith.constant 0 : i32
    %c0_i32_0 = arith.constant 0 : i32
    return %arg0, %arg1, %c0_i32 : i32, i32, i32
  }
}

</mosaic_0001>

<bundles_post_ra>
// kernel: tpu_custom_call.1
= control target key start
LH: loop header
LB: loop body
LE: loop exit
PB: predicated region body
PF: predicated region fallthrough
CT: control target
= control target key end

     0   :  { %s7934_s0 = inlined_call_operand.hbm [shape: f32[2,256,128], index: 0, kind: input, shape index: {}]   ;;  %s7935_s1 = inlined_call_operand.hbm [shape: bf16[512,256], index: 1, kind: input, shape index: {}]   ;;  %s7936_s2 = inlined_call_operand.vmem [shape: f32[1,256], index: 2, kind: input, shape index: {}]   ;;  %s7937_s3 = inlined_call_operand.hbm [shape: bf16[128,128], index: 3, kind: input, shape index: {}]   ;;  %s7938_s4 = inlined_call_operand.vmem [shape: f32[1,128], index: 4, kind: input, shape index: {}]   ;;  %s7939_s5 = inlined_call_operand.hbm [shape: bf16[128,128], index: 5, kind: input, shape index: {}]   ;;  %s7940_s6 = inlined_call_operand.vmem [shape: f32[1,128], index: 6, kind: input, shape index: {}]   ;;  %s7941_s7 = inlined_call_operand.hbm [shape: f32[2,256,128], index: 7, kind: output, shape index: {}]  }
   0x1   :  { %7954 = sst [smem:[#allocation27_spill]] %s7935_s1 }
   0x2   :  { %7955 = sst [smem:[#allocation28_spill]] %s7937_s3 }
   0x3   :  { %7956 = sst [smem:[#allocation29_spill]] %s7939_s5 }
   0x4   :  { %7957 = sst [smem:[#allocation30_spill]] %s7941_s7 }
   0x5   :  { %12 = vsyncpa [#allocation5], 0 }
   0x6   :  { %14 = vsyncpa [#allocation5 + $0x1], 0 }
   0x7   :  { %15 = vsyncpa [#allocation8], 0 }
   0x8   :  { %16 = vsyncpa [#allocation11], 0 }
   0x9   :  { %17 = vsyncpa [#allocation6], 0 }
   0xa   :  { %19 = vsyncpa [#allocation6 + $0x1], 0  ;;  %s6227_s24 = smov 0   ;;  %s6229_s25 = smov 0  }
   0xb   :  { %s6231_s26 = smov 0   ;;  %s6233_s27 = smov 0  }
   0xc   :  { %s6235_s28 = smov 0   ;;  %s6237_s29 = smov 0  }
   0xd   :  { %s6239_s30 = smov 0   ;;  %s6241_s8 = smov 0  }
   0xe   :  { %s6243_s9 = smov 0   ;;  %s6245_s10 = smov 0  }
   0xf   :  { %s6247_s11 = smov 0  }
  0x10 LB: > { %7958 = sst [smem:[#allocation17_spill]] %s6131_s24  ;;  %s4464_s12 = sadd.s32 4294967295, %s6171_s11   ;;  %s6171_s11 = sphi %s6247_s11, %s25_s11   ;;  %s6167_s10 = sphi %s6245_s10, %s8003_s10   ;;  %s6163_s9 = sphi %s6243_s9, %s7994_s9   ;;  %s6159_s8 = sphi %s6241_s8, %s8002_s8   ;;  %s6155_s30 = sphi %s6239_s30, %s7993_s30   ;;  %s6151_s29 = sphi %s6237_s29, %s8001_s29   ;;  %s6147_s28 = sphi %s6235_s28, %s8000_s28   ;;  %s6143_s27 = sphi %s6233_s27, %s7999_s27   ;;  %s6139_s26 = sphi %s6231_s26, %s7998_s26   ;;  %s6135_s25 = sphi %s6229_s25, %s7997_s25   ;;  %s6131_s24 = sphi %s6227_s24, %s7996_s24  }
  0x11   : > { %7959 = sst [smem:[#allocation18_spill]] %s6159_s8  ;;  %s4465_s13 = sadd.s32 4294967294, %s6171_s11  }
  0x12   : > { %7960 = sst [smem:[#allocation19_spill]] %s6163_s9  ;;  %p57_p0 = scmp.ne.s32.totalorder %s6147_s28, %s6143_s27 }
  0x13   : > { %p6283_p1 = scmp.eq.s32.totalorder %s4464_s12, 0  ;;  %p208_p2 = scmp.ne.s32.totalorder %s6139_s26, %s6135_s25 }
  0x14   : > { %p209_p4 = scmp.eq.s32.totalorder %s4464_s12, 3  ;;  %p214_p5 = scmp.ne.s32.totalorder %s6135_s25, %s6131_s24 }
  0x15   : > { %p6292_p3 = por %p6283_p1, %p57_p0  ;;  %p215_p6 = scmp.eq.s32.totalorder %s4465_s13, 3 }
  0x16   : > { %p6298_p7 = por %p209_p4, %p208_p2  ;;  %p4466_p8 = scmp.ge.s32.totalorder %s6171_s11, 1 }
  0x17   : > { %p6303_p9 = por %p215_p6, %p214_p5  ;;  %p222_p10 = scmp.lt.s32.totalorder %s6171_s11, 5 }
  0x18   : > { %s7963_s17 = scalar_select %p6298_p7, 1, 0 }
  0x19   : > { %s7965_s18 = scalar_select %p6303_p9, 1, 0 }
  0x1a   : > { %7964 = sst [smem:[#allocation20_spill]] %s7963_s17  ;;  %p6308_p11 = pnand %p4466_p8, %p222_p10 }
  0x1b   : > { %7966 = sst [smem:[#allocation21_spill]] %s7965_s18  ;;  %s6173_s20 = smov [#allocation7]  }
  0x1c   : > { %s234_s21 = sshll.u32 %s6173_s20, 4  ;;  %p5355_p12 = pneg %p6308_p11  ;;  %s235_s21 = int_to_ptr.vmem [resolvable:$true] %s234_s21 }
  0x1d   : > { %s6174_s23 = smov [#allocation9]   ;;  %s5948_s12 = scalar_lea.vmem %s235_s21, 8192 }
  0x1e   : > { %p6316_p13 = pnand %p5355_p12, %p6283_p1  ;;  %s250_s27 = sshll.u32 %s6174_s23, 4  ;;  %s251_s27 = int_to_ptr.vmem [resolvable:$true] %s250_s27 }
  0x1f   : > { %p5949_p2 = scmp.ne.s32.totalorder %s235_s21, %s5948_s12  ;;  %p5956_p6 = scmp.lt.s32.totalorder %s235_s21, %s235_s21 }
  0x20   : > { %p5939_p0 = pneg %p6316_p13  ;;  %p5957_p8 = scmp.lt.s32.totalorder %s5948_s12, %s5948_s12 }
  0x22   : > { %p5951_p4 = pnand %p5949_p2, %p5939_p0  ;;  %p5958_p10 = por %p5957_p8, %p5956_p6 }
  0x24   : > { %p5952_p5 = pneg %p5951_p4 }
  0x26   : > { %p5959_p12 = pnand %p5958_p10, %p5952_p5 }
  0x28   : > { %5962 = shalt.err (!%p5959_p12)
}
  0x29   : > { %s7947_s13 = smov 128   ;;  %s7948_s20 = smov 8  }
  0x2a   : > { %s7969_s1 = sld [smem:[#allocation27_spill]]  ;;  %s5974_s18 = scalar_lea.vmem %s251_s27, 1024 }
  0x2b   : > { %p5975_p2 = scmp.ne.s32.totalorder %s251_s27, %s5974_s18  ;;  %p5982_p5 = scmp.lt.s32.totalorder %s251_s27, %s251_s27 }
  0x2c   : > { %p5983_p8 = scmp.lt.s32.totalorder %s5974_s18, %s5974_s18 }
  0x2d   : > { %p5977_p4 = pnand %p5975_p2, %p5939_p0 }
  0x2e   : > { %p5984_p10 = por %p5983_p8, %p5982_p5 }
  0x2f   : > { %p5978_p6 = pneg %p5977_p4 }
  0x30   : > { %5358 = dma.hbm_to_vmem [thread:$0]  (!%p6316_p13), %s7969_s1, 8192, %s235_s21, [#allocation8], %s7947_s13, %s7947_s13, %s7948_s20  }
  0x31   : > { %p5985_p12 = pnand %p5984_p10, %p5978_p6 }
  0x33   : > { %5988 = shalt.err (!%p5985_p12)
}
  0x34   : > { %s6177_s12 = smov 64   ;;  %s6178_s24 = smov 4  }
  0x35   : > { %s7970_s3 = sld [smem:[#allocation28_spill]]  ;;  %s6179_s15 = smov [#allocation10]  }
  0x36   : > { %s266_s21 = sshll.u32 %s6179_s15, 4  ;;  %s267_s21 = int_to_ptr.vmem [resolvable:$true] %s266_s21 }
  0x37   : > { %s6000_s23 = scalar_lea.vmem %s267_s21, 1024  ;;  %p6008_p6 = scmp.lt.s32.totalorder %s267_s21, %s267_s21 }
  0x38   : > { %p6001_p2 = scmp.ne.s32.totalorder %s267_s21, %s6000_s23  ;;  %p6009_p8 = scmp.lt.s32.totalorder %s6000_s23, %s6000_s23 }
  0x3a   : > { %p6003_p4 = pnand %p6001_p2, %p5939_p0  ;;  %p6010_p10 = por %p6009_p8, %p6008_p6 }
  0x3b   : > { %5361 = dma.hbm_to_vmem [thread:$0]  (!%p6316_p13), %s7970_s3, 1024, %s251_s27, [#allocation8], %s6177_s12, %s6177_s12, %s6178_s24  }
  0x3c   : > { %p6004_p5 = pneg %p6003_p4 }
  0x3e   : > { %p6011_p12 = pnand %p6010_p10, %p6004_p5 }
  0x40   : > { %6014 = shalt.err (!%p6011_p12)
}
  0x41   : > { %s7971_s5 = sld [smem:[#allocation29_spill]]  ;;  %s34_s7 = sadd.s32 1, %s6163_s9 }
  0x42   : > { %p35_p0 = scmp.ge.s32.totalorder %s34_s7, 2  ;;  %s37_s17 = sadd.s32 1, %s6167_s10 }
  0x43   : > { %s44_s27 = sadd.s32 1, %s6151_s29  ;;  %p51_p2 = scmp.ne.s32.totalorder %s6151_s29, %s6147_s28 }
  0x44   : > { %s8005_s7 = smov (%p35_p0, %s34_s7), 0  ;;  %s8007_s17 = smov (!%p35_p0, %s37_s17), %s6167_s10 }
  0x45   : > { %7972 = sst [smem:[#allocation22_spill]] %s8005_s7  ;;  %p52_p4 = scmp.eq.s32.totalorder %s6171_s11, 0 }
  0x46   : > { %s194_s22 = ssub.s32 %s6163_s9, %s8005_s7  ;;  %p39_p5 = scmp.ge.s32.totalorder %s8007_s17, 2 }
  0x47   : > { %5364 = dma.hbm_to_vmem [thread:$0]  (!%p6316_p13), %s7971_s5, 1024, %s267_s21, [#allocation11], %s6177_s12, %s6177_s12, %s6178_s24  }
  0x48   : > { %p5376_p6 = scmp.lt.s32.totalorder %s6171_s11, 4  ;;  %p6361_p13 = por %p52_p4, %p51_p2 }
  0x49   : > { %s283_s13 = sand.u32 1, %s6151_s29   ;;  %s8009_s17 = smov (%p39_p5, %s8007_s17), 0 }
  0x4a   : > { %7974 = sst [smem:[#allocation23_spill]] %s8009_s17  ;;  %s4471_s12 = sshll.u32 %s283_s13, 8 }
  0x4b   : > { %s41_s15 = ssub.s32 %s6167_s10, %s8009_s17  ;;  %s4723_s23 = sshll.u32 %s6167_s10, 12 }
  0x4c   : > { %p42_p8 = scmp.eq.s32.totalorder %s41_s15, 0  ;;  %s195_s21 = sor.u32 %s194_s22, %s41_s15 }
  0x4d   : > { %p196_p10 = scmp.eq.s32.totalorder %s195_s21, 0  ;;  %s7975_s20 = sadd.s32 1, %s6139_s26 }
  0x4e   : > { %s6372_s18 = scalar_select %p42_p8, %s6151_s29, %s44_s27  }
  0x4f   : > { %s6377_s1 = scalar_select %p196_p10, %s6139_s26, %s7975_s20  }
  0x50   : > { %s293_s7 = scalar_lea.hbm %s7934_s0, %s4723_s23  ;;  %s287_s9 = scalar_lea.vmem [#allocation4], %s4471_s12 }
  0x51   : > { %s294_s8 = sshll.u32 %s287_s9, 4  ;;  %p6386_p12 = pnand %p5376_p6, %p6361_p13  ;;  %s295_s8 = int_to_ptr.vmem [resolvable:$true] %s294_s8 }
  0x52   : > { %s284_s22 = scalar_lea.sflag [#allocation5], %s283_s13  ;;  %s6028_s27 = scalar_lea.vmem %s295_s8, 4096 }
  0x53   : > { %p6017_p0 = pneg %p6386_p12  ;;  %p6029_p2 = scmp.ne.s32.totalorder %s295_s8, %s6028_s27 }
  0x54   : > { %s6180_s20 = smov [#allocation4]  }
  0x55   : > { %p6031_p4 = pnand %p6029_p2, %p6017_p0  ;;  %s6033_s3 = sshll.u32 %s6180_s20, 4  ;;  %s6034_s3 = int_to_ptr.vmem [resolvable:$false] %s6033_s3 }
  0x56   : > { %s6035_s5 = scalar_lea.vmem %s6034_s3, 8192  ;;  %p6036_p8 = scmp.lt.s32.totalorder %s295_s8, %s6034_s3 }
  0x57   : > { %p6032_p5 = pneg %p6031_p4  ;;  %p6037_p10 = scmp.lt.s32.totalorder %s6035_s5, %s6028_s27 }
  0x59   : > { %p6038_p9 = por %p6037_p10, %p6036_p8 }
  0x5b   : > { %p6039_p7 = pnand %p6038_p9, %p6032_p5 }
  0x5d   : > { %6042 = shalt.err (!%p6039_p7)
}
  0x5e   : > { %s7977_s9 = smov 8   ;;  %s7978_s24 = smov 128  }
  0x5f   : > { %5368 = dma.hbm_to_vmem [thread:$0]  (!%p6386_p12), %s293_s7, 4096, %s295_s8, %s284_s22, %s7978_s24, %s7978_s24, %s7977_s9  }
  0x60   : > { %306 = sbr.rel (%p6308_p11) target bundleno = 3429 (0xd65), region = 48 }
  0x65   : > { %s308_s13 = sand.u32 1, %s6147_s28  }
  0x66   : > { %s4475_s12 = sshll.u32 %s308_s13, 8  ;;  %s309_s15 = scalar_lea.sflag [#allocation5], %s308_s13 }
  0x67   : > { %s6400_s21 = scalar_lea.vmem [#allocation4], %s4475_s12 }
  0x68   : > { %6114 = dma.done.wait (%p6292_p3), %s309_s15, 4096  }
  0x69   : > { %6116 = vsyncadd (%p6292_p3), %s309_s15, 4294963200 }
  0x6a   : > { %6118 = dma.done.wait (%p6283_p1), [#allocation8], 9216  }
  0x6b   : > { %6120 = vsyncadd (%p6283_p1), [#allocation8], 4294958080 }
  0x6c   : > { %6122 = dma.done.wait (%p6283_p1), [#allocation11], 1024  }
  0x6d   : > { %6124 = vsyncadd (%p6283_p1), [#allocation11], 4294966272  ;;  %s352_s8 = sand.u32 1, %s6135_s25   ;;  %p4480_p3 = scmp.ne.s32.totalorder %s6155_s30, 0 }
  0x6e   : > { %s4479_s19 = sshll.u32 %s352_s8, 7 }
  0x6f   : > { %s6417_s7 = scalar_lea.vmem [#allocation12], %s4479_s19  ;;  %360 = sbr.rel (%p4480_p3) target bundleno = 689 (0x2b1), region = 68 }
  0x74   : > { %v6421_v0 = vld [vmem:[%s6400_s21 + $0x40] sm:$0xff]  ;;  %v6429_v2 = vld [vmem:[%s6400_s21 + $0x48] sm:$0xff]  ;;  %v6451_v8 = vld [vmem:[%s6400_s21 + $0x50] sm:$0xff] }
  0x75   : > { %v6424_v1 = vld [vmem:[%s6400_s21] sm:$0xff]  ;;  %409 = vadd.xlane.f32.xlu0 %v6421_v0  ;;  %v6432_v3 = vld [vmem:[%s6400_s21 + $0x8] sm:$0xff]  ;;  %v6454_v9 = vld [vmem:[%s6400_s21 + $0x58] sm:$0xff] }
  0x76   : > { %393 = vadd.xlane.f32.xlu1 %v6424_v1  ;;  %v6437_v4 = vld [vmem:[%s6400_s21 + $0xc0] sm:$0xff]  ;;  %v6440_v5 = vld [vmem:[%s6400_s21 + $0xc8] sm:$0xff]  ;;  %v6459_v10 = vld [vmem:[%s6400_s21 + $0x10] sm:$0xff] }
  0x77   : > { %v6445_v6 = vld [vmem:[%s6400_s21 + $0x80] sm:$0xff]  ;;  %v6448_v7 = vld [vmem:[%s6400_s21 + $0x88] sm:$0xff]  ;;  %v6462_v11 = vld [vmem:[%s6400_s21 + $0x18] sm:$0xff] }
  0x78   : > { %v6467_v12 = vld [vmem:[%s6400_s21 + $0xd0] sm:$0xff]  ;;  %v6470_v13 = vld [vmem:[%s6400_s21 + $0xd8] sm:$0xff]  ;;  %v6483_v16 = vld [vmem:[%s6400_s21 + $0x60] sm:$0xff] }
  0x79   : > { %411 = vadd.xlane.f32.xlu0 %v6429_v2  ;;  %v6475_v14 = vld [vmem:[%s6400_s21 + $0x90] sm:$0xff]  ;;  %v6478_v15 = vld [vmem:[%s6400_s21 + $0x98] sm:$0xff]  ;;  %v6486_v17 = vld [vmem:[%s6400_s21 + $0x68] sm:$0xff] }
  0x7a   : > { %395 = vadd.xlane.f32.xlu1 %v6432_v3  ;;  %v6493_v18 = vld [vmem:[%s6400_s21 + $0x20] sm:$0xff]  ;;  %v6496_v19 = vld [vmem:[%s6400_s21 + $0x28] sm:$0xff]  ;;  %v6517_v24 = vld [vmem:[%s6400_s21 + $0x70] sm:$0xff] }
  0x7b   : > { %v6501_v20 = vld [vmem:[%s6400_s21 + $0xe0] sm:$0xff]  ;;  %v6504_v21 = vld [vmem:[%s6400_s21 + $0xe8] sm:$0xff]  ;;  %v6520_v25 = vld [vmem:[%s6400_s21 + $0x78] sm:$0xff] }
  0x7c   : > { %v6509_v22 = vld [vmem:[%s6400_s21 + $0xa0] sm:$0xff]  ;;  %v6512_v23 = vld [vmem:[%s6400_s21 + $0xa8] sm:$0xff]  ;;  %v6525_v26 = vld [vmem:[%s6400_s21 + $0x30] sm:$0xff] }
  0x7d   : > { %441 = vadd.xlane.f32.xlu0 %v6437_v4  ;;  %v6528_v27 = vld [vmem:[%s6400_s21 + $0x38] sm:$0xff]  ;;  %v6533_v28 = vld [vmem:[%s6400_s21 + $0xf0] sm:$0xff]  ;;  %v5484_v34 = vld [vmem:[#allocation7 + $0x64] ss:$8 sps:$4 sm:$0xff]  }
  0x7e   : > { %443 = vadd.xlane.f32.xlu1 %v6440_v5  ;;  %v6536_v29 = vld [vmem:[%s6400_s21 + $0xf8] sm:$0xff]  ;;  %v6541_v30 = vld [vmem:[%s6400_s21 + $0xb0] sm:$0xff]  ;;  %v5486_v37 = vld [vmem:[#allocation7 + $0x60] ss:$8 sps:$4 sm:$0xff]  }
  0x7f   : > { %v6544_v31 = vld [vmem:[%s6400_s21 + $0xb8] sm:$0xff]  ;;  %v5495_v38 = vld [vmem:[#allocation7 + $0x164] ss:$8 sps:$4 sm:$0xff]   ;;  %v5498_v40 = vld [vmem:[#allocation7 + $0x160] ss:$8 sps:$4 sm:$0xff]  }
  0x80   : > { %v5481_v32 = vld [vmem:[#allocation7 + $0x74] ss:$8 sps:$4 sm:$0xff]   ;;  %v5483_v33 = vld [vmem:[#allocation7 + $0x70] ss:$8 sps:$4 sm:$0xff]   ;;  %v5493_v43 = vld [vmem:[#allocation7 + $0x44] ss:$8 sps:$4 sm:$0xff]  }
  0x81   : > { %425 = vadd.xlane.f32.xlu0 %v6445_v6  ;;  %v5489_v35 = vld [vmem:[#allocation7 + $0x174] ss:$8 sps:$4 sm:$0xff]   ;;  %1302 = vmatprep.subr.bf16.mxu0 %v5481_v32  ;;  %v5492_v36 = vld [vmem:[#allocation7 + $0x170] ss:$8 sps:$4 sm:$0xff]   ;;  %v5507_v45 = vld [vmem:[#allocation7 + $0x144] ss:$8 sps:$4 sm:$0xff]  }
  0x82   : > { %427 = vadd.xlane.f32.xlu1 %v6448_v7  ;;  %1303 = vmatpush1.bf16.msra.mxu0 %v5483_v33  ;;  %v5487_v39 = vld [vmem:[#allocation7 + $0x54] ss:$8 sps:$4 sm:$0xff]   ;;  %v5491_v42 = vld [vmem:[#allocation7 + $0x50] ss:$8 sps:$4 sm:$0xff]   ;;  %v5497_v46 = vld [vmem:[#allocation7 + $0x40] ss:$8 sps:$4 sm:$0xff]  }
  0x83   : > { %1375 = vmatprep.subr.bf16.mxu1 %v5489_v35  ;;  %1304 = vmatprep.subr.bf16.mxu0 %v5484_v34  ;;  %v5501_v41 = vld [vmem:[#allocation7 + $0x154] ss:$8 sps:$4 sm:$0xff]   ;;  %v5504_v44 = vld [vmem:[#allocation7 + $0x150] ss:$8 sps:$4 sm:$0xff]   ;;  %v5510_v48 = vld [vmem:[#allocation7 + $0x140] ss:$8 sps:$4 sm:$0xff]  }
  0x84   : > { %1376 = vmatpush1.bf16.msra.mxu1 %v5492_v36  ;;  %v5499_v47 = vld [vmem:[#allocation7 + $0x34] ss:$8 sps:$4 sm:$0xff]   ;;  %v5503_v50 = vld [vmem:[#allocation7 + $0x30] ss:$8 sps:$4 sm:$0xff]   ;;  %v5505_v51 = vld [vmem:[#allocation7 + $0x24] ss:$8 sps:$4 sm:$0xff]  }
  0x85   : > { %413 = vadd.xlane.f32.xlu0 %v6451_v8  ;;  %1377 = vmatprep.subr.bf16.mxu1 %v5495_v38  ;;  %v5513_v49 = vld [vmem:[#allocation7 + $0x134] ss:$8 sps:$4 sm:$0xff]   ;;  %v5516_v52 = vld [vmem:[#allocation7 + $0x130] ss:$8 sps:$4 sm:$0xff]   ;;  %v5519_v53 = vld [vmem:[#allocation7 + $0x124] ss:$8 sps:$4 sm:$0xff]  }
  0x86   : > { %415 = vadd.xlane.f32.xlu1 %v6454_v9  ;;  %1305 = vmatpush1.bf16.msra.mxu0 %v5486_v37  ;;  %v5509_v54 = vld [vmem:[#allocation7 + $0x20] ss:$8 sps:$4 sm:$0xff]   ;;  %v5511_v55 = vld [vmem:[#allocation7 + $0x14] ss:$8 sps:$4 sm:$0xff]   ;;  %v5515_v58 = vld [vmem:[#allocation7 + $0x10] ss:$8 sps:$4 sm:$0xff]  }
  0x87   : > { %1306 = vmatprep.subr.bf16.mxu0 %v5487_v39  ;;  %v5522_v56 = vld [vmem:[#allocation7 + $0x120] ss:$8 sps:$4 sm:$0xff]   ;;  %v5525_v57 = vld [vmem:[#allocation7 + $0x114] ss:$8 sps:$4 sm:$0xff]   ;;  %v5517_v59 = vld [vmem:[#allocation7 + $0x4] ss:$8 sps:$4 sm:$0xff]  }
  0x88   : > { %1378 = vmatpush1.bf16.msra.mxu1 %v5498_v40  ;;  %v5528_v60 = vld [vmem:[#allocation7 + $0x110] ss:$8 sps:$4 sm:$0xff]   ;;  %v5521_v61 = vld [vmem:[#allocation7] ss:$8 sps:$4 sm:$0xff]   ;;  %v5523_v62 = vld [vmem:[#allocation7 + $0xf4] ss:$8 sps:$4 sm:$0xff]  }
  0x89   : > { %397 = vadd.xlane.f32.xlu0 %v6459_v10  ;;  %1379 = vmatprep.subr.bf16.mxu1 %v5501_v41  ;;  %v5527_v63 = vld [vmem:[#allocation7 + $0xf0] ss:$8 sps:$4 sm:$0xff]  }
  0x8a   : > { %399 = vadd.xlane.f32.xlu1 %v6462_v11  ;;  %1307 = vmatpush1.bf16.msra.mxu0 %v5491_v42 }
  0x8b   : > { %1308 = vmatprep.subr.bf16.mxu0 %v5493_v43 }
  0x8c   : > { %1380 = vmatpush1.bf16.msra.mxu1 %v5504_v44 }
  0x8d   : > { %445 = vadd.xlane.f32.xlu0 %v6467_v12  ;;  %1381 = vmatprep.subr.bf16.mxu1 %v5507_v45 }
  0x8e   : > { %447 = vadd.xlane.f32.xlu1 %v6470_v13  ;;  %1309 = vmatpush1.bf16.msra.mxu0 %v5497_v46 }
  0x8f   : > { %1310 = vmatprep.subr.bf16.mxu0 %v5499_v47 }
  0x90   : > { %1382 = vmatpush1.bf16.msra.mxu1 %v5510_v48 }
  0x91   : > { %429 = vadd.xlane.f32.xlu0 %v6475_v14  ;;  %1383 = vmatprep.subr.bf16.mxu1 %v5513_v49 }
  0x92   : > { %431 = vadd.xlane.f32.xlu1 %v6478_v15  ;;  %1311 = vmatpush1.bf16.msra.mxu0 %v5503_v50 }
  0x93   : > { %1312 = vmatprep.subr.bf16.mxu0 %v5505_v51 }
  0x94   : > { %1384 = vmatpush1.bf16.msra.mxu1 %v5516_v52 }
  0x95   : > { %417 = vadd.xlane.f32.xlu0 %v6483_v16  ;;  %1385 = vmatprep.subr.bf16.mxu1 %v5519_v53 }
  0x96   : > { %419 = vadd.xlane.f32.xlu1 %v6486_v17  ;;  %1313 = vmatpush1.bf16.msra.mxu0 %v5509_v54 }
  0x97   : > { %1314 = vmatprep.subr.bf16.mxu0 %v5511_v55 }
  0x98   : > { %1386 = vmatpush1.bf16.msra.mxu1 %v5522_v56 }
  0x99   : > { %401 = vadd.xlane.f32.xlu0 %v6493_v18  ;;  %1387 = vmatprep.subr.bf16.mxu1 %v5525_v57 }
  0x9a   : > { %403 = vadd.xlane.f32.xlu1 %v6496_v19  ;;  %1315 = vmatpush1.bf16.msra.mxu0 %v5515_v58 }
  0x9b   : > { %1316 = vmatprep.subr.bf16.mxu0 %v5517_v59 }
  0x9c   : > { %1388 = vmatpush1.bf16.msra.mxu1 %v5528_v60 }
  0x9d   : > { %449 = vadd.xlane.f32.xlu0 %v6501_v20 }
  0x9e   : > { %451 = vadd.xlane.f32.xlu1 %v6504_v21  ;;  %1317 = vmatpush1.bf16.msra.mxu0 %v5521_v61  ;;  %v5529_v61 = vld [vmem:[#allocation7 + $0xe4] ss:$8 sps:$4 sm:$0xff]  }
  0x9f   : > { %1318 = vmatprep.subr.bf16.mxu0 %v5523_v62  ;;  %v5531_v62 = vld [vmem:[#allocation7 + $0x104] ss:$8 sps:$4 sm:$0xff]  }
  0xa0   : > { %1389 = vmatprep.subr.bf16.mxu1 %v5531_v62 }
  0xa1   : > { %433 = vadd.xlane.f32.xlu0 %v6509_v22 }
  0xa2   : > { %435 = vadd.xlane.f32.xlu1 %v6512_v23  ;;  %1319 = vmatpush2.bf16.msra.mxu0 %v5527_v63  ;;  %v5533_v63 = vld [vmem:[#allocation7 + $0xe0] ss:$8 sps:$4 sm:$0xff]  }
  0xa3   : > { %1320 = vmatprep.subr.bf16.mxu0 %v5529_v61  ;;  %v5549_v61 = vld [vmem:[#allocation7 + $0x1d4] ss:$8 sps:$4 sm:$0xff]  }
  0xa5   : > { %421 = vadd.xlane.f32.xlu0 %v6517_v24 }
  0xa6   : > { %423 = vadd.xlane.f32.xlu1 %v6520_v25  ;;  %1321 = vmatpush2.bf16.msra.mxu0 %v5533_v63 }
  0xa9   : > { %405 = vadd.xlane.f32.xlu0 %v6525_v26 }
  0xaa   : > { %407 = vadd.xlane.f32.xlu1 %v6528_v27 }
  0xad   : > { %453 = vadd.xlane.f32.xlu0 %v6533_v28 }
  0xae   : > { %455 = vadd.xlane.f32.xlu1 %v6536_v29 }
  0xb1   : > { %437 = vadd.xlane.f32.xlu0 %v6541_v30 }
  0xb2   : > { %439 = vadd.xlane.f32.xlu1 %v6544_v31 }
  0xfe   : > { %v410_v32 = vpop.xlane.xlu0 %409 }
  0xff   : > { %v394_v33 = vpop.xlane.xlu1 %393  ;;  %v466_v34 = vmul.f32 0.0078125, %v410_v32 }
 0x100   : > { %v458_v35 = vmul.f32 0.0078125, %v394_v33 }
 0x101   : > { %v6549_v36 = vsub.f32 %v6421_v0, %v466_v34 }
 0x102   : > { %v6552_v37 = vsub.f32 %v6424_v1, %v458_v35  ;;  %v412_v38 = vpop.xlane.xlu0 %411 }
 0x103   : > { %v396_v39 = vpop.xlane.xlu1 %395  ;;  %v467_v40 = vmul.f32 0.0078125, %v412_v38  ;;  %v530_v41 = vmul.f32 %v6549_v36, %v6549_v36 }
 0x104   : > { %v459_v42 = vmul.f32 0.0078125, %v396_v39  ;;  %v522_v0 = vmul.f32 %v6552_v37, %v6552_v37 }
 0x105   : > { %v6557_v43 = vsub.f32 %v6429_v2, %v467_v40  ;;  %570 = vadd.xlane.f32.xlu0 %v530_v41  ;;  %v5537_v41 = vld [vmem:[#allocation7 + $0x1f4] ss:$8 sps:$4 sm:$0xff]  }
 0x106   : > { %v6560_v44 = vsub.f32 %v6432_v3, %v459_v42  ;;  %v442_v45 = vpop.xlane.xlu0 %441 }
 0x107   : > { %v444_v1 = vpop.xlane.xlu1 %443  ;;  %v482_v46 = vmul.f32 0.0078125, %v442_v45  ;;  %v531_v47 = vmul.f32 %v6557_v43, %v6557_v43  ;;  %v5539_v45 = vld [vmem:[#allocation7 + $0xd0] ss:$8 sps:$4 sm:$0xff]  }
 0x108   : > { %v483_v48 = vmul.f32 0.0078125, %v444_v1  ;;  %v523_v3 = vmul.f32 %v6560_v44, %v6560_v44  ;;  %v5540_v1 = vld [vmem:[#allocation7 + $0x1f0] ss:$8 sps:$4 sm:$0xff]  }
 0x109   : > { %v6567_v49 = vsub.f32 %v6437_v4, %v482_v46  ;;  %572 = vadd.xlane.f32.xlu1 %v531_v47  ;;  %554 = vadd.xlane.f32.xlu0 %v522_v0 }
 0x10a   : > { %v6570_v2 = vsub.f32 %v6440_v5, %v483_v48  ;;  %v426_v50 = vpop.xlane.xlu0 %425 }
 0x10b   : > { %v428_v51 = vpop.xlane.xlu1 %427  ;;  %v474_v52 = vmul.f32 0.0078125, %v426_v50  ;;  %v546_v53 = vmul.f32 %v6567_v49, %v6567_v49  ;;  %v5541_v50 = vld [vmem:[#allocation7 + $0xc4] ss:$8 sps:$4 sm:$0xff]  }
 0x10c   : > { %v475_v54 = vmul.f32 0.0078125, %v428_v51  ;;  %v547_v5 = vmul.f32 %v6570_v2, %v6570_v2  ;;  %v5543_v51 = vld [vmem:[#allocation7 + $0x1e4] ss:$8 sps:$4 sm:$0xff]  }
 0x10d   : > { %v6577_v55 = vsub.f32 %v6445_v6, %v474_v52  ;;  %602 = vadd.xlane.f32.xlu0 %v546_v53  ;;  %556 = vadd.xlane.f32.xlu1 %v523_v3  ;;  %v5534_v6 = vld [vmem:[#allocation7 + $0x100] ss:$8 sps:$4 sm:$0xff]  }
 0x10e   : > { %v6580_v4 = vsub.f32 %v6448_v7, %v475_v54  ;;  %v414_v56 = vpop.xlane.xlu0 %413  ;;  %1390 = vmatpush1.bf16.msra.mxu1 %v5534_v6  ;;  %v5545_v54 = vld [vmem:[#allocation7 + $0xc0] ss:$8 sps:$4 sm:$0xff]   ;;  %v5551_v6 = vld [vmem:[#allocation7 + $0xb0] ss:$8 sps:$4 sm:$0xff]  }
 0x10f   : > { %v416_v57 = vpop.xlane.xlu1 %415  ;;  %v468_v58 = vmul.f32 0.0078125, %v414_v56  ;;  %v538_v59 = vmul.f32 %v6577_v55, %v6577_v55  ;;  %1391 = vmatprep.subr.bf16.mxu1 %v5537_v41 }
 0x110   : > { %v469_v60 = vmul.f32 0.0078125, %v416_v57  ;;  %v539_v33 = vmul.f32 %v6580_v4, %v6580_v4 }
 0x111   : > { %v6587_v32 = vsub.f32 %v6451_v8, %v468_v58  ;;  %586 = vadd.xlane.f32.xlu0 %v538_v59  ;;  %604 = vadd.xlane.f32.xlu1 %v547_v5  ;;  %v5535_v8 = vld [vmem:[#allocation7 + $0xd4] ss:$8 sps:$4 sm:$0xff]   ;;  %v5546_v5 = vld [vmem:[#allocation7 + $0x1e0] ss:$8 sps:$4 sm:$0xff]  }
 0x112   : > { %v6590_v7 = vsub.f32 %v6454_v9, %v469_v60  ;;  %v398_v34 = vpop.xlane.xlu0 %397  ;;  %1322 = vmatprep.subr.bf16.mxu0 %v5535_v8  ;;  %1392 = vmatpush2.bf16.msra.mxu1 %v5540_v1  ;;  %v5547_v60 = vld [vmem:[#allocation7 + $0xb4] ss:$8 sps:$4 sm:$0xff]   ;;  %v5555_v8 = vld [vmem:[#allocation7 + $0x1c4] ss:$8 sps:$4 sm:$0xff]   ;;  %v5558_v1 = vld [vmem:[#allocation7 + $0x1c0] ss:$8 sps:$4 sm:$0xff]  }
 0x113   : > { %v400_v35 = vpop.xlane.xlu1 %399  ;;  %v460_v38 = vmul.f32 0.0078125, %v398_v34  ;;  %v532_v39 = vmul.f32 %v6587_v32, %v6587_v32  ;;  %1323 = vmatpush2.bf16.msra.mxu0 %v5539_v45  ;;  %1393 = vmatprep.subr.bf16.mxu1 %v5543_v51  ;;  %v5557_v45 = vld [vmem:[#allocation7 + $0xa0] ss:$8 sps:$4 sm:$0xff]  }
 0x114   : > { %v461_v40 = vmul.f32 0.0078125, %v400_v35  ;;  %v533_v0 = vmul.f32 %v6590_v7, %v6590_v7  ;;  %1324 = vmatprep.subr.bf16.mxu0 %v5541_v50  ;;  %v5561_v50 = vld [vmem:[#allocation7 + $0x1b4] ss:$8 sps:$4 sm:$0xff]  }
 0x115   : > { %v6597_v42 = vsub.f32 %v6459_v10, %v460_v38  ;;  %574 = vadd.xlane.f32.xlu0 %v532_v39  ;;  %588 = vadd.xlane.f32.xlu1 %v539_v33  ;;  %v5552_v33 = vld [vmem:[#allocation7 + $0x1d0] ss:$8 sps:$4 sm:$0xff]  }
 0x116   : > { %v6600_v9 = vsub.f32 %v6462_v11, %v461_v40  ;;  %v446_v46 = vpop.xlane.xlu0 %445  ;;  %1394 = vmatpush2.bf16.msra.mxu1 %v5546_v5  ;;  %v5553_v40 = vld [vmem:[#allocation7 + $0xa4] ss:$8 sps:$4 sm:$0xff]   ;;  %v5564_v5 = vld [vmem:[#allocation7 + $0x1b0] ss:$8 sps:$4 sm:$0xff]  }
 0x117   : > { %v448_v47 = vpop.xlane.xlu1 %447  ;;  %v484_v48 = vmul.f32 0.0078125, %v446_v46  ;;  %v524_v3 = vmul.f32 %v6597_v42, %v6597_v42  ;;  %1325 = vmatpush2.bf16.msra.mxu0 %v5545_v54  ;;  %1395 = vmatprep.subr.bf16.mxu1 %v5549_v61  ;;  %v5563_v54 = vld [vmem:[#allocation7 + $0x90] ss:$8 sps:$4 sm:$0xff]  }
 0x118   : > { %v485_v10 = vmul.f32 0.0078125, %v448_v47  ;;  %v525_v53 = vmul.f32 %v6600_v9, %v6600_v9  ;;  %1326 = vmatprep.subr.bf16.mxu0 %v5547_v60  ;;  %v5567_v60 = vld [vmem:[#allocation7 + $0x1a4] ss:$8 sps:$4 sm:$0xff]  }
 0x119   : > { %v6607_v11 = vsub.f32 %v6467_v12, %v484_v48  ;;  %558 = vadd.xlane.f32.xlu0 %v524_v3  ;;  %576 = vadd.xlane.f32.xlu1 %v533_v0 }
 0x11a   : > { %v6610_v52 = vsub.f32 %v6470_v13, %v485_v10  ;;  %v430_v56 = vpop.xlane.xlu0 %429  ;;  %1396 = vmatpush2.bf16.msra.mxu1 %v5552_v33  ;;  %v5559_v10 = vld [vmem:[#allocation7 + $0x94] ss:$8 sps:$4 sm:$0xff]   ;;  %v5570_v33 = vld [vmem:[#allocation7 + $0x1a0] ss:$8 sps:$4 sm:$0xff]  }
 0x11b   : > { %v432_v57 = vpop.xlane.xlu1 %431  ;;  %v476_v58 = vmul.f32 0.0078125, %v430_v56  ;;  %v548_v59 = vmul.f32 %v6607_v11, %v6607_v11  ;;  %1327 = vmatpush2.bf16.msra.mxu0 %v5551_v6  ;;  %1397 = vmatprep.subr.bf16.mxu1 %v5555_v8  ;;  %v5569_v6 = vld [vmem:[#allocation7 + $0x80] ss:$8 sps:$4 sm:$0xff]  }
 0x11c   : > { %v477_v12 = vmul.f32 0.0078125, %v432_v57  ;;  %v549_v63 = vmul.f32 %v6610_v52, %v6610_v52  ;;  %1328 = vmatprep.subr.bf16.mxu0 %v5553_v40 }
 0x11d   : > { %v6617_v13 = vsub.f32 %v6475_v14, %v476_v58  ;;  %606 = vadd.xlane.f32.xlu0 %v548_v59  ;;  %560 = vadd.xlane.f32.xlu1 %v525_v53 }
 0x11e   : > { %v6620_v62 = vsub.f32 %v6478_v15, %v477_v12  ;;  %v418_v34 = vpop.xlane.xlu0 %417  ;;  %1398 = vmatpush2.bf16.msra.mxu1 %v5558_v1  ;;  %v5565_v12 = vld [vmem:[#allocation7 + $0x84] ss:$8 sps:$4 sm:$0xff]  }
 0x11f   : > { %v420_v35 = vpop.xlane.xlu1 %419  ;;  %v470_v38 = vmul.f32 0.0078125, %v418_v34  ;;  %v540_v39 = vmul.f32 %v6617_v13, %v6617_v13  ;;  %1329 = vmatpush2.bf16.msra.mxu0 %v5557_v45  ;;  %1399 = vmatprep.subr.bf16.mxu1 %v5561_v50 }
 0x120   : > { %v471_v14 = vmul.f32 0.0078125, %v420_v35  ;;  %v541_v0 = vmul.f32 %v6620_v62, %v6620_v62  ;;  %1330 = vmatprep.subr.bf16.mxu0 %v5559_v10  ;;  %v5576_v10 = vld [vmem:[#allocation7 + $0x180] ss:$8 sps:$4 sm:$0xff]  }
 0x121   : > { %v6627_v15 = vsub.f32 %v6483_v16, %v470_v38  ;;  %590 = vadd.xlane.f32.xlu0 %v540_v39  ;;  %608 = vadd.xlane.f32.xlu1 %v549_v63 }
 0x122   : > { %v6630_v41 = vsub.f32 %v6486_v17, %v471_v14  ;;  %v402_v46 = vpop.xlane.xlu0 %401  ;;  %1400 = vmatpush2.bf16.msra.mxu1 %v5564_v5  ;;  %v5571_v14 = vld [vmem:[#allocation7 + $0x194] ss:$8 sps:$4 sm:$0xff]  }
 0x123   : > { %v404_v47 = vpop.xlane.xlu1 %403  ;;  %v462_v48 = vmul.f32 0.0078125, %v402_v46  ;;  %v534_v3 = vmul.f32 %v6627_v15, %v6627_v15  ;;  %1331 = vmatpush2.bf16.msra.mxu0 %v5563_v54  ;;  %1401 = vmatprep.subr.bf16.mxu1 %v5567_v60 }
 0x124   : > { %v463_v16 = vmul.f32 0.0078125, %v404_v47  ;;  %v535_v53 = vmul.f32 %v6630_v41, %v6630_v41  ;;  %1332 = vmatprep.subr.bf16.mxu0 %v5565_v12 }
 0x125   : > { %v6637_v17 = vsub.f32 %v6493_v18, %v462_v48  ;;  %578 = vadd.xlane.f32.xlu0 %v534_v3  ;;  %592 = vadd.xlane.f32.xlu1 %v541_v0  ;;  %v5573_v0 = vld [vmem:[#allocation7 + $0x190] ss:$8 sps:$4 sm:$0xff]  }
 0x126   : > { %v6640_v51 = vsub.f32 %v6496_v19, %v463_v16  ;;  %v450_v56 = vpop.xlane.xlu0 %449  ;;  %1402 = vmatpush2.bf16.msra.mxu1 %v5570_v33 }
 0x127   : > { %v452_v57 = vpop.xlane.xlu1 %451  ;;  %v486_v58 = vmul.f32 0.0078125, %v450_v56  ;;  %v526_v59 = vmul.f32 %v6637_v17, %v6637_v17  ;;  %1333 = vmatpush2.bf16.msra.mxu0 %v5569_v6  ;;  %1403 = vmatprep.subr.bf16.mxu1 %v5571_v14 }
 0x128   : > { %v487_v18 = vmul.f32 0.0078125, %v452_v57  ;;  %v527_v63 = vmul.f32 %v6640_v51, %v6640_v51 }
 0x129   : > { %v6647_v19 = vsub.f32 %v6501_v20, %v486_v58  ;;  %562 = vadd.xlane.f32.xlu0 %v526_v59  ;;  %580 = vadd.xlane.f32.xlu1 %v535_v53 }
 0x12a   : > { %v6650_v61 = vsub.f32 %v6504_v21, %v487_v18  ;;  %v434_v34 = vpop.xlane.xlu0 %433  ;;  %1404 = vmatpush2.bf16.msra.mxu1 %v5573_v0 }
 0x12b   : > { %v436_v35 = vpop.xlane.xlu1 %435  ;;  %v478_v38 = vmul.f32 0.0078125, %v434_v34  ;;  %v550_v39 = vmul.f32 %v6647_v19, %v6647_v19 }
 0x12c   : > { %v479_v20 = vmul.f32 0.0078125, %v436_v35  ;;  %v551_v8 = vmul.f32 %v6650_v61, %v6650_v61 }
 0x12d   : > { %v6657_v21 = vsub.f32 %v6509_v22, %v478_v38  ;;  %610 = vadd.xlane.f32.xlu0 %v550_v39  ;;  %564 = vadd.xlane.f32.xlu1 %v527_v63  ;;  %v5574_v22 = vld [vmem:[#allocation7 + $0x184] ss:$8 sps:$4 sm:$0xff]  }
 0x12e   : > { %v6660_v40 = vsub.f32 %v6512_v23, %v479_v20  ;;  %v422_v45 = vpop.xlane.xlu0 %421  ;;  %1405 = vmatprep.subr.bf16.mxu1 %v5574_v22 }
 0x12f   : > { %v424_v1 = vpop.xlane.xlu1 %423  ;;  %v472_v46 = vmul.f32 0.0078125, %v422_v45  ;;  %v542_v47 = vmul.f32 %v6657_v21, %v6657_v21  ;;  %1406 = vmatpush2.bf16.msra.mxu1 %v5576_v10 }
 0x130   : > { %v473_v48 = vmul.f32 0.0078125, %v424_v1  ;;  %v543_v16 = vmul.f32 %v6660_v40, %v6660_v40 }
 0x131   : > { %v6667_v3 = vsub.f32 %v6517_v24, %v472_v46  ;;  %594 = vadd.xlane.f32.xlu0 %v542_v47  ;;  %612 = vadd.xlane.f32.xlu1 %v551_v8 }
 0x132   : > { %v6670_v23 = vsub.f32 %v6520_v25, %v473_v48  ;;  %v406_v50 = vpop.xlane.xlu0 %405 }
 0x133   : > { %v408_v53 = vpop.xlane.xlu1 %407  ;;  %v464_v54 = vmul.f32 0.0078125, %v406_v50  ;;  %v536_v5 = vmul.f32 %v6667_v3, %v6667_v3 }
 0x134   : > { %v465_v56 = vmul.f32 0.0078125, %v408_v53  ;;  %v537_v57 = vmul.f32 %v6670_v23, %v6670_v23 }
 0x135   : > { %v6677_v24 = vsub.f32 %v6525_v26, %v464_v54  ;;  %582 = vadd.xlane.f32.xlu0 %v536_v5  ;;  %596 = vadd.xlane.f32.xlu1 %v543_v16 }
 0x136   : > { %v6680_v25 = vsub.f32 %v6528_v27, %v465_v56  ;;  %v454_v58 = vpop.xlane.xlu0 %453 }
 0x137   : > { %v456_v59 = vpop.xlane.xlu1 %455  ;;  %v488_v18 = vmul.f32 0.0078125, %v454_v58  ;;  %v528_v12 = vmul.f32 %v6677_v24, %v6677_v24 }
 0x138   : > { %v489_v60 = vmul.f32 0.0078125, %v456_v59  ;;  %v529_v27 = vmul.f32 %v6680_v25, %v6680_v25 }
 0x139   : > { %v6687_v63 = vsub.f32 %v6533_v28, %v488_v18  ;;  %566 = vadd.xlane.f32.xlu0 %v528_v12  ;;  %584 = vadd.xlane.f32.xlu1 %v537_v57 }
 0x13a   : > { %v6690_v26 = vsub.f32 %v6536_v29, %v489_v60  ;;  %v438_v6 = vpop.xlane.xlu0 %437 }
 0x13b   : > { %v440_v33 = vpop.xlane.xlu1 %439  ;;  %v480_v34 = vmul.f32 0.0078125, %v438_v6  ;;  %v552_v35 = vmul.f32 %v6687_v63, %v6687_v63 }
 0x13c   : > { %v481_v38 = vmul.f32 0.0078125, %v440_v33  ;;  %v553_v29 = vmul.f32 %v6690_v26, %v6690_v26 }
 0x13d   : > { %v6697_v39 = vsub.f32 %v6541_v30, %v480_v34  ;;  %614 = vadd.xlane.f32.xlu0 %v552_v35  ;;  %568 = vadd.xlane.f32.xlu1 %v529_v27 }
 0x13e   : > { %v6700_v28 = vsub.f32 %v6544_v31, %v481_v38 }
 0x13f   : > { %v544_v20 = vmul.f32 %v6697_v39, %v6697_v39 }
 0x140   : > { %v545_v14 = vmul.f32 %v6700_v28, %v6700_v28 }
 0x141   : > { %598 = vadd.xlane.f32.xlu0 %v544_v20  ;;  %616 = vadd.xlane.f32.xlu1 %v553_v29 }
 0x145   : > { %600 = vadd.xlane.f32.xlu1 %v545_v14 }
 0x18e   : > { %v571_v8 = vpop.xlane.xlu0 %570 }
 0x18f   : > { %v626_v30 = vmul.f32 0.0078125, %v571_v8 }
 0x191   : > { %v658_v0 = vadd.f32 1e-05, %v626_v30 }
 0x192   : > { %v555_v45 = vpop.xlane.xlu0 %554  ;;  %v573_v1 = vpop.xlane.xlu1 %572 }
 0x193   : > { %v618_v46 = vmul.f32 0.0078125, %v555_v45  ;;  %v627_v31 = vmul.f32 0.0078125, %v573_v1  ;;  %5577 = vrsqrt.f32 %v658_v0 }
 0x195   : > { %v659_v47 = vadd.f32 1e-05, %v627_v31  ;;  %v650_v48 = vadd.f32 1e-05, %v618_v46 }
 0x196   : > { %v603_v22 = vpop.xlane.xlu0 %602  ;;  %v557_v16 = vpop.xlane.xlu1 %556 }
 0x197   : > { %v642_v10 = vmul.f32 0.0078125, %v603_v22  ;;  %v619_v50 = vmul.f32 0.0078125, %v557_v16  ;;  %5579 = vrsqrt.f32 %v659_v47 }
 0x198   : > { %5581 = vrsqrt.f32 %v650_v48 }
 0x199   : > { %v651_v53 = vadd.f32 1e-05, %v619_v50  ;;  %v674_v54 = vadd.f32 1e-05, %v642_v10 }
 0x19a   : > { %v587_v5 = vpop.xlane.xlu0 %586  ;;  %v605_v56 = vpop.xlane.xlu1 %604 }
 0x19b   : > { %v634_v57 = vmul.f32 0.0078125, %v587_v5  ;;  %v643_v58 = vmul.f32 0.0078125, %v605_v56  ;;  %5583 = vrsqrt.f32 %v651_v53 }
 0x19c   : > { %5585 = vrsqrt.f32 %v674_v54 }
 0x19d   : > { %v675_v59 = vadd.f32 1e-05, %v643_v58  ;;  %v666_v18 = vadd.f32 1e-05, %v634_v57 }
 0x19e   : > { %v575_v12 = vpop.xlane.xlu0 %574  ;;  %v589_v60 = vpop.xlane.xlu1 %588 }
 0x19f   : > { %v628_v27 = vmul.f32 0.0078125, %v575_v12  ;;  %v635_v6 = vmul.f32 0.0078125, %v589_v60  ;;  %5587 = vrsqrt.f32 %v675_v59 }
 0x1a0   : > { %5589 = vrsqrt.f32 %v666_v18  ;;  %v5578_v29 = vpop.eup %5577 }
 0x1a1   : > { %v667_v33 = vadd.f32 1e-05, %v635_v6  ;;  %v660_v34 = vadd.f32 1e-05, %v628_v27  ;;  %v722_v46 = vmul.f32 %v5578_v29, %v6549_v36 }
 0x1a2   : > { %v559_v35 = vpop.xlane.xlu0 %558  ;;  %v577_v38 = vpop.xlane.xlu1 %576 }
 0x1a3   : > { %v620_v20 = vmul.f32 0.0078125, %v559_v35  ;;  %v629_v14 = vmul.f32 0.0078125, %v577_v38  ;;  %5591 = vrsqrt.f32 %v667_v33 }
 0x1a4   : > { %v5580_v8 = vpop.eup %5579  ;;  %5593 = vrsqrt.f32 %v660_v34 }
 0x1a5   : > { %v661_v30 = vadd.f32 1e-05, %v629_v14  ;;  %v652_v0 = vadd.f32 1e-05, %v620_v20  ;;  %v723_v31 = vmul.f32 %v5580_v8, %v6557_v43  ;;  %v5582_v47 = vpop.eup %5581 }
 0x1a6   : > { %v607_v45 = vpop.xlane.xlu0 %606  ;;  %v561_v1 = vpop.xlane.xlu1 %560  ;;  %v714_v56 = vmul.f32 %v5582_v47, %v6552_v37 }
 0x1a7   : > { %v644_v48 = vmul.f32 0.0078125, %v607_v45  ;;  %v621_v22 = vmul.f32 0.0078125, %v561_v1  ;;  %5595 = vrsqrt.f32 %v661_v30  ;;  %v750_v16 = vpack.c.bf16 %v723_v31, %v722_v46 }
 0x1a8   : > { %v5584_v10 = vpop.eup %5583  ;;  %5597 = vrsqrt.f32 %v652_v0 }
 0x1a9   : > { %v653_v50 = vadd.f32 1e-05, %v621_v22  ;;  %v676_v53 = vadd.f32 1e-05, %v644_v48  ;;  %4847 = vst [vmem:[#allocation2 + $0x20] sm:$0xff] %v750_v16   ;;  %1334 = vmatprep.mubr.bf16.mxu0 %v750_v16  ;;  %v715_v57 = vmul.f32 %v5584_v10, %v6560_v44  ;;  %v5586_v36 = vpop.eup %5585 }
 0x1aa   : > { %v591_v54 = vpop.xlane.xlu0 %590  ;;  %v609_v5 = vpop.xlane.xlu1 %608  ;;  %v738_v33 = vmul.f32 %v5586_v36, %v6567_v49 }
 0x1ab   : > { %v636_v58 = vmul.f32 0.0078125, %v591_v54  ;;  %v645_v43 = vmul.f32 0.0078125, %v609_v5  ;;  %5599 = vrsqrt.f32 %v653_v50  ;;  %v746_v59 = vpack.c.bf16 %v715_v57, %v714_v56 }
 0x1ac   : > { %v5588_v18 = vpop.eup %5587  ;;  %5601 = vrsqrt.f32 %v676_v53 }
 0x1ad   : > { %v677_v12 = vadd.f32 1e-05, %v645_v43  ;;  %v668_v60 = vadd.f32 1e-05, %v636_v58  ;;  %4768 = vst [vmem:[#allocation2] sm:$0xff] %v746_v59   ;;  %1335 = vmatmul.mubr.bf16.vlgmr.msra.gmra.mxu0 %v746_v59  ;;  %v739_v34 = vmul.f32 %v5588_v18, %v6570_v2  ;;  %v5590_v37 = vpop.eup %5589 }
 0x1ae   : > { %v579_v27 = vpop.xlane.xlu0 %578  ;;  %v593_v6 = vpop.xlane.xlu1 %592  ;;  %v730_v0 = vmul.f32 %v5590_v37, %v6577_v55 }
 0x1af   : > { %v630_v35 = vmul.f32 0.0078125, %v579_v27  ;;  %v637_v44 = vmul.f32 0.0078125, %v593_v6  ;;  %5603 = vrsqrt.f32 %v677_v12  ;;  %v758_v38 = vpack.c.bf16 %v739_v34, %v738_v33 }
 0x1b0   : > { %v5592_v29 = vpop.eup %5591  ;;  %5605 = vrsqrt.f32 %v668_v60 }
 0x1b1   : > { %v669_v20 = vadd.f32 1e-05, %v637_v44  ;;  %v662_v14 = vadd.f32 1e-05, %v630_v35  ;;  %4855 = vst [vmem:[#allocation2 + $0x60] sm:$0xff] %v758_v38   ;;  %1407 = vmatprep.mubr.bf16.mxu1 %v758_v38  ;;  %v731_v45 = vmul.f32 %v5592_v29, %v6580_v4  ;;  %v5594_v49 = vpop.eup %5593 }
 0x1b2   : > { %v563_v8 = vpop.xlane.xlu0 %562  ;;  %v581_v30 = vpop.xlane.xlu1 %580  ;;  %v724_v10 = vmul.f32 %v5594_v49, %v6587_v32 }
 0x1b3   : > { %v622_v1 = vmul.f32 0.0078125, %v563_v8  ;;  %v631_v2 = vmul.f32 0.0078125, %v581_v30  ;;  %5607 = vrsqrt.f32 %v669_v20  ;;  %v754_v46 = vpack.c.bf16 %v731_v45, %v730_v0 }
 0x1b4   : > { %v5596_v31 = vpop.eup %5595  ;;  %5609 = vrsqrt.f32 %v662_v14 }
 0x1b5   : > { %v663_v47 = vadd.f32 1e-05, %v631_v2  ;;  %v654_v48 = vadd.f32 1e-05, %v622_v1  ;;  %4851 = vst [vmem:[#allocation2 + $0x40] sm:$0xff] %v754_v46   ;;  %1408 = vmatmul.mubr.bf16.vlgmr.msra.gmra.mxu1 %v754_v46  ;;  %v725_v50 = vmul.f32 %v5596_v31, %v6590_v7  ;;  %v5598_v55 = vpop.eup %5597 }
 0x1b6   : > { %v611_v22 = vpop.xlane.xlu0 %610  ;;  %v565_v16 = vpop.xlane.xlu1 %564  ;;  %v716_v43 = vmul.f32 %v5598_v55, %v6597_v42 }
 0x1b7   : > { %v646_v53 = vmul.f32 0.0078125, %v611_v22  ;;  %v623_v4 = vmul.f32 0.0078125, %v565_v16  ;;  %5611 = vrsqrt.f32 %v663_v47  ;;  %v751_v54 = vpack.c.bf16 %v725_v50, %v724_v10 }
 0x1b8   : > { %v5600_v5 = vpop.eup %5599  ;;  %5613 = vrsqrt.f32 %v654_v48 }
 0x1b9   : > { %v655_v56 = vadd.f32 1e-05, %v623_v4  ;;  %v678_v57 = vadd.f32 1e-05, %v646_v53  ;;  %4848 = vst [vmem:[#allocation2 + $0x28] sm:$0xff] %v751_v54   ;;  %1344 = vmatprep.mubr.bf16.mxu0 %v751_v54  ;;  %v717_v59 = vmul.f32 %v5600_v5, %v6600_v9  ;;  %v5602_v32 = vpop.eup %5601 }
 0x1ba   : > { %v595_v36 = vpop.xlane.xlu0 %594  ;;  %v613_v58 = vpop.xlane.xlu1 %612  ;;  %v740_v37 = vmul.f32 %v5602_v32, %v6607_v11 }
 0x1bb   : > { %v638_v18 = vmul.f32 0.0078125, %v595_v36  ;;  %v647_v7 = vmul.f32 0.0078125, %v613_v58  ;;  %5615 = vrsqrt.f32 %v655_v56  ;;  %v747_v12 = vpack.c.bf16 %v717_v59, %v716_v43 }
 0x1bc   : > { %v5604_v60 = vpop.eup %5603  ;;  %5617 = vrsqrt.f32 %v678_v57 }
 0x1bd   : > { %v679_v27 = vadd.f32 1e-05, %v647_v7  ;;  %v670_v6 = vadd.f32 1e-05, %v638_v18  ;;  %4844 = vst [vmem:[#allocation2 + $0x8] sm:$0xff] %v747_v12   ;;  %1345 = vmatmul.mubr.bf16.gmra.mxu0 %v747_v12  ;;  %v741_v35 = vmul.f32 %v5604_v60, %v6610_v52  ;;  %v5606_v42 = vpop.eup %5605 }
 0x1be   : > { %v583_v33 = vpop.xlane.xlu0 %582  ;;  %v597_v34 = vpop.xlane.xlu1 %596  ;;  %v732_v0 = vmul.f32 %v5606_v42, %v6617_v13 }
 0x1bf   : > { %v632_v44 = vmul.f32 0.0078125, %v583_v33  ;;  %v639_v9 = vmul.f32 0.0078125, %v597_v34  ;;  %5619 = vrsqrt.f32 %v679_v27  ;;  %v759_v38 = vpack.c.bf16 %v741_v35, %v740_v37 }
 0x1c0   : > { %v5608_v29 = vpop.eup %5607  ;;  %5621 = vrsqrt.f32 %v670_v6 }
 0x1c1   : > { %v671_v20 = vadd.f32 1e-05, %v639_v9  ;;  %v664_v14 = vadd.f32 1e-05, %v632_v44  ;;  %4856 = vst [vmem:[#allocation2 + $0x68] sm:$0xff] %v759_v38   ;;  %1417 = vmatprep.mubr.bf16.mxu1 %v759_v38  ;;  %v733_v45 = vmul.f32 %v5608_v29, %v6620_v62  ;;  %v5610_v11 = vpop.eup %5609 }
 0x1c2   : > { %v567_v8 = vpop.xlane.xlu0 %566  ;;  %v585_v30 = vpop.xlane.xlu1 %584  ;;  %v726_v22 = vmul.f32 %v5610_v11, %v6627_v15 }
 0x1c3   : > { %v624_v49 = vmul.f32 0.0078125, %v567_v8  ;;  %v633_v52 = vmul.f32 0.0078125, %v585_v30  ;;  %5623 = vrsqrt.f32 %v671_v20  ;;  %v755_v1 = vpack.c.bf16 %v733_v45, %v732_v0 }
 0x1c4   : > { %v5612_v2 = vpop.eup %5611  ;;  %5625 = vrsqrt.f32 %v664_v14 }
 0x1c5   : > { %v665_v46 = vadd.f32 1e-05, %v633_v52  ;;  %v656_v31 = vadd.f32 1e-05, %v624_v49  ;;  %4852 = vst [vmem:[#allocation2 + $0x48] sm:$0xff] %v755_v1   ;;  %1418 = vmatmul.mubr.bf16.gmra.mxu1 %v755_v1  ;;  %v727_v16 = vmul.f32 %v5612_v2, %v6630_v41  ;;  %v5614_v13 = vpop.eup %5613 }
 0x1c6   : > { %v615_v47 = vpop.xlane.xlu0 %614  ;;  %v569_v48 = vpop.xlane.xlu1 %568  ;;  %v718_v56 = vmul.f32 %v5614_v13, %v6637_v17 }
 0x1c7   : > { %v648_v10 = vmul.f32 0.0078125, %v615_v47  ;;  %v625_v62 = vmul.f32 0.0078125, %v569_v48  ;;  %5627 = vrsqrt.f32 %v665_v46  ;;  %v752_v50 = vpack.c.bf16 %v727_v16, %v726_v22 }
 0x1c8   : > { %v5616_v55 = vpop.eup %5615  ;;  %5629 = vrsqrt.f32 %v656_v31 }
 0x1c9   : > { %v657_v53 = vadd.f32 1e-05, %v625_v62  ;;  %v680_v4 = vadd.f32 1e-05, %v648_v10  ;;  %4849 = vst [vmem:[#allocation2 + $0x30] sm:$0xff] %v752_v50   ;;  %1354 = vmatprep.mubr.bf16.mxu0 %v752_v50  ;;  %v719_v57 = vmul.f32 %v5616_v55, %v6640_v51  ;;  %v5618_v15 = vpop.eup %5617 }
 0x1ca   : > { %v599_v54 = vpop.xlane.xlu0 %598  ;;  %v617_v5 = vpop.xlane.xlu1 %616  ;;  %v742_v7 = vmul.f32 %v5618_v15, %v6647_v19 }
 0x1cb   : > { %v640_v36 = vmul.f32 0.0078125, %v599_v54  ;;  %v649_v41 = vmul.f32 0.0078125, %v617_v5  ;;  %5631 = vrsqrt.f32 %v657_v53  ;;  %v748_v58 = vpack.c.bf16 %v719_v57, %v718_v56 }
 0x1cc   : > { %v5620_v43 = vpop.eup %5619  ;;  %5633 = vrsqrt.f32 %v680_v4 }
 0x1cd   : > { %v672_v59 = vadd.f32 1e-05, %v640_v36  ;;  %v681_v32 = vadd.f32 1e-05, %v649_v41  ;;  %4845 = vst [vmem:[#allocation2 + $0x10] sm:$0xff] %v748_v58   ;;  %1355 = vmatmul.mubr.bf16.gmra.mxu0 %v748_v58  ;;  %v743_v12 = vmul.f32 %v5620_v43, %v6650_v61  ;;  %v5622_v60 = vpop.eup %5621 }
 0x1ce   : > { %v601_v18 = vpop.xlane.xlu1 %600  ;;  %v734_v33 = vmul.f32 %v5622_v60, %v6657_v21 }
 0x1cf   : > { %v641_v17 = vmul.f32 0.0078125, %v601_v18  ;;  %5635 = vrsqrt.f32 %v681_v32  ;;  %v760_v51 = vpack.c.bf16 %v743_v12, %v742_v7 }
 0x1d0   : > { %v5624_v27 = vpop.eup %5623  ;;  %5637 = vrsqrt.f32 %v672_v59 }
 0x1d1   : > { %v673_v6 = vadd.f32 1e-05, %v641_v17  ;;  %4857 = vst [vmem:[#allocation2 + $0x70] sm:$0xff] %v760_v51   ;;  %1427 = vmatprep.mubr.bf16.mxu1 %v760_v51  ;;  %v735_v34 = vmul.f32 %v5624_v27, %v6660_v40  ;;  %v5626_v37 = vpop.eup %5625 }
 0x1d2   : > { %v728_v19 = vmul.f32 %v5626_v37, %v6667_v3 }
 0x1d3   : > { %5639 = vrsqrt.f32 %v673_v6  ;;  %v756_v35 = vpack.c.bf16 %v735_v34, %v734_v33 }
 0x1d4   : > { %v5628_v42 = vpop.eup %5627 }
 0x1d5   : > { %4853 = vst [vmem:[#allocation2 + $0x50] sm:$0xff] %v756_v35   ;;  %1428 = vmatmul.mubr.bf16.gmra.mxu1 %v756_v35  ;;  %v729_v61 = vmul.f32 %v5628_v42, %v6670_v23  ;;  %v5630_v44 = vpop.eup %5629 }
 0x1d6   : > { %v720_v29 = vmul.f32 %v5630_v44, %v6677_v24 }
 0x1d7   : > { %v753_v9 = vpack.c.bf16 %v729_v61, %v728_v19 }
 0x1d8   : > { %v5632_v38 = vpop.eup %5631 }
 0x1d9   : > { %4850 = vst [vmem:[#allocation2 + $0x38] sm:$0xff] %v753_v9   ;;  %1364 = vmatprep.mubr.bf16.mxu0 %v753_v9  ;;  %v721_v21 = vmul.f32 %v5632_v38, %v6680_v25  ;;  %v5634_v40 = vpop.eup %5633  ;;  %v972_v25 = vlaneseq }
 0x1da   : > { %v744_v30 = vmul.f32 %v5634_v40, %v6687_v63  ;;  %v970_v63 = vld [vmem:[%s7936_s2] sm:$0x3] }
 0x1db   : > { %v749_v20 = vpack.c.bf16 %v721_v21, %v720_v29  ;;  %v973_v49 = vshrl.u32 %v972_v25, 7 }
 0x1dc   : > { %v5636_v14 = vpop.eup %5635 }
 0x1dd   : > { %v5638_v8 = vpop.eup %5637  ;;  %4846 = vst [vmem:[#allocation2 + $0x18] sm:$0xff] %v749_v20   ;;  %1365 = vmatmul.mubr.bf16.gmra.mxu0 %v749_v20  ;;  %v745_v3 = vmul.f32 %v5636_v14, %v6690_v26  ;;  %v974_v1 = vsub.s32 0, %v973_v49  ;;  %v978_v2 = vsub.s32 1, %v973_v49 }
 0x1de   : > { %v736_v45 = vmul.f32 %v5638_v8, %v6697_v39 }
 0x1df   : > { %v761_v0 = vpack.c.bf16 %v745_v3, %v744_v30  ;;  %v6743_v46 = vrot.slane %v970_v63, %v974_v1  ;;  %v6745_v39 = vrot.slane %v970_v63, %v978_v2 }
 0x1e0   : > { %v5640_v23 = vpop.eup %5639 }
 0x1e1   : > { %v737_v11 = vmul.f32 %v5640_v23, %v6700_v28  ;;  %4858 = vst [vmem:[#allocation2 + $0x78] sm:$0xff] %v761_v0   ;;  %1437 = vmatprep.mubr.bf16.mxu1 %v761_v0 }
 0x1e3   : > { %v757_v24 = vpack.c.bf16 %v737_v11, %v736_v45 }
 0x1e5   : > { %4854 = vst [vmem:[#allocation2 + $0x58] sm:$0xff] %v757_v24   ;;  %1438 = vmatmul.mubr.bf16.gmra.mxu1 %v757_v24 }
 0x26d   : > { %v1336_v52 = vpop.f32.mrf.mxu0 }
 0x26e   : > { %v1337_v47 = vadd.f32 %v1336_v52, %v6743_v46 }
 0x26f   : > { %v1338_v26 = vpop.f32.mrf.mxu0 }
 0x270   : > { %v1339_v48 = vadd.f32 %v1338_v26, %v6745_v39 }
 0x271   : > { %v1340_v28 = vpop.f32.mrf.mxu0 }
 0x272   : > { %v1341_v50 = vadd.f32 %v1340_v28, %v6743_v46 }
 0x273   : > { %v1342_v22 = vpop.f32.mrf.mxu0 }
 0x274   : > { %v1343_v55 = vadd.f32 %v1342_v22, %v6745_v39 }
 0x275   : > { %v1409_v31 = vpop.f32.mrf.mxu1 }
 0x276   : > { %v1410_v13 = vadd.f32 %v1409_v31, %v1337_v47 }
 0x277   : > { %v1411_v16 = vpop.f32.mrf.mxu1 }
 0x278   : > { %v1412_v10 = vadd.f32 %v1411_v16, %v1339_v48 }
 0x279   : > { %v1413_v62 = vpop.f32.mrf.mxu1 }
 0x27a   : > { %v4756_v53 = vpack.c.bf16 %v1412_v10, %v1410_v13  ;;  %v1414_v54 = vadd.f32 %v1413_v62, %v1341_v50 }
 0x27b   : > { %v1415_v4 = vpop.f32.mrf.mxu1 }
 0x27c   : > { %1496 = vst [vmem:[#allocation3] sm:$0xff] %v4756_v53  ;;  %v1416_v5 = vadd.f32 %v1415_v4, %v1343_v55 }
 0x27d   : > { %v1346_v56 = vpop.f32.mrf.mxu0 }
 0x27e   : > { %v4757_v57 = vpack.c.bf16 %v1416_v5, %v1414_v54  ;;  %v1347_v58 = vadd.f32 %v1346_v56, %v6743_v46 }
 0x27f   : > { %v1348_v15 = vpop.f32.mrf.mxu0 }
 0x280   : > { %1497 = vst [vmem:[#allocation3 + $0x8] sm:$0xff] %v4757_v57  ;;  %v1349_v43 = vadd.f32 %v1348_v15, %v6745_v39 }
 0x281   : > { %v1350_v36 = vpop.f32.mrf.mxu0 }
 0x282   : > { %v1351_v60 = vadd.f32 %v1350_v36, %v6743_v46 }
 0x283   : > { %v1352_v59 = vpop.f32.mrf.mxu0 }
 0x284   : > { %v1353_v17 = vadd.f32 %v1352_v59, %v6745_v39 }
 0x285   : > { %v1419_v41 = vpop.f32.mrf.mxu1 }
 0x286   : > { %v1420_v18 = vadd.f32 %v1419_v41, %v1347_v58 }
 0x287   : > { %v1421_v32 = vpop.f32.mrf.mxu1 }
 0x288   : > { %v1422_v7 = vadd.f32 %v1421_v32, %v1349_v43 }
 0x289   : > { %v1423_v12 = vpop.f32.mrf.mxu1 }
 0x28a   : > { %v4758_v51 = vpack.c.bf16 %v1422_v7, %v1420_v18  ;;  %v1424_v6 = vadd.f32 %v1423_v12, %v1351_v60 }
 0x28b   : > { %v1425_v27 = vpop.f32.mrf.mxu1 }
 0x28c   : > { %1498 = vst [vmem:[#allocation3 + $0x10] sm:$0xff] %v4758_v51  ;;  %v1426_v33 = vadd.f32 %v1425_v27, %v1353_v17 }
 0x28d   : > { %v1356_v34 = vpop.f32.mrf.mxu0 }
 0x28e   : > { %v4759_v37 = vpack.c.bf16 %v1426_v33, %v1424_v6  ;;  %v1357_v61 = vadd.f32 %v1356_v34, %v6743_v46 }
 0x28f   : > { %v1358_v35 = vpop.f32.mrf.mxu0 }
 0x290   : > { %1499 = vst [vmem:[#allocation3 + $0x18] sm:$0xff] %v4759_v37  ;;  %v1359_v44 = vadd.f32 %v1358_v35, %v6745_v39 }
 0x291   : > { %v1360_v42 = vpop.f32.mrf.mxu0 }
 0x292   : > { %v1361_v20 = vadd.f32 %v1360_v42, %v6743_v46 }
 0x293   : > { %v1362_v9 = vpop.f32.mrf.mxu0 }
 0x294   : > { %v1363_v14 = vadd.f32 %v1362_v9, %v6745_v39 }
 0x295   : > { %v1429_v19 = vpop.f32.mrf.mxu1 }
 0x296   : > { %v1430_v29 = vadd.f32 %v1429_v19, %v1357_v61 }
 0x297   : > { %v1431_v38 = vpop.f32.mrf.mxu1 }
 0x298   : > { %v1432_v21 = vadd.f32 %v1431_v38, %v1359_v44 }
 0x299   : > { %v1433_v40 = vpop.f32.mrf.mxu1 }
 0x29a   : > { %v4760_v8 = vpack.c.bf16 %v1432_v21, %v1430_v29  ;;  %v1434_v3 = vadd.f32 %v1433_v40, %v1361_v20 }
 0x29b   : > { %v1435_v30 = vpop.f32.mrf.mxu1 }
 0x29c   : > { %1500 = vst [vmem:[#allocation3 + $0x20] sm:$0xff] %v4760_v8  ;;  %v1436_v23 = vadd.f32 %v1435_v30, %v1363_v14 }
 0x29d   : > { %v1366_v0 = vpop.f32.mrf.mxu0 }
 0x29e   : > { %v4761_v45 = vpack.c.bf16 %v1436_v23, %v1434_v3  ;;  %v1367_v49 = vadd.f32 %v1366_v0, %v6743_v46 }
 0x29f   : > { %v1368_v11 = vpop.f32.mrf.mxu0 }
 0x2a0   : > { %1501 = vst [vmem:[#allocation3 + $0x28] sm:$0xff] %v4761_v45  ;;  %v1369_v52 = vadd.f32 %v1368_v11, %v6745_v39 }
 0x2a1   : > { %v1370_v24 = vpop.f32.mrf.mxu0 }
 0x2a2   : > { %v1371_v31 = vadd.f32 %v1370_v24, %v6743_v46 }
 0x2a3   : > { %v1372_v1 = vpop.f32.mrf.mxu0 }
 0x2a4   : > { %v1373_v47 = vadd.f32 %v1372_v1, %v6745_v39 }
 0x2a5   : > { %v1439_v25 = vpop.f32.mrf.mxu1 }
 0x2a6   : > { %v1440_v63 = vadd.f32 %v1439_v25, %v1367_v49 }
 0x2a7   : > { %v1441_v2 = vpop.f32.mrf.mxu1 }
 0x2a8   : > { %v1442_v26 = vadd.f32 %v1441_v2, %v1369_v52 }
 0x2a9   : > { %v1443_v28 = vpop.f32.mrf.mxu1 }
 0x2aa   : > { %v4762_v48 = vpack.c.bf16 %v1442_v26, %v1440_v63  ;;  %v1444_v16 = vadd.f32 %v1443_v28, %v1371_v31 }
 0x2ab   : > { %v1445_v22 = vpop.f32.mrf.mxu1 }
 0x2ac   : > { %1502 = vst [vmem:[#allocation3 + $0x30] sm:$0xff] %v4762_v48  ;;  %v1446_v13 = vadd.f32 %v1445_v22, %v1373_v47 }
 0x2ae   : > { %v4763_v10 = vpack.c.bf16 %v1446_v13, %v1444_v16 }
 0x2b0   : > { %1503 = vst [vmem:[#allocation3 + $0x38] sm:$0xff] %v4763_v10 }
 0x2b1 PF: > { %v5641_v62 = vld [vmem:[#allocation9 + $0x38] sm:$0xff]   ;;  %s4585_s17 = sshll.u32 %s6155_s30, 7  ;;  %v5642_v50 = vld [vmem:[#allocation9 + $0x30] sm:$0xff]   ;;  %v5643_v46 = vld [vmem:[#allocation9 + $0x28] sm:$0xff]   ;;  %vm1785_vm0 = vcmask 261120   ;;  %s6181_s20 = smov 96  }
 0x2b2   : > { %s1505_s23 = sshra.s32 %s4585_s17, 3  ;;  %5011 = vmatprep.subr.bf16.mxu0 %v5641_v62  ;;  %v5644_v39 = vld [vmem:[#allocation9 + $0x20] sm:$0xff]   ;;  %v5645_v53 = vld [vmem:[#allocation9 + $0x18] sm:$0xff]   ;;  %v5646_v4 = vld [vmem:[#allocation9 + $0x10] sm:$0xff]   ;;  %vm1919_vm1 = vcmask 523264   ;;  %s6182_s9 = smov 64  }
 0x2b3   : > { %s4586_s22 = sshll.u32 %s1505_s23, 2  ;;  %5012 = vmatpush3.bf16.msra.mxu0 %v5641_v62  ;;  %v5658_v5 = vld [vmem:[#allocation3 + $0x20] ss:$8 sps:$4 sm:$0xff]   ;;  %v5659_v15 = vld [vmem:[#allocation3 + $0x10] ss:$8 sps:$4 sm:$0xff]   ;;  %s6183_s24 = smov 32  }
 0x2b4   : > { %5013 = vmatprep.subr.bf16.mxu0 %v5642_v50  ;;  %s6764_s27 = scalar_lea.vmem [#allocation2], %s4586_s22  ;;  %v5647_v57 = vld [vmem:[#allocation9 + $0x8] sm:$0xff]   ;;  %v1817_v36 = vsel %vm1785_vm0, %v5658_v5, 0  ;;  %2287 = vrot.lane.b32.xlu1 %v5659_v15, %s6181_s20  ;;  %v5648_v41 = vld [vmem:[#allocation9] sm:$0xff]   ;;  %v1814_v59 = vsel %vm1785_vm0, %v5659_v15, 0  ;;  %s7983_s15 = sld [smem:[#allocation18_spill]] }
 0x2b5   : > { %v5649_v55 = vld [vmem:[%s6764_s27] sm:$0xff]   ;;  %v5650_v58 = vld [vmem:[%s6764_s27 + $0x8] sm:$0xff]   ;;  %v5651_v43 = vld [vmem:[%s6764_s27 + $0x10] sm:$0xff]   ;;  %s4718_s21 = sshll.u32 %s6155_s30, 4  ;;  %s7986_s30 = sld [smem:[#allocation20_spill]] }
 0x2b6   : > { %5027 = vmatprep.mubr.bf16.mxu0 %v5649_v55  ;;  %v5652_v32 = vld [vmem:[%s6764_s27 + $0x18] sm:$0xff]   ;;  %v5653_v18 = vld [vmem:[%s6764_s27 + $0x20] sm:$0xff]   ;;  %v5654_v7 = vld [vmem:[%s6764_s27 + $0x28] sm:$0xff]   ;;  %s4346_s17 = sshll.u32 %s6417_s7, 4  ;;  %s7874_s5 = scalar_lea.sflag [#allocation6], %s352_s8  ;;  %s7867_s17 = int_to_ptr.vmem [resolvable:$true] %s4346_s17 }
 0x2b7   : > { %5014 = vmatpush3.bf16.msra.mxu0 %v5642_v50  ;;  %v5657_v54 = vld [vmem:[#allocation3 + $0x30] ss:$8 sps:$4 sm:$0xff]   ;;  %v6783_v17 = vld [vmem:[#allocation3] ss:$8 sps:$4 sm:$0xff]   ;;  %v6839_v48 = vld [vmem:[#allocation3 + $0x34] ss:$8 sps:$4 sm:$0xff]  }
 0x2b8   : > { %5015 = vmatprep.subr.bf16.mxu0 %v5643_v46  ;;  %2291 = vrot.lane.b32.xlu0 %v5657_v54, %s6181_s20  ;;  %v1820_v56 = vsel %vm1785_vm0, %v5657_v54, 0  ;;  %v5655_v12 = vld [vmem:[%s6764_s27 + $0x30] sm:$0xff]   ;;  %v5656_v60 = vld [vmem:[%s6764_s27 + $0x38] sm:$0xff]   ;;  %v1811_v51 = vsel %vm1785_vm0, %v6783_v17, 0  ;;  %v6795_v33 = vld [vmem:[%s7938_s4] ss:$0 sm:$0xff] }
 0x2b9   : > { %5323 = vmatprep.subr.msk.bf16.mxu1 %vm1785_vm0, %v5657_v54  ;;  %2285 = vrot.lane.b32.xlu1 %v6783_v17, %s6181_s20  ;;  %v6847_v62 = vld [vmem:[#allocation3 + $0x24] ss:$8 sps:$4 sm:$0xff]   ;;  %s7987_s27 = sld [smem:[#allocation30_spill]] }
 0x2ba   : > { %5044 = vmatpush3.bf16.xpose.msra.mxu1 %v1820_v56  ;;  %s4719_s19 = sshll.u32 %s7983_s15, 5 }
 0x2bb   : > { %5016 = vmatpush3.bf16.msra.mxu0 %v5643_v46  ;;  %5324 = vmatprep.subr.msk.bf16.mxu1 %vm1785_vm0, %v5658_v5  ;;  %s4343_s14 = sadd.s32 %s4719_s19, %s4718_s21  ;;  %p7989_p7 = scmp.ne.s32.totalorder %s7986_s30, 0 }
 0x2bc   : > { %5017 = vmatprep.subr.bf16.mxu0 %v5644_v39  ;;  %2289 = vrot.lane.b32.xlu0 %v5658_v5, %s6181_s20  ;;  %s4720_s16 = sshll.u32 %s4343_s14, 7 }
 0x2bf   : > { %5018 = vmatpush3.bf16.msra.mxu0 %v5644_v39  ;;  %s7865_s3 = scalar_lea.hbm %s7987_s27, %s4720_s16 }
 0x2c0   : > { %5019 = vmatprep.subr.bf16.mxu0 %v5645_v53 }
 0x2c2   : > { %5046 = vmatpush3.bf16.xpose.msra.mxu1 %v1817_v36 }
 0x2c3   : > { %5020 = vmatpush3.bf16.msra.mxu0 %v5645_v53  ;;  %5325 = vmatprep.subr.msk.bf16.mxu1 %vm1785_vm0, %v5659_v15 }
 0x2c4   : > { %5021 = vmatprep.subr.bf16.mxu0 %v5646_v4 }
 0x2c7   : > { %5022 = vmatpush3.bf16.msra.mxu0 %v5646_v4 }
 0x2c8   : > { %5023 = vmatprep.subr.bf16.mxu0 %v5647_v57 }
 0x2ca   : > { %5048 = vmatpush3.bf16.xpose.msra.mxu1 %v1814_v59 }
 0x2cb   : > { %5024 = vmatpush3.bf16.msra.mxu0 %v5647_v57  ;;  %5326 = vmatprep.subr.msk.bf16.mxu1 %vm1785_vm0, %v6783_v17 }
 0x2cc   : > { %5025 = vmatprep.subr.bf16.mxu0 %v5648_v41 }
 0x2cf   : > { %5026 = vmatpush3.bf16.msra.mxu0 %v5648_v41 }
 0x2d0   : > { %5067 = vmatprep.subr.bf16.mxu0 %v6839_v48 }
 0x2d2   : > { %5028 = vmatmul.mubr.bf16.vlgmr.msra.gmra.mxu0 %v5650_v58  ;;  %5050 = vmatpush3.bf16.xpose.msra.mxu1 %v1811_v51 }
 0x2d3   : > { %5031 = vmatprep.mubr.bf16.mxu0 %v5651_v43  ;;  %5068 = vmatpush3.bf16.msra.mxu0 %v6839_v48 }
 0x2d4   : > { %5069 = vmatprep.subr.bf16.mxu0 %v6847_v62 }
 0x2d7   : > { %5070 = vmatpush3.bf16.msra.mxu0 %v6847_v62 }
 0x2da   : > { %5032 = vmatmul.mubr.bf16.gmra.mxu0 %v5652_v32 }
 0x2db   : > { %5035 = vmatprep.mubr.bf16.mxu0 %v5653_v18 }
 0x2e2   : > { %5036 = vmatmul.mubr.bf16.gmra.mxu0 %v5654_v7 }
 0x2e3   : > { %5039 = vmatprep.mubr.bf16.mxu0 %v5655_v12 }
 0x2ea   : > { %5040 = vmatmul.mubr.bf16.gmra.mxu0 %v5656_v60 }
 0x326   : > { %v2288_v1 = vpop.permute.xlu1 %2287 }
 0x327   : > { %v2321_v10 = vsel %vm1785_vm0, %v2288_v1, 0 }
 0x32a   : > { %v2292_v27 = vpop.permute.xlu0 %2291 }
 0x32b   : > { %5327 = vmatprep.subr.msk.bf16.mxu1 %vm1785_vm0, %v2292_v27  ;;  %v2327_v40 = vsel %vm1785_vm0, %v2292_v27, 0  ;;  %v2286_v46 = vpop.permute.xlu1 %2285 }
 0x32c   : > { %v2318_v57 = vsel %vm1785_vm0, %v2286_v46, 0 }
 0x32e   : > { %v2290_v20 = vpop.permute.xlu0 %2289 }
 0x32f   : > { %v2324_v49 = vsel %vm1785_vm0, %v2290_v20, 0 }
 0x392   : > { %v5029_v6 = vpop.f32.mrf.mxu0 }
 0x393   : > { %v1687_v35 = vadd.f32 %v5029_v6, %v6795_v33 }
 0x394   : > { %v1678_v34 = vpop.f32.mrf.mxu0 }
 0x395   : > { %v1679_v61 = vadd.f32 %v6795_v33, %v1678_v34 }
 0x396   : > { %v5030_v37 = vpop.f32.mrf.mxu0 }
 0x397   : > { %v1690_v42 = vadd.f32 %v5030_v37, %v6795_v33 }
 0x398   : > { %v1681_v19 = vpop.f32.mrf.mxu0 }
 0x399   : > { %v6800_v44 = vpack.c.bf16 %v1690_v42, %v1687_v35  ;;  %v1682_v9 = vadd.f32 %v6795_v33, %v1681_v19 }
 0x39a   : > { %v5033_v38 = vpop.f32.mrf.mxu0 }
 0x39b   : > { %v6803_v29 = vpack.c.bf16 %v1682_v9, %v1679_v61  ;;  %2271 = vrot.lane.b32.xlu1 %v6800_v44, %s6181_s20  ;;  %v1703_v8 = vadd.f32 %v5033_v38, %v6795_v33 }
 0x39c   : > { %v1694_v21 = vpop.f32.mrf.mxu0 }
 0x39d   : > { %2269 = vrot.lane.b32.xlu0 %v6803_v29, %s6181_s20  ;;  %5051 = vmatprep.mubr.msk.bf16.mxu1 %vm1785_vm0, %v6803_v29  ;;  %v1695_v23 = vadd.f32 %v6795_v33, %v1694_v21 }
 0x39e   : > { %v5034_v14 = vpop.f32.mrf.mxu0  ;;  %5052 = vmatmul.mubr.msk.bf16.vlgmr.msra.gmra.mxu1 %vm1785_vm0, %v6800_v44 }
 0x39f   : > { %v1706_v30 = vadd.f32 %v5034_v14, %v6795_v33  ;;  %5092 = vmatpush3.bf16.xpose.msra.mxu1 %v2327_v40 }
 0x3a0   : > { %v1697_v3 = vpop.f32.mrf.mxu0  ;;  %5328 = vmatprep.subr.msk.bf16.mxu1 %vm1785_vm0, %v2290_v20 }
 0x3a1   : > { %v6818_v0 = vpack.c.bf16 %v1706_v30, %v1703_v8  ;;  %v1698_v45 = vadd.f32 %v6795_v33, %v1697_v3 }
 0x3a2   : > { %v5037_v11 = vpop.f32.mrf.mxu0 }
 0x3a3   : > { %v6821_v24 = vpack.c.bf16 %v1698_v45, %v1695_v23  ;;  %2275 = vrot.lane.b32.xlu1 %v6818_v0, %s6181_s20  ;;  %v1719_v52 = vadd.f32 %v5037_v11, %v6795_v33 }
 0x3a4   : > { %v1710_v25 = vpop.f32.mrf.mxu0 }
 0x3a5   : > { %2273 = vrot.lane.b32.xlu0 %v6821_v24, %s6181_s20  ;;  %5055 = vmatprep.mubr.msk.bf16.mxu1 %vm1785_vm0, %v6821_v24  ;;  %v1711_v28 = vadd.f32 %v6795_v33, %v1710_v25 }
 0x3a6   : > { %v5038_v2 = vpop.f32.mrf.mxu0  ;;  %5056 = vmatmul.mubr.msk.bf16.gmra.mxu1 %vm1785_vm0, %v6818_v0 }
 0x3a7   : > { %v1722_v63 = vadd.f32 %v5038_v2, %v6795_v33  ;;  %5094 = vmatpush3.bf16.xpose.msra.mxu1 %v2324_v49 }
 0x3a8   : > { %v1713_v26 = vpop.f32.mrf.mxu0  ;;  %5329 = vmatprep.subr.msk.bf16.mxu1 %vm1785_vm0, %v2288_v1 }
 0x3a9   : > { %v6836_v31 = vpack.c.bf16 %v1722_v63, %v1719_v52  ;;  %v1714_v47 = vadd.f32 %v6795_v33, %v1713_v26 }
 0x3aa   : > { %v5041_v22 = vpop.f32.mrf.mxu0 }
 0x3ab   : > { %v6841_v16 = vpack.c.bf16 %v1714_v47, %v1711_v28  ;;  %2279 = vrot.lane.b32.xlu1 %v6836_v31, %s6181_s20  ;;  %v1735_v50 = vadd.f32 %v5041_v22, %v6795_v33  ;;  %v6960_v22 = vld [vmem:[#allocation3 + $0x14] ss:$8 sps:$4 sm:$0xff]  }
 0x3ac   : > { %v1726_v13 = vpop.f32.mrf.mxu0  ;;  %5071 = vmatprep.subr.bf16.mxu0 %v6960_v22 }
 0x3ad   : > { %2277 = vrot.lane.b32.xlu0 %v6841_v16, %s6181_s20  ;;  %5059 = vmatprep.mubr.msk.bf16.mxu1 %vm1785_vm0, %v6841_v16  ;;  %v1727_v55 = vadd.f32 %v6795_v33, %v1726_v13  ;;  %v6964_v13 = vld [vmem:[#allocation3 + $0x4] ss:$8 sps:$4 sm:$0xff]  }
 0x3ae   : > { %v5042_v39 = vpop.f32.mrf.mxu0  ;;  %5060 = vmatmul.mubr.msk.bf16.gmra.mxu1 %vm1785_vm0, %v6836_v31  ;;  %5072 = vmatpush3.bf16.msra.mxu0 %v6960_v22 }
 0x3af   : > { %v1738_v53 = vadd.f32 %v5042_v39, %v6795_v33  ;;  %5096 = vmatpush3.bf16.xpose.msra.mxu1 %v2321_v10  ;;  %5073 = vmatprep.subr.bf16.mxu0 %v6964_v13 }
 0x3b0   : > { %v1729_v4 = vpop.f32.mrf.mxu0  ;;  %5330 = vmatprep.subr.msk.bf16.mxu1 %vm1785_vm0, %v2286_v46 }
 0x3b1   : > { %v6862_v54 = vpack.c.bf16 %v1738_v53, %v1735_v50  ;;  %v1730_v5 = vadd.f32 %v6795_v33, %v1729_v4 }
 0x3b2   : > { %5074 = vmatpush3.bf16.msra.mxu0 %v6964_v13 }
 0x3b3   : > { %v6865_v56 = vpack.c.bf16 %v1730_v5, %v1727_v55  ;;  %2283 = vrot.lane.b32.xlu1 %v6862_v54, %s6181_s20 }
 0x3b5   : > { %2281 = vrot.lane.b32.xlu0 %v6865_v56, %s6181_s20  ;;  %5063 = vmatprep.mubr.msk.bf16.mxu1 %vm1785_vm0, %v6865_v56 }
 0x3b6   : > { %5064 = vmatmul.mubr.msk.bf16.gmra.mxu1 %vm1785_vm0, %v6862_v54 }
 0x3b7   : > { %5098 = vmatpush3.bf16.xpose.msra.mxu1 %v2318_v57  ;;  %2616 = vrot.lane.b32.xlu1 %v6839_v48, %s6181_s20 }
 0x3bb   : > { %2614 = vrot.lane.b32.xlu1 %v6847_v62, %s6181_s20 }
 0x40d   : > { %v2272_v36 = vpop.permute.xlu1 %2271 }
 0x40f   : > { %v2270_v15 = vpop.permute.xlu0 %2269 }
 0x410   : > { %5099 = vmatprep.mubr.msk.bf16.mxu1 %vm1785_vm0, %v2270_v15 }
 0x411   : > { %5100 = vmatmul.mubr.msk.bf16.vlgmr.msra.gmra.mxu1 %vm1785_vm0, %v2272_v36 }
 0x415   : > { %v2276_v58 = vpop.permute.xlu1 %2275 }
 0x417   : > { %v2274_v41 = vpop.permute.xlu0 %2273 }
 0x418   : > { %5103 = vmatprep.mubr.msk.bf16.mxu1 %vm1785_vm0, %v2274_v41 }
 0x419   : > { %5104 = vmatmul.mubr.msk.bf16.gmra.mxu1 %vm1785_vm0, %v2276_v58 }
 0x41d   : > { %v2280_v59 = vpop.permute.xlu1 %2279 }
 0x41f   : > { %v2278_v43 = vpop.permute.xlu0 %2277 }
 0x420   : > { %5107 = vmatprep.mubr.msk.bf16.mxu1 %vm1785_vm0, %v2278_v43 }
 0x421   : > { %5108 = vmatmul.mubr.msk.bf16.gmra.mxu1 %vm1785_vm0, %v2280_v59 }
 0x425   : > { %v2284_v32 = vpop.permute.xlu1 %2283 }
 0x427   : > { %v2282_v18 = vpop.permute.xlu0 %2281 }
 0x428   : > { %5111 = vmatprep.mubr.msk.bf16.mxu1 %vm1785_vm0, %v2282_v18 }
 0x429   : > { %5112 = vmatmul.mubr.msk.bf16.gmra.mxu1 %vm1785_vm0, %v2284_v32  ;;  %v6902_v34 = vpop.permute.xlu1 %2616 }
 0x42a   : > { %5315 = vmatprep.subr.bf16.mxu1 %v6902_v34  ;;  %5115 = vmatprep.subr.bf16.mxu0 %v6902_v34 }
 0x42b   : > { %5319 = vmatpush3.bf16.msra.mxu1 %v6902_v34 }
 0x42d   : > { %v6918_v38 = vpop.permute.xlu1 %2614 }
 0x42e   : > { %5316 = vmatprep.subr.bf16.mxu1 %v6918_v38 }
 0x42f   : > { %5320 = vmatpush3.bf16.msra.mxu1 %v6918_v38 }
 0x45e   : > { %v6888_v7 = vpop.f32.mrf.mxu1 }
 0x45f   : > { %v1926_v12 = vsel %vm1919_vm1, %v6888_v7, -inf }
 0x460   : > { %1927 = vmax.xlane.f32.xlu0 %v1926_v12  ;;  %v6892_v60 = vpop.f32.mrf.mxu1 }
 0x461   : > { %v1920_v27 = vsel %vm1919_vm1, %v6892_v60, -inf }
 0x462   : > { %v6894_v51 = vpop.f32.mrf.mxu1 }
 0x463   : > { %v1929_v35 = vsel %vm1919_vm1, %v6894_v51, -inf }
 0x464   : > { %1921 = vmax.xlane.f32.xlu0 %v1920_v27  ;;  %v6898_v6 = vpop.f32.mrf.mxu1 }
 0x465   : > { %v1923_v33 = vsel %vm1919_vm1, %v6898_v6, -inf }
 0x466   : > { %1924 = vmax.xlane.f32.xlu1 %v1923_v33  ;;  %v6904_v37 = vpop.f32.mrf.mxu1 }
 0x467   : > { %v1938_v19 = vsel %vm1919_vm1, %v6904_v37, -inf }
 0x468   : > { %1930 = vmax.xlane.f32.xlu0 %v1929_v35  ;;  %v6910_v42 = vpop.f32.mrf.mxu1 }
 0x469   : > { %v1932_v40 = vsel %vm1919_vm1, %v6910_v42, -inf }
 0x46a   : > { %1939 = vmax.xlane.f32.xlu1 %v1938_v19  ;;  %v6914_v61 = vpop.f32.mrf.mxu1 }
 0x46b   : > { %v1941_v9 = vsel %vm1919_vm1, %v6914_v61, -inf }
 0x46c   : > { %1942 = vmax.xlane.f32.xlu0 %v1941_v9  ;;  %v6920_v21 = vpop.f32.mrf.mxu1 }
 0x46d   : > { %v1935_v14 = vsel %vm1919_vm1, %v6920_v21, -inf }
 0x46e   : > { %1933 = vmax.xlane.f32.xlu1 %v1932_v40  ;;  %v6926_v20 = vpop.f32.mrf.mxu1 }
 0x46f   : > { %v1950_v30 = vsel %vm1919_vm1, %v6926_v20, -inf }
 0x470   : > { %1936 = vmax.xlane.f32.xlu0 %v1935_v14  ;;  %v6930_v8 = vpop.f32.mrf.mxu1 }
 0x471   : > { %v1944_v11 = vsel %vm1919_vm1, %v6930_v8, -inf }
 0x472   : > { %1951 = vmax.xlane.f32.xlu1 %v1950_v30  ;;  %v6934_v3 = vpop.f32.mrf.mxu1 }
 0x473   : > { %v1953_v23 = vsel %vm1919_vm1, %v6934_v3, -inf }
 0x474   : > { %1954 = vmax.xlane.f32.xlu0 %v1953_v23  ;;  %v6938_v45 = vpop.f32.mrf.mxu1 }
 0x475   : > { %v1947_v49 = vsel %vm1919_vm1, %v6938_v45, -inf }
 0x476   : > { %1945 = vmax.xlane.f32.xlu1 %v1944_v11  ;;  %v6942_v25 = vpop.f32.mrf.mxu1 }
 0x477   : > { %v1962_v52 = vsel %vm1919_vm1, %v6942_v25, -inf }
 0x478   : > { %1948 = vmax.xlane.f32.xlu0 %v1947_v49  ;;  %v6948_v1 = vpop.f32.mrf.mxu1 }
 0x479   : > { %v1956_v26 = vsel %vm1919_vm1, %v6948_v1, -inf }
 0x47a   : > { %1963 = vmax.xlane.f32.xlu1 %v1962_v52  ;;  %v6950_v2 = vpop.f32.mrf.mxu1 }
 0x47b   : > { %v1965_v63 = vsel %vm1919_vm1, %v6950_v2, -inf }
 0x47c   : > { %1966 = vmax.xlane.f32.xlu0 %v1965_v63  ;;  %v6956_v28 = vpop.f32.mrf.mxu1 }
 0x47d   : > { %v1959_v47 = vsel %vm1919_vm1, %v6956_v28, -inf }
 0x47e   : > { %1957 = vmax.xlane.f32.xlu1 %v1956_v26 }
 0x480   : > { %1960 = vmax.xlane.f32.xlu0 %v1959_v47 }
 0x4d1   : > { %v6969_v10 = vpop.f32.mrf.mxu1 }
 0x4d2   : > { %v2432_v50 = vsel %vm1919_vm1, %v6969_v10, -inf }
 0x4d3   : > { %2433 = vmax.xlane.f32.xlu1 %v2432_v50  ;;  %v6973_v46 = vpop.f32.mrf.mxu1 }
 0x4d4   : > { %v2426_v55 = vsel %vm1919_vm1, %v6973_v46, -inf }
 0x4d5   : > { %v6975_v39 = vpop.f32.mrf.mxu1 }
 0x4d6   : > { %v2435_v53 = vsel %vm1919_vm1, %v6975_v39, -inf }
 0x4d7   : > { %2427 = vmax.xlane.f32.xlu1 %v2426_v55  ;;  %v6981_v4 = vpop.f32.mrf.mxu1  ;;  %2436 = vmax.xlane.f32.xlu0 %v2435_v53 }
 0x4d8   : > { %v2429_v15 = vsel %vm1919_vm1, %v6981_v4, -inf }
 0x4d9   : > { %v6983_v5 = vpop.f32.mrf.mxu1 }
 0x4da   : > { %v2444_v57 = vsel %vm1919_vm1, %v6983_v5, -inf }
 0x4db   : > { %2445 = vmax.xlane.f32.xlu1 %v2444_v57  ;;  %v6989_v36 = vpop.f32.mrf.mxu1  ;;  %2430 = vmax.xlane.f32.xlu0 %v2429_v15 }
 0x4dc   : > { %v2438_v58 = vsel %vm1919_vm1, %v6989_v36, -inf }
 0x4dd   : > { %v6991_v41 = vpop.f32.mrf.mxu1 }
 0x4de   : > { %v2447_v43 = vsel %vm1919_vm1, %v6991_v41, -inf }
 0x4df   : > { %2439 = vmax.xlane.f32.xlu1 %v2438_v58  ;;  %v6997_v59 = vpop.f32.mrf.mxu1  ;;  %2448 = vmax.xlane.f32.xlu0 %v2447_v43 }
 0x4e0   : > { %v2441_v12 = vsel %vm1919_vm1, %v6997_v59, -inf }
 0x4e1   : > { %v6999_v32 = vpop.f32.mrf.mxu1 }
 0x4e2   : > { %v2456_v18 = vsel %vm1919_vm1, %v6999_v32, -inf }
 0x4e3   : > { %2457 = vmax.xlane.f32.xlu1 %v2456_v18  ;;  %v7005_v27 = vpop.f32.mrf.mxu1  ;;  %2442 = vmax.xlane.f32.xlu0 %v2441_v12 }
 0x4e4   : > { %v2450_v35 = vsel %vm1919_vm1, %v7005_v27, -inf }
 0x4e5   : > { %v7007_v33 = vpop.f32.mrf.mxu1 }
 0x4e6   : > { %v2459_v19 = vsel %vm1919_vm1, %v7007_v33, -inf }
 0x4e7   : > { %2451 = vmax.xlane.f32.xlu1 %v2450_v35  ;;  %v7013_v9 = vpop.f32.mrf.mxu1  ;;  %2460 = vmax.xlane.f32.xlu0 %v2459_v19 }
 0x4e8   : > { %v2453_v11 = vsel %vm1919_vm1, %v7013_v9, -inf }
 0x4e9   : > { %v1928_v40 = vpop.xlane.xlu0 %1927  ;;  %v7015_v14 = vpop.f32.mrf.mxu1 }
 0x4ea   : > { %v1970_v30 = vsub.f32 %v6888_v7, %v1928_v40  ;;  %v2468_v23 = vsel %vm1919_vm1, %v7015_v14, -inf }
 0x4eb   : > { %2469 = vmax.xlane.f32.xlu1 %v2468_v23  ;;  %v7022_v49 = vpop.f32.mrf.mxu1  ;;  %2454 = vmax.xlane.f32.xlu0 %v2453_v11 }
 0x4ec   : > { %v1988_v52 = vmul.f32 1.442695, %v1970_v30  ;;  %v2462_v63 = vsel %vm1919_vm1, %v7022_v49, -inf }
 0x4ed   : > { %v1922_v26 = vpop.xlane.xlu0 %1921  ;;  %v7026_v47 = vpop.f32.mrf.mxu1 }
 0x4ee   : > { %5673 = vpow2.f32 %v1988_v52  ;;  %v1968_v7 = vsub.f32 %v6892_v60, %v1922_v26  ;;  %v2471_v50 = vsel %vm1919_vm1, %v7026_v47, -inf }
 0x4ef   : > { %v1925_v55 = vpop.xlane.xlu1 %1924  ;;  %2463 = vmax.xlane.f32.xlu1 %v2462_v63  ;;  %2472 = vmax.xlane.f32.xlu0 %v2471_v50  ;;  %v7031_v53 = vpop.f32.mrf.mxu1 }
 0x4f0   : > { %v1984_v57 = vmul.f32 1.442695, %v1968_v7  ;;  %v1969_v15 = vsub.f32 %v6898_v6, %v1925_v55  ;;  %v2465_v58 = vsel %vm1919_vm1, %v7031_v53, -inf }
 0x4f1   : > { %v1931_v43 = vpop.xlane.xlu0 %1930 }
 0x4f2   : > { %5675 = vpow2.f32 %v1984_v57  ;;  %v1971_v18 = vsub.f32 %v6894_v51, %v1931_v43  ;;  %v1986_v12 = vmul.f32 1.442695, %v1969_v15 }
 0x4f3   : > { %v1940_v60 = vpop.xlane.xlu1 %1939  ;;  %2466 = vmax.xlane.f32.xlu0 %v2465_v58 }
 0x4f4   : > { %v1990_v35 = vmul.f32 1.442695, %v1971_v18  ;;  %v1974_v19 = vsub.f32 %v6904_v37, %v1940_v60 }
 0x4f5   : > { %v1943_v40 = vpop.xlane.xlu0 %1942 }
 0x4f6   : > { %5677 = vpow2.f32 %v1990_v35  ;;  %v1996_v30 = vmul.f32 1.442695, %v1974_v19  ;;  %v1975_v23 = vsub.f32 %v6914_v61, %v1943_v40 }
 0x4f7   : > { %5679 = vpow2.f32 %v1986_v12  ;;  %v1934_v6 = vpop.xlane.xlu1 %1933 }
 0x4f8   : > { %5681 = vpow2.f32 %v1996_v30  ;;  %v1998_v11 = vmul.f32 1.442695, %v1975_v23  ;;  %v1972_v52 = vsub.f32 %v6910_v42, %v1934_v6 }
 0x4f9   : > { %v1937_v63 = vpop.xlane.xlu0 %1936 }
 0x4fa   : > { %v1992_v26 = vmul.f32 1.442695, %v1972_v52  ;;  %v1973_v51 = vsub.f32 %v6920_v21, %v1937_v63  ;;  %5683 = vpow2.f32 %v1998_v11 }
 0x4fb   : > { %v7041_v7 = vpop.eup %5673  ;;  %v1952_v50 = vpop.xlane.xlu1 %1951 }
 0x4fc   : > { %5685 = vpow2.f32 %v1992_v26  ;;  %v1994_v37 = vmul.f32 1.442695, %v1973_v51  ;;  %v1978_v55 = vsub.f32 %v6926_v20, %v1952_v50  ;;  %v2022_v61 = vsel %vm1919_vm1, %v7041_v7, 0.0 }
 0x4fd   : > { %v1955_v57 = vpop.xlane.xlu0 %1954  ;;  %2023 = vadd.xlane.f32.xlu1 %v2022_v61 }
 0x4fe   : > { %v2004_v15 = vmul.f32 1.442695, %v1978_v55  ;;  %v1979_v42 = vsub.f32 %v6934_v3, %v1955_v57  ;;  %5687 = vpow2.f32 %v1994_v37 }
 0x4ff   : > { %v7047_v58 = vpop.eup %5675  ;;  %v1946_v21 = vpop.xlane.xlu1 %1945 }
 0x500   : > { %5689 = vpow2.f32 %v2004_v15  ;;  %v2006_v43 = vmul.f32 1.442695, %v1979_v42  ;;  %v1976_v18 = vsub.f32 %v6930_v8, %v1946_v21  ;;  %v2016_v12 = vsel %vm1919_vm1, %v7047_v58, 0.0 }
 0x501   : > { %v1949_v20 = vpop.xlane.xlu0 %1948  ;;  %2017 = vadd.xlane.f32.xlu1 %v2016_v12 }
 0x502   : > { %v2000_v60 = vmul.f32 1.442695, %v1976_v18  ;;  %v1977_v35 = vsub.f32 %v6938_v45, %v1949_v20  ;;  %5691 = vpow2.f32 %v2006_v43 }
 0x503   : > { %v7053_v19 = vpop.eup %5677  ;;  %v1964_v3 = vpop.xlane.xlu1 %1963 }
 0x504   : > { %v7055_v40 = vpop.eup %5679  ;;  %5693 = vpow2.f32 %v2000_v60  ;;  %v2002_v30 = vmul.f32 1.442695, %v1977_v35  ;;  %v1982_v23 = vsub.f32 %v6942_v25, %v1964_v3  ;;  %v2025_v8 = vsel %vm1919_vm1, %v7053_v19, 0.0 }
 0x505   : > { %v7060_v6 = vpop.eup %5681  ;;  %v1967_v11 = vpop.xlane.xlu0 %1966  ;;  %2026 = vadd.xlane.f32.xlu0 %v2025_v8  ;;  %v2019_v37 = vsel %vm1919_vm1, %v7055_v40, 0.0 }
 0x506   : > { %v2012_v52 = vmul.f32 1.442695, %v1982_v23  ;;  %v1983_v45 = vsub.f32 %v6950_v2, %v1967_v11  ;;  %v2034_v63 = vsel %vm1919_vm1, %v7060_v6, 0.0  ;;  %5695 = vpow2.f32 %v2002_v30 }
 0x507   : > { %v1958_v26 = vpop.xlane.xlu1 %1957  ;;  %2035 = vadd.xlane.f32.xlu1 %v2034_v63  ;;  %v7065_v51 = vpop.eup %5683 }
 0x508   : > { %5697 = vpow2.f32 %v2012_v52  ;;  %v2014_v25 = vmul.f32 1.442695, %v1983_v45  ;;  %v1980_v50 = vsub.f32 %v6948_v1, %v1958_v26  ;;  %v2037_v1 = vsel %vm1919_vm1, %v7065_v51, 0.0 }
 0x509   : > { %v7070_v55 = vpop.eup %5685  ;;  %2020 = vadd.xlane.f32.xlu0 %v2019_v37  ;;  %v1961_v61 = vpop.xlane.xlu0 %1960 }
 0x50a   : > { %v2008_v2 = vmul.f32 1.442695, %v1980_v50  ;;  %v1981_v57 = vsub.f32 %v6956_v28, %v1961_v61  ;;  %v2028_v15 = vsel %vm1919_vm1, %v7070_v55, 0.0  ;;  %5699 = vpow2.f32 %v2014_v25 }
 0x50b   : > { %2029 = vadd.xlane.f32.xlu1 %v2028_v15  ;;  %v7075_v42 = vpop.eup %5687 }
 0x50c   : > { %5701 = vpow2.f32 %v2008_v2  ;;  %v2010_v21 = vmul.f32 1.442695, %v1981_v57  ;;  %v2031_v12 = vsel %vm1919_vm1, %v7075_v42, 0.0 }
 0x50d   : > { %v7079_v43 = vpop.eup %5689  ;;  %2038 = vadd.xlane.f32.xlu0 %v2037_v1 }
 0x50e   : > { %v2046_v18 = vsel %vm1919_vm1, %v7079_v43, 0.0  ;;  %5703 = vpow2.f32 %v2010_v21 }
 0x50f   : > { %2047 = vadd.xlane.f32.xlu1 %v2046_v18  ;;  %v7083_v28 = vpop.eup %5691 }
 0x510   : > { %v2049_v3 = vsel %vm1919_vm1, %v7083_v28, 0.0 }
 0x511   : > { %v7087_v20 = vpop.eup %5693  ;;  %2032 = vadd.xlane.f32.xlu0 %v2031_v12 }
 0x512   : > { %v2040_v60 = vsel %vm1919_vm1, %v7087_v20, 0.0 }
 0x513   : > { %2041 = vadd.xlane.f32.xlu1 %v2040_v60  ;;  %v7091_v35 = vpop.eup %5695 }
 0x514   : > { %v2043_v11 = vsel %vm1919_vm1, %v7091_v35, 0.0 }
 0x515   : > { %v7095_v30 = vpop.eup %5697  ;;  %2050 = vadd.xlane.f32.xlu0 %v2049_v3 }
 0x516   : > { %v2058_v23 = vsel %vm1919_vm1, %v7095_v30, 0.0 }
 0x517   : > { %2059 = vadd.xlane.f32.xlu1 %v2058_v23  ;;  %v7099_v8 = vpop.eup %5699 }
 0x518   : > { %v2061_v63 = vsel %vm1919_vm1, %v7099_v8, 0.0 }
 0x519   : > { %v7103_v52 = vpop.eup %5701  ;;  %2044 = vadd.xlane.f32.xlu0 %v2043_v11 }
 0x51a   : > { %v2052_v45 = vsel %vm1919_vm1, %v7103_v52, 0.0 }
 0x51b   : > { %2053 = vadd.xlane.f32.xlu1 %v2052_v45  ;;  %v7109_v26 = vpop.eup %5703 }
 0x51c   : > { %v2055_v25 = vsel %vm1919_vm1, %v7109_v26, 0.0 }
 0x51d   : > { %2062 = vadd.xlane.f32.xlu0 %v2061_v63 }
 0x521   : > { %2056 = vadd.xlane.f32.xlu0 %v2055_v25 }
 0x55c   : > { %v2434_v50 = vpop.xlane.xlu1 %2433 }
 0x55d   : > { %v2476_v37 = vsub.f32 %v6969_v10, %v2434_v50 }
 0x55f   : > { %v2494_v61 = vmul.f32 1.442695, %v2476_v37 }
 0x560   : > { %v2428_v2 = vpop.xlane.xlu1 %2427  ;;  %v2437_v57 = vpop.xlane.xlu0 %2436 }
 0x561   : > { %5705 = vpow2.f32 %v2494_v61  ;;  %v2474_v15 = vsub.f32 %v6973_v46, %v2428_v2  ;;  %v2477_v21 = vsub.f32 %v6975_v39, %v2437_v57 }
 0x563   : > { %v2490_v1 = vmul.f32 1.442695, %v2474_v15  ;;  %v2496_v18 = vmul.f32 1.442695, %v2477_v21 }
 0x564   : > { %v2446_v12 = vpop.xlane.xlu1 %2445  ;;  %v2431_v60 = vpop.xlane.xlu0 %2430 }
 0x565   : > { %5707 = vpow2.f32 %v2490_v1  ;;  %v2480_v3 = vsub.f32 %v6983_v5, %v2446_v12  ;;  %v2475_v23 = vsub.f32 %v6981_v4, %v2431_v60 }
 0x566   : > { %5709 = vpow2.f32 %v2496_v18 }
 0x567   : > { %v2502_v11 = vmul.f32 1.442695, %v2480_v3  ;;  %v2492_v10 = vmul.f32 1.442695, %v2475_v23 }
 0x568   : > { %v2440_v45 = vpop.xlane.xlu1 %2439  ;;  %v2449_v63 = vpop.xlane.xlu0 %2448 }
 0x569   : > { %5711 = vpow2.f32 %v2502_v11  ;;  %v2478_v25 = vsub.f32 %v6989_v36, %v2440_v45  ;;  %v2481_v46 = vsub.f32 %v6991_v41, %v2449_v63 }
 0x56a   : > { %5713 = vpow2.f32 %v2492_v10 }
 0x56b   : > { %v2498_v39 = vmul.f32 1.442695, %v2478_v25  ;;  %v2504_v50 = vmul.f32 1.442695, %v2481_v46 }
 0x56c   : > { %v2458_v37 = vpop.xlane.xlu1 %2457  ;;  %v2443_v61 = vpop.xlane.xlu0 %2442 }
 0x56d   : > { %5715 = vpow2.f32 %v2498_v39  ;;  %v2484_v5 = vsub.f32 %v6999_v32, %v2458_v37  ;;  %v2479_v4 = vsub.f32 %v6997_v59, %v2443_v61 }
 0x56e   : > { %v7122_v2 = vpop.eup %5705  ;;  %5717 = vpow2.f32 %v2504_v50 }
 0x56f   : > { %v2500_v57 = vmul.f32 1.442695, %v2479_v4  ;;  %v2528_v15 = vsel %vm1919_vm1, %v7122_v2, 0.0  ;;  %v2510_v36 = vmul.f32 1.442695, %v2484_v5 }
 0x570   : > { %v2452_v21 = vpop.xlane.xlu1 %2451  ;;  %2529 = vadd.xlane.f32.xlu1 %v2528_v15  ;;  %v2461_v41 = vpop.xlane.xlu0 %2460 }
 0x571   : > { %v2482_v1 = vsub.f32 %v7005_v27, %v2452_v21  ;;  %5719 = vpow2.f32 %v2500_v57  ;;  %v2485_v60 = vsub.f32 %v7007_v33, %v2461_v41 }
 0x572   : > { %v7127_v18 = vpop.eup %5707  ;;  %5721 = vpow2.f32 %v2510_v36 }
 0x573   : > { %v7129_v12 = vpop.eup %5709  ;;  %v2522_v59 = vsel %vm1919_vm1, %v7127_v18, 0.0  ;;  %v2506_v32 = vmul.f32 1.442695, %v2482_v1  ;;  %v2512_v25 = vmul.f32 1.442695, %v2485_v60 }
 0x574   : > { %v2470_v3 = vpop.xlane.xlu1 %2469  ;;  %2523 = vadd.xlane.f32.xlu1 %v2522_v59  ;;  %v2531_v23 = vsel %vm1919_vm1, %v7129_v12, 0.0  ;;  %v2455_v11 = vpop.xlane.xlu0 %2454 }
 0x575   : > { %2532 = vadd.xlane.f32.xlu0 %v2531_v23  ;;  %v2488_v45 = vsub.f32 %v7015_v14, %v2470_v3  ;;  %5723 = vpow2.f32 %v2506_v32  ;;  %v2483_v33 = vsub.f32 %v7013_v9, %v2455_v11 }
 0x576   : > { %v7136_v27 = vpop.eup %5711  ;;  %5725 = vpow2.f32 %v2512_v25 }
 0x577   : > { %v7138_v10 = vpop.eup %5713  ;;  %v2540_v63 = vsel %vm1919_vm1, %v7136_v27, 0.0  ;;  %v2518_v14 = vmul.f32 1.442695, %v2488_v45  ;;  %v2508_v15 = vmul.f32 1.442695, %v2483_v33 }
 0x578   : > { %2541 = vadd.xlane.f32.xlu1 %v2540_v63  ;;  %v2464_v46 = vpop.xlane.xlu1 %2463  ;;  %v2525_v39 = vsel %vm1919_vm1, %v7138_v10, 0.0  ;;  %v2473_v50 = vpop.xlane.xlu0 %2472 }
 0x579   : > { %v2486_v37 = vsub.f32 %v7022_v49, %v2464_v46  ;;  %2526 = vadd.xlane.f32.xlu0 %v2525_v39  ;;  %v2489_v57 = vsub.f32 %v7026_v47, %v2473_v50 }
 0x57a   : > { %v7147_v61 = vpop.eup %5715 }
 0x57b   : > { %v7149_v5 = vpop.eup %5717  ;;  %v2514_v4 = vmul.f32 1.442695, %v2486_v37  ;;  %v2534_v9 = vsel %vm1919_vm1, %v7147_v61, 0.0  ;;  %v2520_v21 = vmul.f32 1.442695, %v2489_v57 }
 0x57c   : > { %2535 = vadd.xlane.f32.xlu1 %v2534_v9  ;;  %v2543_v36 = vsel %vm1919_vm1, %v7149_v5, 0.0  ;;  %v7172_v11 = vpop.xlane.xlu0 %2466 }
 0x57d   : > { %5727 = vpow2.f32 %v2514_v4  ;;  %2544 = vadd.xlane.f32.xlu0 %v2543_v36 }
 0x57e   : > { %v7156_v49 = vpop.eup %5719  ;;  %5729 = vpow2.f32 %v2518_v14 }
 0x57f   : > { %5731 = vpow2.f32 %v2508_v15  ;;  %v2537_v41 = vsel %vm1919_vm1, %v7156_v49, 0.0  ;;  %v7160_v47 = vpop.eup %5721 }
 0x580   : > { %5733 = vpow2.f32 %v2520_v21  ;;  %v2552_v1 = vsel %vm1919_vm1, %v7160_v47, 0.0 }
 0x581   : > { %2538 = vadd.xlane.f32.xlu0 %v2537_v41 }
 0x582   : > { %v7164_v59 = vpop.eup %5723 }
 0x583   : > { %v2546_v60 = vsel %vm1919_vm1, %v7164_v59, 0.0  ;;  %v7168_v3 = vpop.eup %5725 }
 0x584   : > { %v2555_v33 = vsel %vm1919_vm1, %v7168_v3, 0.0 }
 0x585   : > { %2553 = vadd.xlane.f32.xlu0 %v2552_v1 }
 0x586   : > { %v2024_v32 = vpop.xlane.xlu1 %2023 }
 0x589   : > { %2547 = vadd.xlane.f32.xlu0 %v2546_v60 }
 0x58a   : > { %v7170_v23 = vpop.eup %5727  ;;  %v2018_v25 = vpop.xlane.xlu1 %2017 }
 0x58b   : > { %v2558_v45 = vsel %vm1919_vm1, %v7170_v23, 0.0  ;;  %v7176_v63 = vpop.eup %5729 }
 0x58c   : > { %2559 = vadd.xlane.f32.xlu1 %v2558_v45  ;;  %v7180_v46 = vpop.eup %5731  ;;  %v2564_v50 = vsel %vm1919_vm1, %v7176_v63, 0.0 }
 0x58d   : > { %2556 = vadd.xlane.f32.xlu0 %v2555_v33  ;;  %v7184_v37 = vpop.eup %5733  ;;  %v2549_v4 = vsel %vm1919_vm1, %v7180_v46, 0.0 }
 0x58e   : > { %v2027_v39 = vpop.xlane.xlu0 %2026  ;;  %v2567_v9 = vsel %vm1919_vm1, %v7184_v37, 0.0 }
 0x58f   : > { %5735 = vrcp.f32 %v2027_v39 }
 0x590   : > { %2565 = vadd.xlane.f32.xlu1 %v2564_v50  ;;  %v2036_v14 = vpop.xlane.xlu1 %2035  ;;  %5737 = vrcp.f32 %v2018_v25 }
 0x591   : > { %2550 = vadd.xlane.f32.xlu0 %v2549_v4  ;;  %5739 = vrcp.f32 %v2024_v32 }
 0x592   : > { %v2021_v57 = vpop.xlane.xlu0 %2020 }
 0x593   : > { %5741 = vrcp.f32 %v2021_v57 }
 0x594   : > { %v2030_v15 = vpop.xlane.xlu1 %2029  ;;  %2568 = vadd.xlane.f32.xlu1 %v2567_v9 }
 0x596   : > { %v2039_v36 = vpop.xlane.xlu0 %2038 }
 0x597   : > { %5743 = vrcp.f32 %v2039_v36 }
 0x598   : > { %v2048_v21 = vpop.xlane.xlu1 %2047  ;;  %5745 = vrcp.f32 %v2030_v15 }
 0x599   : > { %5747 = vrcp.f32 %v2036_v14 }
 0x59a   : > { %v2033_v41 = vpop.xlane.xlu0 %2032 }
 0x59b   : > { %5749 = vrcp.f32 %v2033_v41 }
 0x59c   : > { %v2042_v1 = vpop.xlane.xlu1 %2041  ;;  %v5736_v60 = vpop.eup %5735 }
 0x59d   : > { %v5738_v45 = vpop.eup %5737  ;;  %v2083_v39 = vmul.f32 %v5736_v60, %v7053_v19 }
 0x59e   : > { %v2051_v25 = vpop.xlane.xlu0 %2050  ;;  %v5740_v33 = vpop.eup %5739  ;;  %v2080_v4 = vmul.f32 %v5738_v45, %v7047_v58 }
 0x59f   : > { %5751 = vrcp.f32 %v2051_v25  ;;  %v2082_v9 = vmul.f32 %v5740_v33, %v7041_v7 }
 0x5a0   : > { %v5742_v32 = vpop.eup %5741  ;;  %v2060_v50 = vpop.xlane.xlu1 %2059  ;;  %5753 = vrcp.f32 %v2042_v1 }
 0x5a1   : > { %v2081_v57 = vmul.f32 %v5742_v32, %v7055_v40  ;;  %5755 = vrcp.f32 %v2048_v21  ;;  %v2097_v36 = vpack.c.bf16 %v2083_v39, %v2082_v9  ;;  %v2487_v32 = vsub.f32 %v7031_v53, %v7172_v11  ;;  %v7213_v39 = vld [vmem:[#allocation3 + $0x10] ss:$8 sps:$4 sm:$0xff]  }
 0x5a2   : > { %v2045_v14 = vpop.xlane.xlu0 %2044 }
 0x5a3   : > { %5757 = vrcp.f32 %v2045_v14  ;;  %v2096_v15 = vpack.c.bf16 %v2081_v57, %v2080_v4 }
 0x5a4   : > { %v5744_v41 = vpop.eup %5743  ;;  %v2054_v60 = vpop.xlane.xlu1 %2053 }
 0x5a5   : > { %2610 = vrot.lane.b32.xlu1 %v6964_v13, %s6181_s20  ;;  %5075 = vmatprep.mubr.msk.bf16.mxu0 %vm1919_vm1, %v2096_v15  ;;  %v5746_v19 = vpop.eup %5745  ;;  %v2087_v40 = vmul.f32 %v5744_v41, %v7065_v51  ;;  %v7203_v13 = vld [vmem:[#allocation3 + $0x20] ss:$8 sps:$4 sm:$0xff]  }
 0x5a6   : > { %5076 = vmatmul.mubr.msk.bf16.vlgmr.msra.gmra.mxu0 %vm1919_vm1, %v2097_v36  ;;  %v2063_v58 = vpop.xlane.xlu0 %2062  ;;  %v5748_v1 = vpop.eup %5747  ;;  %v2084_v21 = vmul.f32 %v5746_v19, %v7070_v55 }
 0x5a7   : > { %2612 = vrot.lane.b32.xlu0 %v6960_v22, %s6181_s20  ;;  %5116 = vmatpush3.bf16.msra.mxu0 %v6902_v34  ;;  %5759 = vrcp.f32 %v2063_v58  ;;  %v2086_v34 = vmul.f32 %v5748_v1, %v7060_v6  ;;  %s7988_s20 = smov %s7987_s27 }
 0x5a8   : > { %v5750_v7 = vpop.eup %5749  ;;  %5117 = vmatprep.subr.bf16.mxu0 %v6918_v38  ;;  %5761 = vrcp.f32 %v2054_v60 }
 0x5a9   : > { %3041 = vrot.lane.b32.xlu1 %v7203_v13, %s6182_s9  ;;  %v2085_v45 = vmul.f32 %v5750_v7, %v7075_v42  ;;  %5763 = vrcp.f32 %v2060_v50  ;;  %v2099_v51 = vpack.c.bf16 %v2087_v40, %v2086_v34  ;;  %v2516_v50 = vmul.f32 1.442695, %v2487_v32 }
 0x5aa   : > { %v2057_v22 = vpop.xlane.xlu0 %2056 }
 0x5ab   : > { %5118 = vmatpush3.bf16.msra.mxu0 %v6918_v38  ;;  %5765 = vrcp.f32 %v2057_v22  ;;  %v2098_v25 = vpack.c.bf16 %v2085_v45, %v2084_v21 }
 0x5ac   : > { %v5752_v33 = vpop.eup %5751  ;;  %5767 = vpow2.f32 %v2516_v50 }
 0x5ad   : > { %3039 = vrot.lane.b32.xlu1 %v7213_v39, %s6182_s9  ;;  %5079 = vmatprep.mubr.msk.bf16.mxu0 %vm1919_vm1, %v2098_v25  ;;  %v5754_v55 = vpop.eup %5753  ;;  %v2091_v38 = vmul.f32 %v5752_v33, %v7083_v28 }
 0x5ae   : > { %5080 = vmatmul.mubr.msk.bf16.gmra.mxu0 %vm1919_vm1, %v2099_v51  ;;  %v5756_v6 = vpop.eup %5755  ;;  %v2088_v53 = vmul.f32 %v5754_v55, %v7087_v20 }
 0x5af   : > { %v2090_v4 = vmul.f32 %v5756_v6, %v7079_v43 }
 0x5b0   : > { %v5758_v42 = vpop.eup %5757 }
 0x5b1   : > { %3037 = vrot.lane.b32.xlu1 %v6783_v17, %s6182_s9  ;;  %v2089_v11 = vmul.f32 %v5758_v42, %v7091_v35  ;;  %v2101_v9 = vpack.c.bf16 %v2091_v38, %v2090_v4 }
 0x5b3   : > { %v2100_v57 = vpack.c.bf16 %v2089_v11, %v2088_v53 }
 0x5b4   : > { %v5760_v14 = vpop.eup %5759 }
 0x5b5   : > { %3023 = vrot.lane.b32.xlu1 %v6800_v44, %s6182_s9  ;;  %5083 = vmatprep.mubr.msk.bf16.mxu0 %vm1919_vm1, %v2100_v57  ;;  %v5762_v28 = vpop.eup %5761  ;;  %v2095_v20 = vmul.f32 %v5760_v14, %v7099_v8 }
 0x5b6   : > { %5084 = vmatmul.mubr.msk.bf16.gmra.mxu0 %vm1919_vm1, %v2101_v9  ;;  %v5764_v15 = vpop.eup %5763  ;;  %v2092_v43 = vmul.f32 %v5762_v28, %v7103_v52  ;;  %v5665_v9 = vld [vmem:[#allocation10 + $0x8] sm:$0xff]  }
 0x5b7   : > { %v2094_v36 = vmul.f32 %v5764_v15, %v7095_v30  ;;  %v7249_v30 = vld [vmem:[#allocation3 + $0x30] ss:$8 sps:$4 sm:$0xff]  }
 0x5b8   : > { %v5766_v17 = vpop.eup %5765 }
 0x5b9   : > { %3027 = vrot.lane.b32.xlu1 %v6818_v0, %s6182_s9  ;;  %v2093_v35 = vmul.f32 %v5766_v17, %v7109_v26  ;;  %v2103_v19 = vpack.c.bf16 %v2095_v20, %v2094_v36  ;;  %v7241_v8 = vpop.eup %5767  ;;  %v5666_v36 = vld [vmem:[#allocation10] sm:$0xff]  }
 0x5ba   : > { %v2561_v52 = vsel %vm1919_vm1, %v7241_v8, 0.0 }
 0x5bb   : > { %v2102_v41 = vpack.c.bf16 %v2093_v35, %v2092_v43 }
 0x5bd   : > { %3031 = vrot.lane.b32.xlu1 %v6836_v31, %s6182_s9  ;;  %5087 = vmatprep.mubr.msk.bf16.mxu0 %vm1919_vm1, %v2102_v41 }
 0x5be   : > { %5088 = vmatmul.mubr.msk.bf16.gmra.mxu0 %vm1919_vm1, %v2103_v19 }
 0x5c1   : > { %3035 = vrot.lane.b32.xlu1 %v6862_v54, %s6182_s9 }
 0x5c5   : > { %3368 = vrot.lane.b32.xlu1 %v6839_v48, %s6182_s9 }
 0x5c6   : > { %2562 = vadd.xlane.f32.xlu0 %v2561_v52 }
 0x5c9   : > { %3366 = vrot.lane.b32.xlu1 %v6847_v62, %s6182_s9 }
 0x5dc   : > { %3043 = vrot.lane.b32.xlu0 %v7249_v30, %s6182_s9 }
 0x5e0   : > { %3021 = vrot.lane.b32.xlu0 %v6803_v29, %s6182_s9 }
 0x5e4   : > { %3025 = vrot.lane.b32.xlu0 %v6821_v24, %s6182_s9 }
 0x5e8   : > { %3029 = vrot.lane.b32.xlu0 %v6841_v16, %s6182_s9 }
 0x5ec   : > { %3033 = vrot.lane.b32.xlu0 %v6865_v56, %s6182_s9 }
 0x5f9   : > { %v2530_v48 = vpop.xlane.xlu1 %2529 }
 0x5fd   : > { %v2524_v26 = vpop.xlane.xlu1 %2523 }
 0x5fe   : > { %v2533_v62 = vpop.xlane.xlu0 %2532  ;;  %5769 = vrcp.f32 %v2524_v26 }
 0x601   : > { %v2542_v7 = vpop.xlane.xlu1 %2541 }
 0x602   : > { %v2527_v60 = vpop.xlane.xlu0 %2526 }
 0x603   : > { %5771 = vrcp.f32 %v2527_v60 }
 0x604   : > { %5773 = vrcp.f32 %v2533_v62 }
 0x605   : > { %v2536_v22 = vpop.xlane.xlu1 %2535 }
 0x606   : > { %v2545_v58 = vpop.xlane.xlu0 %2544 }
 0x60a   : > { %v2539_v1 = vpop.xlane.xlu0 %2538 }
 0x60b   : > { %v5770_v40 = vpop.eup %5769  ;;  %5775 = vrcp.f32 %v2539_v1 }
 0x60c   : > { %v2586_v34 = vmul.f32 %v5770_v40, %v7127_v18  ;;  %5777 = vrcp.f32 %v2530_v48 }
 0x60d   : > { %5779 = vrcp.f32 %v2536_v22 }
 0x60e   : > { %v2554_v21 = vpop.xlane.xlu0 %2553  ;;  %5781 = vrcp.f32 %v2542_v7 }
 0x60f   : > { %5783 = vrcp.f32 %v2545_v58 }
 0x610   : > { %v5772_v45 = vpop.eup %5771 }
 0x611   : > { %v2587_v25 = vmul.f32 %v5772_v45, %v7138_v10  ;;  %v5774_v38 = vpop.eup %5773 }
 0x612   : > { %v2548_v51 = vpop.xlane.xlu0 %2547  ;;  %v2589_v4 = vmul.f32 %v5774_v38, %v7129_v12 }
 0x613   : > { %v2602_v33 = vpack.c.bf16 %v2587_v25, %v2586_v34  ;;  %v5667_v25 = vld [vmem:[#allocation10 + $0x18] sm:$0xff]  }
 0x615   : > { %5123 = vmatprep.mubr.msk.bf16.mxu0 %vm1919_vm1, %v2602_v33  ;;  %v2560_v32 = vpop.xlane.xlu1 %2559 }
 0x616   : > { %v2557_v55 = vpop.xlane.xlu0 %2556 }
 0x617   : > { %5785 = vrcp.f32 %v2557_v55 }
 0x618   : > { %5787 = vrcp.f32 %v2548_v51  ;;  %v5776_v50 = vpop.eup %5775 }
 0x619   : > { %v2566_v6 = vpop.xlane.xlu1 %2565  ;;  %5789 = vrcp.f32 %v2554_v21  ;;  %v5778_v53 = vpop.eup %5777  ;;  %v2591_v14 = vmul.f32 %v5776_v50, %v7156_v49 }
 0x61a   : > { %v2551_v42 = vpop.xlane.xlu0 %2550  ;;  %v5780_v11 = vpop.eup %5779  ;;  %v2588_v15 = vmul.f32 %v5778_v53, %v7122_v2 }
 0x61b   : > { %5791 = vrcp.f32 %v2551_v42  ;;  %v5782_v28 = vpop.eup %5781  ;;  %v2590_v20 = vmul.f32 %v5780_v11, %v7147_v61 }
 0x61c   : > { %v5784_v17 = vpop.eup %5783  ;;  %v2603_v35 = vpack.c.bf16 %v2589_v4, %v2588_v15  ;;  %v2592_v60 = vmul.f32 %v5782_v28, %v7136_v27 }
 0x61d   : > { %v2569_v18 = vpop.xlane.xlu1 %2568  ;;  %v2604_v12 = vpack.c.bf16 %v2591_v14, %v2590_v20  ;;  %v2593_v48 = vmul.f32 %v5784_v17, %v7149_v5 }
 0x61e   : > { %v2613_v10 = vpop.permute.xlu0 %2612  ;;  %5793 = vrcp.f32 %v2569_v18 }
 0x61f   : > { %5119 = vmatprep.subr.bf16.mxu0 %v2613_v10  ;;  %5317 = vmatprep.subr.bf16.mxu1 %v2613_v10  ;;  %5795 = vrcp.f32 %v2560_v32  ;;  %v5668_v32 = vld [vmem:[#allocation10 + $0x10] sm:$0xff]  }
 0x620   : > { %5120 = vmatpush3.bf16.msra.mxu0 %v2613_v10  ;;  %5321 = vmatpush3.bf16.msra.mxu1 %v2613_v10  ;;  %5797 = vrcp.f32 %v2566_v6 }
 0x621   : > { %v2611_v57 = vpop.permute.xlu1 %2610 }
 0x622   : > { %5121 = vmatprep.subr.bf16.mxu0 %v2611_v57  ;;  %5318 = vmatprep.subr.bf16.mxu1 %v2611_v57 }
 0x624   : > { %5122 = vmatpush3.bf16.msra.mxu0 %v2611_v57  ;;  %5322 = vmatpush3.bf16.msra.mxu1 %v2611_v57  ;;  %v5786_v43 = vpop.eup %5785 }
 0x625   : > { %5159 = vmatprep.subr.bf16.mxu0 %v5665_v9  ;;  %v5788_v41 = vpop.eup %5787  ;;  %v2597_v49 = vmul.f32 %v5786_v43, %v7168_v3  ;;  %v2605_v3 = vpack.c.bf16 %v2593_v48, %v2592_v60  ;;  %5139 = vmatprep.subr.bf16.mxu1 %v5667_v25 }
 0x626   : > { %v5790_v19 = vpop.eup %5789  ;;  %v2594_v2 = vmul.f32 %v5788_v41, %v7164_v59 }
 0x627   : > { %5124 = vmatmul.mubr.msk.bf16.vlgmr.msra.gmra.mxu0 %vm1919_vm1, %v2603_v35  ;;  %v2596_v26 = vmul.f32 %v5790_v19, %v7160_v47 }
 0x628   : > { %v5792_v52 = vpop.eup %5791  ;;  %5127 = vmatprep.mubr.msk.bf16.mxu0 %vm1919_vm1, %v2604_v12  ;;  %5160 = vmatpush3.bf16.msra.mxu0 %v5665_v9 }
 0x629   : > { %v2595_v61 = vmul.f32 %v5792_v52, %v7180_v46  ;;  %5161 = vmatprep.subr.bf16.mxu0 %v5666_v36  ;;  %v2607_v58 = vpack.c.bf16 %v2597_v49, %v2596_v26 }
 0x62b   : > { %v2606_v62 = vpack.c.bf16 %v2595_v61, %v2594_v2  ;;  %v5794_v5 = vpop.eup %5793 }
 0x62c   : > { %5162 = vmatpush3.bf16.msra.mxu0 %v5666_v36  ;;  %v5796_v46 = vpop.eup %5795  ;;  %v2601_v27 = vmul.f32 %v5794_v5, %v7184_v37 }
 0x62d   : > { %5131 = vmatprep.mubr.msk.bf16.mxu1 %vm1919_vm1, %v2606_v62  ;;  %v5798_v47 = vpop.eup %5797  ;;  %v2598_v7 = vmul.f32 %v5796_v46, %v7170_v23  ;;  %v3042_v62 = vpop.permute.xlu1 %3041 }
 0x62e   : > { %5132 = vmatmul.mubr.msk.bf16.vlgmr.msra.gmra.mxu1 %vm1919_vm1, %v2607_v58  ;;  %v2600_v21 = vmul.f32 %v5798_v47, %v7176_v63  ;;  %v3076_v46 = vsel %vm1785_vm0, %v3042_v62, 0 }
 0x62f   : > { %5128 = vmatmul.mubr.msk.bf16.gmra.mxu0 %vm1919_vm1, %v2605_v3  ;;  %5140 = vmatpush3.bf16.msra.mxu1 %v5667_v25 }
 0x630   : > { %v2609_v22 = vpack.c.bf16 %v2601_v27, %v2600_v21  ;;  %5141 = vmatprep.subr.bf16.mxu1 %v5668_v32 }
 0x631   : > { %v3040_v27 = vpop.permute.xlu1 %3039 }
 0x633   : > { %5142 = vmatpush3.bf16.msra.mxu1 %v5668_v32 }
 0x635   : > { %v3038_v21 = vpop.permute.xlu1 %3037 }
 0x64f   : > { %v2563_v59 = vpop.xlane.xlu0 %2562 }
 0x650   : > { %5799 = vrcp.f32 %v2563_v59 }
 0x653   : > { %v3044_v23 = vpop.permute.xlu0 %3043 }
 0x654   : > { %5331 = vmatprep.subr.msk.bf16.mxu1 %vm1785_vm0, %v3044_v23  ;;  %v3079_v49 = vsel %vm1785_vm0, %v3044_v23, 0 }
 0x65d   : > { %v5800_v1 = vpop.eup %5799 }
 0x65e   : > { %v2599_v40 = vmul.f32 %v5800_v1, %v7241_v8 }
 0x660   : > { %v2608_v45 = vpack.c.bf16 %v2599_v40, %v2598_v7  ;;  %v3073_v7 = vsel %vm1785_vm0, %v3040_v27, 0 }
 0x662   : > { %5135 = vmatprep.mubr.msk.bf16.mxu1 %vm1919_vm1, %v2608_v45  ;;  %v3070_v45 = vsel %vm1785_vm0, %v3038_v21, 0 }
 0x663   : > { %5136 = vmatmul.mubr.msk.bf16.gmra.mxu1 %vm1919_vm1, %v2609_v22 }
 0x666   : > { %v5077_v34 = vpop.f32.mrf.mxu0 }
 0x668   : > { %v2186_v51 = vpop.f32.mrf.mxu0 }
 0x66a   : > { %v5078_v33 = vpop.f32.mrf.mxu0 }
 0x66b   : > { %v2250_v8 = vpack.c.bf16 %v5078_v33, %v5077_v34 }
 0x66c   : > { %v2189_v37 = vpop.f32.mrf.mxu0 }
 0x66d   : > { %v2249_v55 = vpack.c.bf16 %v2189_v37, %v2186_v51  ;;  %v3022_v37 = vpop.permute.xlu0 %3021 }
 0x66e   : > { %v5081_v6 = vpop.f32.mrf.mxu0 }
 0x66f   : > { %5163 = vmatprep.mubr.msk.bf16.mxu0 %vm1785_vm0, %v2249_v55  ;;  %v3024_v55 = vpop.permute.xlu1 %3023 }
 0x670   : > { %v2202_v63 = vpop.f32.mrf.mxu0  ;;  %5164 = vmatmul.mubr.msk.bf16.vlgmr.msra.gmra.mxu0 %vm1785_vm0, %v2250_v8 }
 0x671   : > { %v3026_v23 = vpop.permute.xlu0 %3025 }
 0x672   : > { %v5082_v42 = vpop.f32.mrf.mxu0 }
 0x673   : > { %v2252_v10 = vpack.c.bf16 %v5082_v42, %v5081_v6  ;;  %v3028_v8 = vpop.permute.xlu1 %3027 }
 0x674   : > { %v2205_v18 = vpop.f32.mrf.mxu0 }
 0x675   : > { %v2251_v38 = vpack.c.bf16 %v2205_v18, %v2202_v63  ;;  %v3030_v6 = vpop.permute.xlu0 %3029 }
 0x676   : > { %v5085_v50 = vpop.f32.mrf.mxu0 }
 0x677   : > { %5167 = vmatprep.mubr.msk.bf16.mxu0 %vm1785_vm0, %v2251_v38  ;;  %v3032_v63 = vpop.permute.xlu1 %3031 }
 0x678   : > { %v2218_v53 = vpop.f32.mrf.mxu0  ;;  %5168 = vmatmul.mubr.msk.bf16.gmra.mxu0 %vm1785_vm0, %v2252_v10 }
 0x679   : > { %v3034_v42 = vpop.permute.xlu0 %3033 }
 0x67a   : > { %v5086_v11 = vpop.f32.mrf.mxu0 }
 0x67b   : > { %v2254_v9 = vpack.c.bf16 %v5086_v11, %v5085_v50  ;;  %v3036_v18 = vpop.permute.xlu1 %3035 }
 0x67c   : > { %v2221_v4 = vpop.f32.mrf.mxu0 }
 0x67d   : > { %v2253_v57 = vpack.c.bf16 %v2221_v4, %v2218_v53 }
 0x67e   : > { %v5089_v14 = vpop.f32.mrf.mxu0 }
 0x67f   : > { %5171 = vmatprep.mubr.msk.bf16.mxu0 %vm1785_vm0, %v2253_v57  ;;  %v3369_v38 = vpop.permute.xlu1 %3368 }
 0x680   : > { %v2234_v28 = vpop.f32.mrf.mxu0  ;;  %5172 = vmatmul.mubr.msk.bf16.gmra.mxu0 %vm1785_vm0, %v2254_v9  ;;  %5203 = vmatprep.subr.bf16.mxu0 %v3369_v38 }
 0x681   : > { %5204 = vmatpush3.bf16.msra.mxu0 %v3369_v38 }
 0x682   : > { %v5090_v15 = vpop.f32.mrf.mxu0 }
 0x683   : > { %v2256_v43 = vpack.c.bf16 %v5090_v15, %v5089_v14  ;;  %v3367_v10 = vpop.permute.xlu1 %3366 }
 0x684   : > { %v2237_v17 = vpop.f32.mrf.mxu0  ;;  %5205 = vmatprep.subr.bf16.mxu0 %v3367_v10 }
 0x685   : > { %v2255_v20 = vpack.c.bf16 %v2237_v17, %v2234_v28  ;;  %5206 = vmatpush3.bf16.msra.mxu0 %v3367_v10 }
 0x687   : > { %5175 = vmatprep.mubr.msk.bf16.mxu0 %vm1785_vm0, %v2255_v20 }
 0x688   : > { %5176 = vmatmul.mubr.msk.bf16.gmra.mxu0 %vm1785_vm0, %v2256_v43 }
 0x6e7   : > { %v5125_v35 = vpop.f32.mrf.mxu0 }
 0x6e9   : > { %v2680_v36 = vpop.f32.mrf.mxu0 }
 0x6eb   : > { %v5126_v41 = vpop.f32.mrf.mxu0 }
 0x6ec   : > { %v2744_v2 = vpack.c.bf16 %v5126_v41, %v5125_v35 }
 0x6ed   : > { %v2683_v12 = vpop.f32.mrf.mxu0 }
 0x6ee   : > { %v2743_v19 = vpack.c.bf16 %v2683_v12, %v2680_v36  ;;  %v5133_v52 = vpop.f32.mrf.mxu1 }
 0x6ef   : > { %v5129_v61 = vpop.f32.mrf.mxu0 }
 0x6f0   : > { %v2712_v48 = vpop.f32.mrf.mxu1  ;;  %5143 = vmatprep.mubr.msk.bf16.mxu1 %vm1785_vm0, %v2743_v19 }
 0x6f1   : > { %v2696_v26 = vpop.f32.mrf.mxu0  ;;  %5144 = vmatmul.mubr.msk.bf16.vlgmr.msra.gmra.mxu1 %vm1785_vm0, %v2744_v2 }
 0x6f2   : > { %v5134_v60 = vpop.f32.mrf.mxu1  ;;  %5180 = vmatpush3.bf16.xpose.msra.mxu1 %v3079_v49 }
 0x6f3   : > { %v5130_v58 = vpop.f32.mrf.mxu0  ;;  %5332 = vmatprep.subr.msk.bf16.mxu1 %vm1785_vm0, %v3042_v62  ;;  %v2748_v40 = vpack.c.bf16 %v5134_v60, %v5133_v52 }
 0x6f4   : > { %v2715_v3 = vpop.f32.mrf.mxu1  ;;  %v2746_v47 = vpack.c.bf16 %v5130_v58, %v5129_v61 }
 0x6f5   : > { %v2699_v59 = vpop.f32.mrf.mxu0  ;;  %v2747_v1 = vpack.c.bf16 %v2715_v3, %v2712_v48 }
 0x6f6   : > { %v2745_v5 = vpack.c.bf16 %v2699_v59, %v2696_v26 }
 0x6f8   : > { %5147 = vmatprep.mubr.msk.bf16.mxu1 %vm1785_vm0, %v2745_v5 }
 0x6f9   : > { %5148 = vmatmul.mubr.msk.bf16.gmra.mxu1 %vm1785_vm0, %v2746_v47 }
 0x6fa   : > { %5151 = vmatprep.mubr.msk.bf16.mxu1 %vm1785_vm0, %v2747_v1  ;;  %5182 = vmatpush3.bf16.xpose.msra.mxu1 %v3076_v46 }
 0x6fb   : > { %5333 = vmatprep.subr.msk.bf16.mxu1 %vm1785_vm0, %v3040_v27 }
 0x701   : > { %5152 = vmatmul.mubr.msk.bf16.gmra.mxu1 %vm1785_vm0, %v2748_v40 }
 0x702   : > { %5184 = vmatpush3.bf16.xpose.msra.mxu1 %v3073_v7 }
 0x703   : > { %5334 = vmatprep.subr.msk.bf16.mxu1 %vm1785_vm0, %v3038_v21 }
 0x70a   : > { %5186 = vmatpush3.bf16.xpose.msra.mxu1 %v3070_v45 }
 0x723   : > { %v5137_v22 = vpop.f32.mrf.mxu1 }
 0x725   : > { %v2728_v34 = vpop.f32.mrf.mxu1 }
 0x727   : > { %v5138_v25 = vpop.f32.mrf.mxu1 }
 0x728   : > { %v2750_v32 = vpack.c.bf16 %v5138_v25, %v5137_v22 }
 0x729   : > { %v2731_v51 = vpop.f32.mrf.mxu1 }
 0x72a   : > { %v2749_v33 = vpack.c.bf16 %v2731_v51, %v2728_v34 }
 0x72c   : > { %5155 = vmatprep.mubr.msk.bf16.mxu1 %vm1785_vm0, %v2749_v33 }
 0x72d   : > { %5156 = vmatmul.mubr.msk.bf16.gmra.mxu1 %vm1785_vm0, %v2750_v32 }
 0x72e   : > { %5187 = vmatprep.mubr.msk.bf16.mxu1 %vm1785_vm0, %v3022_v37 }
 0x735   : > { %5188 = vmatmul.mubr.msk.bf16.vlgmr.msra.gmra.mxu1 %vm1785_vm0, %v3024_v55 }
 0x736   : > { %5191 = vmatprep.mubr.msk.bf16.mxu1 %vm1785_vm0, %v3026_v23 }
 0x73d   : > { %5192 = vmatmul.mubr.msk.bf16.gmra.mxu1 %vm1785_vm0, %v3028_v8 }
 0x73e   : > { %5195 = vmatprep.mubr.msk.bf16.mxu1 %vm1785_vm0, %v3030_v6 }
 0x745   : > { %5196 = vmatmul.mubr.msk.bf16.gmra.mxu1 %vm1785_vm0, %v3032_v63  ;;  %v7395_v63 = vld [vmem:[#allocation3 + $0x4] ss:$8 sps:$4 sm:$0xff]  }
 0x746   : > { %5199 = vmatprep.mubr.msk.bf16.mxu1 %vm1785_vm0, %v3034_v42  ;;  %v7399_v42 = vld [vmem:[#allocation3 + $0x14] ss:$8 sps:$4 sm:$0xff]  }
 0x74d   : > { %5200 = vmatmul.mubr.msk.bf16.gmra.mxu1 %vm1785_vm0, %v3036_v18 }
 0x7b1   : > { %v7317_v50 = vpop.f32.mrf.mxu1 }
 0x7b3   : > { %v7319_v53 = vpop.f32.mrf.mxu1 }
 0x7b5   : > { %v7321_v11 = vpop.f32.mrf.mxu1 }
 0x7b7   : > { %v7323_v4 = vpop.f32.mrf.mxu1 }
 0x7b9   : > { %v7325_v57 = vpop.f32.mrf.mxu1 }
 0x7bb   : > { %v7327_v9 = vpop.f32.mrf.mxu1 }
 0x7bd   : > { %v7329_v14 = vpop.f32.mrf.mxu1 }
 0x7bf   : > { %v7331_v28 = vpop.f32.mrf.mxu1 }
 0x7c1   : > { %v7333_v15 = vpop.f32.mrf.mxu1 }
 0x7c3   : > { %v7335_v17 = vpop.f32.mrf.mxu1 }
 0x7c5   : > { %v7337_v20 = vpop.f32.mrf.mxu1 }
 0x7c7   : > { %v7339_v43 = vpop.f32.mrf.mxu1 }
 0x7ed   : > { %v7341_v35 = vpop.f32.mrf.mxu1 }
 0x7ef   : > { %v7343_v36 = vpop.f32.mrf.mxu1 }
 0x7f1   : > { %v7345_v41 = vpop.f32.mrf.mxu1 }
 0x7f3   : > { %v7347_v12 = vpop.f32.mrf.mxu1 }
 0x7f4   : > { %7979 = vst [vmem:[#allocation24_spill] sm:$0xff] %v7347_v12 }
 0x7f5   : > { %v5189_v19 = vpop.f32.mrf.mxu1 }
 0x7f6   : > { %v3184_v52 = vsel %vm1919_vm1, %v5189_v19, -inf }
 0x7f7   : > { %3185 = vmax.xlane.f32.xlu0 %v3184_v52  ;;  %v3115_v49 = vpop.f32.mrf.mxu1 }
 0x7f8   : > { %v3178_v61 = vsel %vm1919_vm1, %v3115_v49, -inf }
 0x7f9   : > { %v5190_v2 = vpop.f32.mrf.mxu1 }
 0x7fa   : > { %v3187_v60 = vsel %vm1919_vm1, %v5190_v2, -inf }
 0x7fb   : > { %3179 = vmax.xlane.f32.xlu0 %v3178_v61  ;;  %v3118_v48 = vpop.f32.mrf.mxu1 }
 0x7fc   : > { %v3181_v26 = vsel %vm1919_vm1, %v3118_v48, -inf }
 0x7fd   : > { %3182 = vmax.xlane.f32.xlu1 %v3181_v26  ;;  %v5193_v62 = vpop.f32.mrf.mxu1 }
 0x7fe   : > { %v3196_v3 = vsel %vm1919_vm1, %v5193_v62, -inf }
 0x7ff   : > { %3188 = vmax.xlane.f32.xlu0 %v3187_v60  ;;  %v7353_v58 = vpop.f32.mrf.mxu1 }
 0x800   : > { %v3190_v47 = vsel %vm1919_vm1, %v7353_v58, -inf }
 0x801   : > { %3197 = vmax.xlane.f32.xlu1 %v3196_v3  ;;  %v5194_v59 = vpop.f32.mrf.mxu1 }
 0x802   : > { %v3199_v5 = vsel %vm1919_vm1, %v5194_v59, -inf }
 0x803   : > { %3200 = vmax.xlane.f32.xlu0 %v3199_v5  ;;  %v7357_v46 = vpop.f32.mrf.mxu1 }
 0x804   : > { %v3193_v27 = vsel %vm1919_vm1, %v7357_v46, -inf }
 0x805   : > { %3191 = vmax.xlane.f32.xlu1 %v3190_v47  ;;  %v7361_v1 = vpop.f32.mrf.mxu1 }
 0x806   : > { %v3208_v40 = vsel %vm1919_vm1, %v7361_v1, -inf }
 0x807   : > { %3194 = vmax.xlane.f32.xlu0 %v3193_v27  ;;  %v7365_v7 = vpop.f32.mrf.mxu1 }
 0x808   : > { %v3202_v34 = vsel %vm1919_vm1, %v7365_v7, -inf }
 0x809   : > { %3209 = vmax.xlane.f32.xlu1 %v3208_v40  ;;  %v7369_v21 = vpop.f32.mrf.mxu1 }
 0x80a   : > { %v3211_v45 = vsel %vm1919_vm1, %v7369_v21, -inf }
 0x80b   : > { %3212 = vmax.xlane.f32.xlu0 %v3211_v45  ;;  %v7373_v22 = vpop.f32.mrf.mxu1 }
 0x80c   : > { %v3205_v51 = vsel %vm1919_vm1, %v7373_v22, -inf }
 0x80d   : > { %3203 = vmax.xlane.f32.xlu1 %v3202_v34  ;;  %v7377_v25 = vpop.f32.mrf.mxu1 }
 0x80e   : > { %v3220_v32 = vsel %vm1919_vm1, %v7377_v25, -inf }
 0x80f   : > { %3206 = vmax.xlane.f32.xlu0 %v3205_v51  ;;  %v7381_v33 = vpop.f32.mrf.mxu1 }
 0x810   : > { %v3214_v8 = vsel %vm1919_vm1, %v7381_v33, -inf }
 0x811   : > { %3221 = vmax.xlane.f32.xlu1 %v3220_v32  ;;  %v7385_v37 = vpop.f32.mrf.mxu1 }
 0x812   : > { %v3223_v55 = vsel %vm1919_vm1, %v7385_v37, -inf }
 0x813   : > { %3224 = vmax.xlane.f32.xlu0 %v3223_v55  ;;  %v7389_v23 = vpop.f32.mrf.mxu1 }
 0x814   : > { %v3217_v6 = vsel %vm1919_vm1, %v7389_v23, -inf }
 0x815   : > { %3215 = vmax.xlane.f32.xlu1 %v3214_v8 }
 0x817   : > { %3218 = vmax.xlane.f32.xlu0 %v3217_v6 }
 0x826   : > { %3362 = vrot.lane.b32.xlu1 %v7395_v63, %s6182_s9 }
 0x82d   : > { %3364 = vrot.lane.b32.xlu0 %v7399_v42, %s6182_s9  ;;  %s6043_s9 = scalar_lea.vmem %s7867_s17, 2048 }
 0x82e   : > { %p6044_p1 = scmp.ne.s32.totalorder %s7867_s17, %s6043_s9 }
 0x830   : > { %p6045_p9 = pnand %p6044_p1, %p7989_p7 }
 0x832   : > { %p6046_p11 = pneg %p6045_p9 }
 0x880   : > { %v3186_v18 = vpop.xlane.xlu0 %3185 }
 0x881   : > { %v3228_v38 = vsub.f32 %v5189_v19, %v3186_v18 }
 0x883   : > { %v3246_v10 = vmul.f32 1.442695, %v3228_v38 }
 0x884   : > { %v3180_v52 = vpop.xlane.xlu0 %3179 }
 0x885   : > { %5801 = vpow2.f32 %v3246_v10  ;;  %v3226_v61 = vsub.f32 %v3115_v49, %v3180_v52 }
 0x886   : > { %v3183_v26 = vpop.xlane.xlu1 %3182 }
 0x887   : > { %v3242_v60 = vmul.f32 1.442695, %v3226_v61  ;;  %v3227_v3 = vsub.f32 %v3118_v48, %v3183_v26 }
 0x888   : > { %v3189_v5 = vpop.xlane.xlu0 %3188 }
 0x889   : > { %5803 = vpow2.f32 %v3242_v60  ;;  %v3229_v47 = vsub.f32 %v5190_v2, %v3189_v5  ;;  %v3244_v27 = vmul.f32 1.442695, %v3227_v3 }
 0x88a   : > { %v3198_v40 = vpop.xlane.xlu1 %3197 }
 0x88b   : > { %v3248_v45 = vmul.f32 1.442695, %v3229_v47  ;;  %v3232_v34 = vsub.f32 %v5193_v62, %v3198_v40 }
 0x88c   : > { %v3201_v51 = vpop.xlane.xlu0 %3200 }
 0x88d   : > { %5805 = vpow2.f32 %v3248_v45  ;;  %v3254_v32 = vmul.f32 1.442695, %v3232_v34  ;;  %v3233_v55 = vsub.f32 %v5194_v59, %v3201_v51 }
 0x88e   : > { %5807 = vpow2.f32 %v3244_v27  ;;  %v3192_v19 = vpop.xlane.xlu1 %3191 }
 0x88f   : > { %5809 = vpow2.f32 %v3254_v32  ;;  %v3256_v8 = vmul.f32 1.442695, %v3233_v55  ;;  %v3230_v49 = vsub.f32 %v7353_v58, %v3192_v19 }
 0x890   : > { %v3195_v6 = vpop.xlane.xlu0 %3194 }
 0x891   : > { %v3250_v18 = vmul.f32 1.442695, %v3230_v49  ;;  %v3231_v48 = vsub.f32 %v7357_v46, %v3195_v6  ;;  %5811 = vpow2.f32 %v3256_v8 }
 0x892   : > { %v7405_v38 = vpop.eup %5801  ;;  %v3210_v2 = vpop.xlane.xlu1 %3209 }
 0x893   : > { %5813 = vpow2.f32 %v3250_v18  ;;  %v3252_v62 = vmul.f32 1.442695, %v3231_v48  ;;  %v3236_v10 = vsub.f32 %v7361_v1, %v3210_v2  ;;  %v3280_v59 = vsel %vm1919_vm1, %v7405_v38, 0.0 }
 0x894   : > { %3281 = vadd.xlane.f32.xlu1 %v3280_v59  ;;  %v3213_v52 = vpop.xlane.xlu0 %3212 }
 0x895   : > { %5815 = vpow2.f32 %v3252_v62  ;;  %v3262_v26 = vmul.f32 1.442695, %v3236_v10  ;;  %v3237_v1 = vsub.f32 %v7369_v21, %v3213_v52 }
 0x896   : > { %v7410_v61 = vpop.eup %5803  ;;  %v3204_v58 = vpop.xlane.xlu1 %3203 }
 0x897   : > { %v3234_v46 = vsub.f32 %v7365_v7, %v3204_v58  ;;  %v3274_v60 = vsel %vm1919_vm1, %v7410_v61, 0.0  ;;  %5817 = vpow2.f32 %v3262_v26  ;;  %v3264_v19 = vmul.f32 1.442695, %v3237_v1 }
 0x898   : > { %3275 = vadd.xlane.f32.xlu1 %v3274_v60  ;;  %v3207_v3 = vpop.xlane.xlu0 %3206 }
 0x899   : > { %v3258_v47 = vmul.f32 1.442695, %v3234_v46 }
 0x89a   : > { %v7415_v5 = vpop.eup %5805  ;;  %v3222_v27 = vpop.xlane.xlu1 %3221 }
 0x89b   : > { %v7418_v40 = vpop.eup %5807  ;;  %v3240_v45 = vsub.f32 %v7377_v25, %v3222_v27  ;;  %v3283_v34 = vsel %vm1919_vm1, %v7415_v5, 0.0  ;;  %5819 = vpow2.f32 %v3258_v47  ;;  %v3235_v25 = vsub.f32 %v7373_v22, %v3207_v3 }
 0x89c   : > { %v7423_v7 = vpop.eup %5809  ;;  %3284 = vadd.xlane.f32.xlu0 %v3283_v34  ;;  %v3225_v51 = vpop.xlane.xlu0 %3224  ;;  %v3277_v18 = vsel %vm1919_vm1, %v7418_v40, 0.0 }
 0x89d   : > { %v3270_v32 = vmul.f32 1.442695, %v3240_v45  ;;  %v3241_v55 = vsub.f32 %v7385_v37, %v3225_v51  ;;  %v3292_v21 = vsel %vm1919_vm1, %v7423_v7, 0.0  ;;  %v3260_v59 = vmul.f32 1.442695, %v3235_v25 }
 0x89e   : > { %v3216_v8 = vpop.xlane.xlu1 %3215  ;;  %3293 = vadd.xlane.f32.xlu1 %v3292_v21  ;;  %v7428_v49 = vpop.eup %5811 }
 0x89f   : > { %5821 = vpow2.f32 %v3270_v32  ;;  %v3238_v6 = vsub.f32 %v7381_v33, %v3216_v8  ;;  %v3272_v2 = vmul.f32 1.442695, %v3241_v55  ;;  %v3295_v33 = vsel %vm1919_vm1, %v7428_v49, 0.0 }
 0x8a0   : > { %v7434_v48 = vpop.eup %5813  ;;  %3278 = vadd.xlane.f32.xlu0 %v3277_v18  ;;  %v3219_v37 = vpop.xlane.xlu0 %3218  ;;  %5823 = vpow2.f32 %v3264_v19 }
 0x8a1   : > { %v3266_v62 = vmul.f32 1.442695, %v3238_v6  ;;  %v3286_v10 = vsel %vm1919_vm1, %v7434_v48, 0.0  ;;  %v3239_v22 = vsub.f32 %v7389_v23, %v3219_v37  ;;  %v5934_v37 = vld [vmem:[#allocation3] ss:$8 sps:$4 sm:$0xff]  }
 0x8a2   : > { %3287 = vadd.xlane.f32.xlu1 %v3286_v10  ;;  %v7441_v52 = vpop.eup %5815  ;;  %v3363_v26 = vpop.permute.xlu1 %3362 }
 0x8a3   : > { %5825 = vpow2.f32 %v3266_v62  ;;  %v3268_v46 = vmul.f32 1.442695, %v3239_v22  ;;  %v3289_v60 = vsel %vm1919_vm1, %v7441_v52, 0.0 }
 0x8a4   : > { %3296 = vadd.xlane.f32.xlu0 %v3295_v33  ;;  %v3365_v58 = vpop.permute.xlu0 %3364  ;;  %5827 = vpow2.f32 %v3272_v2  ;;  %v7445_v3 = vpop.eup %5817 }
 0x8a5   : > { %5207 = vmatprep.subr.bf16.mxu0 %v3365_v58  ;;  %5829 = vpow2.f32 %v3260_v59  ;;  %v3304_v1 = vsel %vm1919_vm1, %v7445_v3, 0.0 }
 0x8a6   : > { %5208 = vmatpush3.bf16.msra.mxu0 %v3365_v58  ;;  %5831 = vpow2.f32 %v3268_v46 }
 0x8a7   : > { %5209 = vmatprep.subr.bf16.mxu0 %v3363_v26 }
 0x8a8   : > { %3290 = vadd.xlane.f32.xlu0 %v3289_v60  ;;  %v7447_v23 = vpop.eup %5819 }
 0x8a9   : > { %v3298_v34 = vsel %vm1919_vm1, %v7447_v23, 0.0 }
 0x8aa   : > { %5210 = vmatpush3.bf16.msra.mxu0 %v3363_v26 }
 0x8ac   : > { %v7451_v47 = vpop.eup %5821  ;;  %3305 = vadd.xlane.f32.xlu0 %v3304_v1 }
 0x8ad   : > { %v3316_v27 = vsel %vm1919_vm1, %v7451_v47, 0.0  ;;  %v7455_v45 = vpop.eup %5823 }
 0x8ae   : > { %3317 = vadd.xlane.f32.xlu1 %v3316_v27  ;;  %v3307_v21 = vsel %vm1919_vm1, %v7455_v45, 0.0 }
 0x8b0   : > { %v7459_v51 = vpop.eup %5825  ;;  %3299 = vadd.xlane.f32.xlu0 %v3298_v34 }
 0x8b1   : > { %v3310_v32 = vsel %vm1919_vm1, %v7459_v51, 0.0  ;;  %v7463_v55 = vpop.eup %5827 }
 0x8b2   : > { %3311 = vadd.xlane.f32.xlu1 %v3310_v32  ;;  %v7467_v19 = vpop.eup %5829  ;;  %v3319_v8 = vsel %vm1919_vm1, %v7463_v55, 0.0 }
 0x8b3   : > { %v3301_v25 = vsel %vm1919_vm1, %v7467_v19, 0.0  ;;  %v7473_v6 = vpop.eup %5831 }
 0x8b4   : > { %3308 = vadd.xlane.f32.xlu0 %v3307_v21  ;;  %v3313_v18 = vsel %vm1919_vm1, %v7473_v6, 0.0 }
 0x8b6   : > { %3320 = vadd.xlane.f32.xlu1 %v3319_v8 }
 0x8b8   : > { %3302 = vadd.xlane.f32.xlu0 %v3301_v25 }
 0x8bc   : > { %3314 = vadd.xlane.f32.xlu0 %v3313_v18 }
 0x8c7   : > { %3676 = vrot.lane.b32.xlu1 %v7203_v13, %s6183_s24 }
 0x8cb   : > { %3674 = vrot.lane.b32.xlu1 %v7213_v39, %s6183_s24 }
 0x8cf   : > { %3672 = vrot.lane.b32.xlu1 %v5934_v37, %s6183_s24 }
 0x8d2   : > { %3678 = vrot.lane.b32.xlu0 %v7249_v30, %s6183_s24 }
 0x8d3   : > { %3658 = vrot.lane.b32.xlu1 %v6800_v44, %s6183_s24 }
 0x8d6   : > { %3656 = vrot.lane.b32.xlu0 %v6803_v29, %s6183_s24 }
 0x8d7   : > { %3662 = vrot.lane.b32.xlu1 %v6818_v0, %s6183_s24 }
 0x8da   : > { %3660 = vrot.lane.b32.xlu0 %v6821_v24, %s6183_s24 }
 0x8db   : > { %3666 = vrot.lane.b32.xlu1 %v6836_v31, %s6183_s24 }
 0x8de   : > { %3664 = vrot.lane.b32.xlu0 %v6841_v16, %s6183_s24 }
 0x8df   : > { %3670 = vrot.lane.b32.xlu1 %v6862_v54, %s6183_s24 }
 0x8e2   : > { %3668 = vrot.lane.b32.xlu0 %v6865_v56, %s6183_s24 }
 0x91d   : > { %v3282_v44 = vpop.xlane.xlu1 %3281 }
 0x921   : > { %v3276_v29 = vpop.xlane.xlu1 %3275 }
 0x925   : > { %v3285_v13 = vpop.xlane.xlu0 %3284 }
 0x926   : > { %5833 = vrcp.f32 %v3285_v13 }
 0x927   : > { %v3294_v0 = vpop.xlane.xlu1 %3293  ;;  %5835 = vrcp.f32 %v3276_v29 }
 0x928   : > { %5837 = vrcp.f32 %v3282_v44 }
 0x929   : > { %v3279_v24 = vpop.xlane.xlu0 %3278 }
 0x92a   : > { %5839 = vrcp.f32 %v3279_v24 }
 0x92b   : > { %v3288_v39 = vpop.xlane.xlu1 %3287 }
 0x92d   : > { %v3297_v31 = vpop.xlane.xlu0 %3296 }
 0x92e   : > { %5841 = vrcp.f32 %v3297_v31 }
 0x92f   : > { %5843 = vrcp.f32 %v3288_v39 }
 0x930   : > { %5845 = vrcp.f32 %v3294_v0 }
 0x931   : > { %v3291_v16 = vpop.xlane.xlu0 %3290 }
 0x932   : > { %5847 = vrcp.f32 %v3291_v16 }
 0x933   : > { %v5834_v54 = vpop.eup %5833 }
 0x934   : > { %v5836_v30 = vpop.eup %5835  ;;  %v3341_v10 = vmul.f32 %v5834_v54, %v7415_v5 }
 0x935   : > { %v3306_v2 = vpop.xlane.xlu0 %3305  ;;  %v5838_v56 = vpop.eup %5837  ;;  %v3338_v22 = vmul.f32 %v5836_v30, %v7410_v61 }
 0x936   : > { %v3340_v58 = vmul.f32 %v5838_v56, %v7405_v38 }
 0x937   : > { %v5840_v62 = vpop.eup %5839  ;;  %v3318_v59 = vpop.xlane.xlu1 %3317 }
 0x938   : > { %v3339_v33 = vmul.f32 %v5840_v62, %v7418_v40  ;;  %v3355_v60 = vpack.c.bf16 %v3341_v10, %v3340_v58 }
 0x939   : > { %v3300_v26 = vpop.xlane.xlu0 %3299 }
 0x93a   : > { %v3354_v46 = vpack.c.bf16 %v3339_v33, %v3338_v22 }
 0x93b   : > { %v5842_v1 = vpop.eup %5841  ;;  %v3312_v21 = vpop.xlane.xlu1 %3311 }
 0x93c   : > { %5211 = vmatprep.mubr.msk.bf16.mxu0 %vm1919_vm1, %v3354_v46  ;;  %v5844_v27 = vpop.eup %5843  ;;  %v3345_v61 = vmul.f32 %v5842_v1, %v7428_v49 }
 0x93d   : > { %5212 = vmatmul.mubr.msk.bf16.vlgmr.msra.gmra.mxu0 %vm1919_vm1, %v3355_v60  ;;  %v3309_v34 = vpop.xlane.xlu0 %3308  ;;  %v5846_v32 = vpop.eup %5845  ;;  %v3342_v40 = vmul.f32 %v5844_v27, %v7434_v48 }
 0x93e   : > { %5849 = vrcp.f32 %v3309_v34  ;;  %v3344_v25 = vmul.f32 %v5846_v32, %v7423_v7 }
 0x93f   : > { %v5848_v5 = vpop.eup %5847  ;;  %5851 = vrcp.f32 %v3300_v26  ;;  %v3321_v44 = vpop.xlane.xlu1 %3320 }
 0x940   : > { %v3343_v38 = vmul.f32 %v5848_v5, %v7441_v52  ;;  %5853 = vrcp.f32 %v3306_v2  ;;  %v3357_v37 = vpack.c.bf16 %v3345_v61, %v3344_v25  ;;  %v5670_v61 = vld [vmem:[#allocation10 + $0x20] sm:$0xff]  }
 0x941   : > { %v3303_v8 = vpop.xlane.xlu0 %3302 }
 0x942   : > { %5855 = vrcp.f32 %v3303_v8  ;;  %v3356_v18 = vpack.c.bf16 %v3343_v38, %v3342_v40  ;;  %v7540_v40 = vpop.f32.mrf.mxu0 }
 0x943   : > { %5857 = vrcp.f32 %v3312_v21  ;;  %v3677_v52 = vpop.permute.xlu1 %3676  ;;  %v5669_v21 = vld [vmem:[#allocation10 + $0x28] sm:$0xff]  }
 0x944   : > { %5215 = vmatprep.mubr.msk.bf16.mxu0 %vm1919_vm1, %v3356_v18  ;;  %v3711_v31 = vsel %vm1785_vm0, %v3677_v52, 0  ;;  %5227 = vmatprep.subr.bf16.mxu1 %v5669_v21  ;;  %v7542_v38 = vpop.f32.mrf.mxu0 }
 0x945   : > { %5216 = vmatmul.mubr.msk.bf16.gmra.mxu0 %vm1919_vm1, %v3357_v37  ;;  %v3315_v29 = vpop.xlane.xlu0 %3314  ;;  %5228 = vmatpush3.bf16.msra.mxu1 %v5669_v21 }
 0x946   : > { %5859 = vrcp.f32 %v3315_v29  ;;  %5229 = vmatprep.subr.bf16.mxu1 %v5670_v61  ;;  %v7544_v8 = vpop.f32.mrf.mxu0 }
 0x947   : > { %5861 = vrcp.f32 %v3321_v44  ;;  %v3675_v10 = vpop.permute.xlu1 %3674 }
 0x948   : > { %5863 = vrcp.f32 %v3318_v59  ;;  %v3708_v58 = vsel %vm1785_vm0, %v3675_v10, 0  ;;  %v7546_v25 = vpop.f32.mrf.mxu0 }
 0x949   : > { %v3679_v49 = vpop.permute.xlu0 %3678  ;;  %5230 = vmatpush3.bf16.msra.mxu1 %v5670_v61 }
 0x94a   : > { %v3714_v48 = vsel %vm1785_vm0, %v3679_v49, 0  ;;  %5335 = vmatprep.subr.msk.bf16.mxu0 %vm1785_vm0, %v3679_v49  ;;  %v7548_v18 = vpop.f32.mrf.mxu0 }
 0x94b   : > { %5248 = vmatpush3.bf16.xpose.msra.mxu0 %v3714_v48  ;;  %v5850_v7 = vpop.eup %5849  ;;  %v3673_v46 = vpop.permute.xlu1 %3672 }
 0x94c   : > { %5336 = vmatprep.subr.msk.bf16.mxu0 %vm1785_vm0, %v3677_v52  ;;  %v5852_v13 = vpop.eup %5851  ;;  %v3349_v39 = vmul.f32 %v5850_v7, %v7455_v45  ;;  %v7550_v37 = vpop.f32.mrf.mxu0 }
 0x94d   : > { %v5854_v0 = vpop.eup %5853  ;;  %v3346_v16 = vmul.f32 %v5852_v13, %v7447_v23 }
 0x94e   : > { %v3348_v2 = vmul.f32 %v5854_v0, %v7445_v3  ;;  %v7552_v44 = vpop.f32.mrf.mxu0 }
 0x94f   : > { %v5856_v24 = vpop.eup %5855 }
 0x950   : > { %v3347_v54 = vmul.f32 %v5856_v24, %v7467_v19  ;;  %v5858_v30 = vpop.eup %5857  ;;  %v3359_v59 = vpack.c.bf16 %v3349_v39, %v3348_v2  ;;  %v7554_v29 = vpop.f32.mrf.mxu0 }
 0x951   : > { %v3350_v33 = vmul.f32 %v5858_v30, %v7459_v51  ;;  %v3657_v51 = vpop.permute.xlu0 %3656 }
 0x952   : > { %v3358_v56 = vpack.c.bf16 %v3347_v54, %v3346_v16  ;;  %v7556_v49 = vpop.f32.mrf.mxu0 }
 0x953   : > { %v5860_v62 = vpop.eup %5859  ;;  %5250 = vmatpush3.bf16.xpose.msra.mxu0 %v3711_v31 }
 0x954   : > { %v5862_v22 = vpop.eup %5861  ;;  %5219 = vmatprep.mubr.msk.bf16.mxu0 %vm1919_vm1, %v3358_v56  ;;  %v3351_v45 = vmul.f32 %v5860_v62, %v7473_v6  ;;  %5337 = vmatprep.subr.msk.bf16.mxu0 %vm1785_vm0, %v3675_v10  ;;  %v3705_v6 = vsel %vm1785_vm0, %v3673_v46, 0  ;;  %v7558_v48 = vpop.f32.mrf.mxu0 }
 0x955   : > { %5220 = vmatmul.mubr.msk.bf16.gmra.mxu0 %vm1919_vm1, %v3359_v59  ;;  %v5864_v23 = vpop.eup %5863  ;;  %v3353_v3 = vmul.f32 %v5862_v22, %v7463_v55  ;;  %v3659_v55 = vpop.permute.xlu1 %3658 }
 0x956   : > { %v3360_v19 = vpack.c.bf16 %v3351_v45, %v3350_v33  ;;  %v3352_v26 = vmul.f32 %v5864_v23, %v7451_v47  ;;  %v3661_v1 = vpop.permute.xlu0 %3660  ;;  %v7560_v52 = vpop.f32.mrf.mxu0 }
 0x958   : > { %5223 = vmatprep.mubr.msk.bf16.mxu0 %vm1919_vm1, %v3360_v19  ;;  %v3361_v60 = vpack.c.bf16 %v3353_v3, %v3352_v26  ;;  %v7562_v7 = vpop.f32.mrf.mxu0 }
 0x959   : > { %v3663_v47 = vpop.permute.xlu1 %3662 }
 0x95a   : > { %v3665_v27 = vpop.permute.xlu0 %3664  ;;  %v7564_v13 = vpop.f32.mrf.mxu0 }
 0x95b   : > { %5252 = vmatpush3.bf16.xpose.msra.mxu0 %v3708_v58 }
 0x95c   : > { %5338 = vmatprep.subr.msk.bf16.mxu0 %vm1785_vm0, %v3673_v46  ;;  %v7566_v0 = vpop.f32.mrf.mxu0 }
 0x95d   : > { %5224 = vmatmul.mubr.msk.bf16.gmra.mxu0 %vm1919_vm1, %v3361_v60  ;;  %v3667_v34 = vpop.permute.xlu1 %3666 }
 0x95e   : > { %5255 = vmatprep.mubr.msk.bf16.mxu0 %vm1785_vm0, %v3657_v51  ;;  %v3669_v32 = vpop.permute.xlu0 %3668  ;;  %v7568_v24 = vpop.f32.mrf.mxu0 }
 0x960   : > { %v7570_v39 = vpop.f32.mrf.mxu0 }
 0x961   : > { %v3671_v5 = vpop.permute.xlu1 %3670  ;;  %7980 = vst [vmem:[#allocation25_spill] sm:$0xff] %v7570_v39 }
 0x963   : > { %5254 = vmatpush3.bf16.xpose.msra.mxu0 %v3705_v6 }
 0x96a   : > { %5256 = vmatmul.mubr.msk.bf16.vlgmr.msra.gmra.mxu0 %vm1785_vm0, %v3659_v55 }
 0x96b   : > { %5259 = vmatprep.mubr.msk.bf16.mxu0 %vm1785_vm0, %v3661_v1 }
 0x972   : > { %5260 = vmatmul.mubr.msk.bf16.gmra.mxu0 %vm1785_vm0, %v3663_v47 }
 0x973   : > { %5263 = vmatprep.mubr.msk.bf16.mxu0 %vm1785_vm0, %v3665_v27 }
 0x97a   : > { %5264 = vmatmul.mubr.msk.bf16.gmra.mxu0 %vm1785_vm0, %v3667_v34 }
 0x97b   : > { %5267 = vmatprep.mubr.msk.bf16.mxu0 %vm1785_vm0, %v3669_v32 }
 0x982   : > { %5268 = vmatmul.mubr.msk.bf16.gmra.mxu0 %vm1785_vm0, %v3671_v5 }
 0x9fd   : > { %v5213_v31 = vpop.f32.mrf.mxu0 }
 0x9ff   : > { %v3432_v16 = vpop.f32.mrf.mxu0 }
 0xa01   : > { %v5214_v54 = vpop.f32.mrf.mxu0 }
 0xa02   : > { %v3496_v56 = vpack.c.bf16 %v5214_v54, %v5213_v31 }
 0xa03   : > { %v3435_v30 = vpop.f32.mrf.mxu0 }
 0xa04   : > { %v3495_v2 = vpack.c.bf16 %v3435_v30, %v3432_v16 }
 0xa05   : > { %v5217_v62 = vpop.f32.mrf.mxu0 }
 0xa06   : > { %5231 = vmatprep.mubr.msk.bf16.mxu1 %vm1785_vm0, %v3495_v2 }
 0xa07   : > { %v3448_v10 = vpop.f32.mrf.mxu0  ;;  %5232 = vmatmul.mubr.msk.bf16.vlgmr.msra.gmra.mxu1 %vm1785_vm0, %v3496_v56 }
 0xa09   : > { %v5218_v59 = vpop.f32.mrf.mxu0 }
 0xa0a   : > { %v3498_v45 = vpack.c.bf16 %v5218_v59, %v5217_v62 }
 0xa0b   : > { %v3451_v22 = vpop.f32.mrf.mxu0 }
 0xa0c   : > { %v3497_v33 = vpack.c.bf16 %v3451_v22, %v3448_v10 }
 0xa0e   : > { %5235 = vmatprep.mubr.msk.bf16.mxu1 %vm1785_vm0, %v3497_v33 }
 0xa0f   : > { %5236 = vmatmul.mubr.msk.bf16.gmra.mxu1 %vm1785_vm0, %v3498_v45 }
 0xa15   : > { %v5221_v23 = vpop.f32.mrf.mxu0 }
 0xa17   : > { %v3464_v19 = vpop.f32.mrf.mxu0 }
 0xa19   : > { %v5222_v3 = vpop.f32.mrf.mxu0 }
 0xa1a   : > { %v3500_v46 = vpack.c.bf16 %v5222_v3, %v5221_v23 }
 0xa1b   : > { %v3467_v58 = vpop.f32.mrf.mxu0 }
 0xa1c   : > { %v3499_v26 = vpack.c.bf16 %v3467_v58, %v3464_v19 }
 0xa1d   : > { %v5225_v60 = vpop.f32.mrf.mxu0 }
 0xa1e   : > { %5239 = vmatprep.mubr.msk.bf16.mxu1 %vm1785_vm0, %v3499_v26 }
 0xa1f   : > { %v3480_v51 = vpop.f32.mrf.mxu0  ;;  %5240 = vmatmul.mubr.msk.bf16.gmra.mxu1 %vm1785_vm0, %v3500_v46 }
 0xa21   : > { %v5226_v6 = vpop.f32.mrf.mxu0 }
 0xa22   : > { %v3502_v47 = vpack.c.bf16 %v5226_v6, %v5225_v60 }
 0xa23   : > { %v3483_v55 = vpop.f32.mrf.mxu0 }
 0xa24   : > { %v3501_v1 = vpack.c.bf16 %v3483_v55, %v3480_v51 }
 0xa26   : > { %5243 = vmatprep.mubr.msk.bf16.mxu1 %vm1785_vm0, %v3501_v1 }
 0xa27   : > { %5244 = vmatmul.mubr.msk.bf16.gmra.mxu1 %vm1785_vm0, %v3502_v47 }
 0xa2a   : > { %v5257_v27 = vpop.f32.mrf.mxu0 }
 0xa2b   : > { %v3819_v34 = vsel %vm1919_vm1, %v5257_v27, -inf }
 0xa2c   : > { %3820 = vmax.xlane.f32.xlu0 %v3819_v34  ;;  %v3750_v32 = vpop.f32.mrf.mxu0 }
 0xa2d   : > { %v3813_v5 = vsel %vm1919_vm1, %v3750_v32, -inf }
 0xa2e   : > { %v5258_v21 = vpop.f32.mrf.mxu0 }
 0xa2f   : > { %v3822_v54 = vsel %vm1919_vm1, %v5258_v21, -inf }
 0xa30   : > { %3814 = vmax.xlane.f32.xlu0 %v3813_v5  ;;  %v3753_v61 = vpop.f32.mrf.mxu0 }
 0xa31   : > { %v3816_v31 = vsel %vm1919_vm1, %v3753_v61, -inf }
 0xa32   : > { %3817 = vmax.xlane.f32.xlu1 %v3816_v31  ;;  %v5261_v16 = vpop.f32.mrf.mxu0  ;;  %v5935_v31 = vld [vmem:[#allocation3 + $0x34] ss:$8 sps:$4 sm:$0xff]  }
 0xa33   : > { %v3831_v2 = vsel %vm1919_vm1, %v5261_v16, -inf }
 0xa34   : > { %3823 = vmax.xlane.f32.xlu0 %v3822_v54  ;;  %v7584_v30 = vpop.f32.mrf.mxu0  ;;  %v5936_v54 = vld [vmem:[#allocation3 + $0x24] ss:$8 sps:$4 sm:$0xff]  }
 0xa35   : > { %v3825_v10 = vsel %vm1919_vm1, %v7584_v30, -inf }
 0xa36   : > { %3832 = vmax.xlane.f32.xlu1 %v3831_v2  ;;  %v7587_v56 = vpop.f32.mrf.mxu0 }
 0xa37   : > { %v3834_v45 = vsel %vm1919_vm1, %v7587_v56, -inf }
 0xa38   : > { %v7589_v62 = vpop.f32.mrf.mxu0 }
 0xa39   : > { %v3828_v59 = vsel %vm1919_vm1, %v7589_v62, -inf }
 0xa3a   : > { %3826 = vmax.xlane.f32.xlu1 %v3825_v10  ;;  %3829 = vmax.xlane.f32.xlu0 %v3828_v59  ;;  %v7595_v22 = vpop.f32.mrf.mxu0 }
 0xa3b   : > { %v3843_v23 = vsel %vm1919_vm1, %v7595_v22, -inf }
 0xa3c   : > { %v7597_v33 = vpop.f32.mrf.mxu0 }
 0xa3d   : > { %v3837_v58 = vsel %vm1919_vm1, %v7597_v33, -inf }
 0xa3e   : > { %3835 = vmax.xlane.f32.xlu0 %v3834_v45  ;;  %3844 = vmax.xlane.f32.xlu1 %v3843_v23  ;;  %v7603_v19 = vpop.f32.mrf.mxu0 }
 0xa3f   : > { %v3846_v51 = vsel %vm1919_vm1, %v7603_v19, -inf }
 0xa40   : > { %v7605_v3 = vpop.f32.mrf.mxu0 }
 0xa41   : > { %v3840_v26 = vsel %vm1919_vm1, %v7605_v3, -inf }
 0xa42   : > { %3838 = vmax.xlane.f32.xlu1 %v3837_v58  ;;  %3841 = vmax.xlane.f32.xlu0 %v3840_v26  ;;  %v7611_v46 = vpop.f32.mrf.mxu0 }
 0xa43   : > { %v3855_v6 = vsel %vm1919_vm1, %v7611_v46, -inf }
 0xa44   : > { %v7613_v60 = vpop.f32.mrf.mxu0 }
 0xa45   : > { %v3849_v47 = vsel %vm1919_vm1, %v7613_v60, -inf }
 0xa46   : > { %3847 = vmax.xlane.f32.xlu0 %v3846_v51  ;;  %3856 = vmax.xlane.f32.xlu1 %v3855_v6  ;;  %v7619_v55 = vpop.f32.mrf.mxu0 }
 0xa47   : > { %v3858_v5 = vsel %vm1919_vm1, %v7619_v55, -inf }
 0xa48   : > { %v7621_v1 = vpop.f32.mrf.mxu0 }
 0xa49   : > { %7981 = vst [vmem:[#allocation26_spill] sm:$0xff] %v7621_v1  ;;  %v3852_v34 = vsel %vm1919_vm1, %v7621_v1, -inf }
 0xa4a   : > { %3850 = vmax.xlane.f32.xlu1 %v3849_v47  ;;  %3853 = vmax.xlane.f32.xlu0 %v3852_v34 }
 0xa4e   : > { %3859 = vmax.xlane.f32.xlu0 %v3858_v5 }
 0xa5b   : > { %4003 = vrot.lane.b32.xlu1 %v5935_v31, %s6183_s24 }
 0xa5f   : > { %4001 = vrot.lane.b32.xlu1 %v5936_v54, %s6183_s24 }
 0xab5   : > { %v3821_v2 = vpop.xlane.xlu0 %3820 }
 0xab6   : > { %v3863_v10 = vsub.f32 %v5257_v27, %v3821_v2 }
 0xab8   : > { %v3881_v59 = vmul.f32 1.442695, %v3863_v10 }
 0xab9   : > { %v3815_v45 = vpop.xlane.xlu0 %3814 }
 0xaba   : > { %5865 = vpow2.f32 %v3881_v59  ;;  %v3861_v23 = vsub.f32 %v3750_v32, %v3815_v45  ;;  %v2967_v32 = vadd.f32 %v7540_v40, %v7317_v50  ;;  %v2970_v40 = vadd.f32 %v7544_v8, %v7321_v11 }
 0xabb   : > { %v3818_v58 = vpop.xlane.xlu1 %3817  ;;  %v2983_v8 = vadd.f32 %v7548_v18, %v7325_v57 }
 0xabc   : > { %v3877_v26 = vmul.f32 1.442695, %v3861_v23  ;;  %v3862_v51 = vsub.f32 %v3753_v61, %v3818_v58 }
 0xabd   : > { %v3824_v6 = vpop.xlane.xlu0 %3823 }
 0xabe   : > { %5867 = vpow2.f32 %v3877_v26  ;;  %v3864_v47 = vsub.f32 %v5258_v21, %v3824_v6  ;;  %v3879_v34 = vmul.f32 1.442695, %v3862_v51  ;;  %v2962_v51 = vadd.f32 %v7546_v25, %v7323_v4 }
 0xabf   : > { %v3833_v5 = vpop.xlane.xlu1 %3832 }
 0xac0   : > { %v3883_v39 = vmul.f32 1.442695, %v3864_v47  ;;  %v3867_v12 = vsub.f32 %v5261_v16, %v3833_v5 }
 0xac2   : > { %5869 = vpow2.f32 %v3883_v39  ;;  %v3889_v31 = vmul.f32 1.442695, %v3867_v12  ;;  %v2959_v39 = vadd.f32 %v7542_v38, %v7319_v53 }
 0xac3   : > { %5871 = vpow2.f32 %v3879_v34  ;;  %v3827_v54 = vpop.xlane.xlu1 %3826  ;;  %v3830_v1 = vpop.xlane.xlu0 %3829 }
 0xac4   : > { %5873 = vpow2.f32 %v3889_v31  ;;  %v3865_v27 = vsub.f32 %v7584_v30, %v3827_v54  ;;  %v3866_v21 = vsub.f32 %v7589_v62, %v3830_v1 }
 0xac6   : > { %v3885_v2 = vmul.f32 1.442695, %v3865_v27  ;;  %v3887_v23 = vmul.f32 1.442695, %v3866_v21  ;;  %v2975_v27 = vadd.f32 %v7550_v37, %v7327_v9 }
 0xac7   : > { %v7634_v61 = vpop.eup %5865  ;;  %v5233_v10 = vpop.f32.mrf.mxu1 }
 0xac8   : > { %v3845_v59 = vpop.xlane.xlu1 %3844  ;;  %5875 = vpow2.f32 %v3885_v2  ;;  %v7639_v12 = vadd.f32 %v5233_v10, %v2967_v32  ;;  %v3836_v16 = vpop.xlane.xlu0 %3835  ;;  %v3915_v30 = vsel %vm1919_vm1, %v7634_v61, 0.0 }
 0xac9   : > { %v3868_v45 = vsub.f32 %v7587_v56, %v3836_v16  ;;  %v3577_v50 = vpop.f32.mrf.mxu1  ;;  %3916 = vadd.xlane.f32.xlu1 %v3915_v30  ;;  %v3871_v53 = vsub.f32 %v7595_v22, %v3845_v59 }
 0xaca   : > { %v7646_v62 = vadd.f32 %v3577_v50, %v2959_v39 }
 0xacb   : > { %v7648_v1 = vpop.eup %5867  ;;  %v3891_v38 = vmul.f32 1.442695, %v3868_v45  ;;  %v5234_v58 = vpop.f32.mrf.mxu1  ;;  %v3897_v5 = vmul.f32 1.442695, %v3871_v53  ;;  %v2978_v45 = vadd.f32 %v7554_v29, %v7331_v28 }
 0xacc   : > { %v3839_v26 = vpop.xlane.xlu1 %3838  ;;  %v7653_v6 = vadd.f32 %v5234_v58, %v2970_v40  ;;  %v3842_v56 = vpop.xlane.xlu0 %3841  ;;  %v3909_v47 = vsel %vm1919_vm1, %v7648_v1, 0.0 }
 0xacd   : > { %5877 = vpow2.f32 %v3891_v38  ;;  %v3580_v11 = vpop.f32.mrf.mxu1  ;;  %3910 = vadd.xlane.f32.xlu1 %v3909_v47  ;;  %v3869_v4 = vsub.f32 %v7597_v33, %v3839_v26  ;;  %v2986_v33 = vadd.f32 %v7552_v44, %v7329_v14  ;;  %v3870_v29 = vsub.f32 %v7605_v3, %v3842_v56 }
 0xace   : > { %v7659_v34 = vadd.f32 %v3580_v11, %v2962_v51  ;;  %5879 = vpow2.f32 %v3887_v23  ;;  %v2999_v56 = vadd.f32 %v7556_v49, %v7333_v15 }
 0xacf   : > { %v7661_v22 = vpop.eup %5869  ;;  %v5237_v25 = vpop.f32.mrf.mxu1  ;;  %5881 = vpow2.f32 %v3897_v5  ;;  %v3893_v37 = vmul.f32 1.442695, %v3869_v4  ;;  %v3895_v11 = vmul.f32 1.442695, %v3870_v29  ;;  %v7982_v29 = vld [vmem:[#allocation26_spill] sm:$0xff] }
 0xad0   : > { %v3857_v31 = vpop.xlane.xlu1 %3856  ;;  %v7664_v54 = vpop.eup %5871  ;;  %v7668_v32 = vadd.f32 %v5237_v25, %v2983_v8  ;;  %v3918_v57 = vsel %vm1919_vm1, %v7661_v22, 0.0 }
 0xad1   : > { %v3848_v2 = vpop.xlane.xlu0 %3847  ;;  %v7672_v18 = vpop.eup %5873  ;;  %3919 = vadd.xlane.f32.xlu0 %v3918_v57  ;;  %v3875_v10 = vsub.f32 %v7611_v46, %v3857_v31  ;;  %v3912_v46 = vsel %vm1919_vm1, %v7664_v54, 0.0  ;;  %5883 = vpow2.f32 %v3893_v37 }
 0xad2   : > { %v3593_v21 = vpop.f32.mrf.mxu1  ;;  %v3927_v9 = vsel %vm1919_vm1, %v7672_v18, 0.0  ;;  %v3872_v39 = vsub.f32 %v7603_v19, %v3848_v2 }
 0xad3   : > { %v7677_v59 = vadd.f32 %v3593_v21, %v2975_v27  ;;  %3928 = vadd.xlane.f32.xlu1 %v3927_v9  ;;  %v3905_v19 = vmul.f32 1.442695, %v3875_v10  ;;  %v2991_v27 = vadd.f32 %v7558_v48, %v7335_v17  ;;  %v3002_v21 = vadd.f32 %v7560_v52, %v7337_v20 }
 0xad4   : > { %v5238_v16 = vpop.f32.mrf.mxu1  ;;  %v3851_v30 = vpop.xlane.xlu1 %3850  ;;  %v2994_v9 = vadd.f32 %v7562_v7, %v7339_v43  ;;  %v3015_v20 = vadd.f32 %v7564_v13, %v7341_v35  ;;  %v3018_v13 = vadd.f32 %v7568_v24, %v7345_v41 }
 0xad5   : > { %v7684_v50 = vadd.f32 %v5238_v16, %v2986_v33  ;;  %v3873_v14 = vsub.f32 %v7613_v60, %v3851_v30  ;;  %v7687_v44 = vpop.xlane.xlu0 %3853  ;;  %v7691_v40 = vpop.eup %5875  ;;  %3913 = vadd.xlane.f32.xlu0 %v3912_v46  ;;  %v3899_v60 = vmul.f32 1.442695, %v3872_v39 }
 0xad6   : > { %v3596_v23 = vpop.f32.mrf.mxu1  ;;  %v3921_v28 = vsel %vm1919_vm1, %v7691_v40, 0.0 }
 0xad7   : > { %v3901_v53 = vmul.f32 1.442695, %v3873_v14  ;;  %v7693_v38 = vadd.f32 %v3596_v23, %v2978_v45  ;;  %3922 = vadd.xlane.f32.xlu1 %v3921_v28  ;;  %v3007_v45 = vadd.f32 %v7566_v0, %v7343_v36 }
 0xad8   : > { %v4004_v58 = vpop.permute.xlu1 %4003 }
 0xad9   : > { %5885 = vpow2.f32 %v3901_v53  ;;  %v3860_v26 = vpop.xlane.xlu0 %3859  ;;  %5271 = vmatprep.subr.bf16.mxu1 %v4004_v58 }
 0xada   : > { %v3876_v51 = vsub.f32 %v7619_v55, %v3860_v26  ;;  %5272 = vmatpush3.bf16.msra.mxu1 %v4004_v58  ;;  %v7699_v47 = vpop.eup %5877  ;;  %5887 = vpow2.f32 %v3905_v19 }
 0xadb   : > { %5889 = vpow2.f32 %v3899_v60  ;;  %v3930_v5 = vsel %vm1919_vm1, %v7699_v47, 0.0  ;;  %v7703_v3 = vpop.eup %5879  ;;  %v3874_v60 = vsub.f32 %v7982_v29, %v7687_v44 }
 0xadc   : > { %v3907_v8 = vmul.f32 1.442695, %v3876_v51  ;;  %v4002_v4 = vpop.permute.xlu1 %4001  ;;  %3931 = vadd.xlane.f32.xlu0 %v3930_v5  ;;  %v3924_v25 = vsel %vm1919_vm1, %v7703_v3, 0.0  ;;  %v7709_v31 = vpop.eup %5881 }
 0xadd   : > { %5273 = vmatprep.subr.bf16.mxu1 %v4002_v4  ;;  %v3939_v49 = vsel %vm1919_vm1, %v7709_v31, 0.0  ;;  %v3903_v58 = vmul.f32 1.442695, %v3874_v60 }
 0xade   : > { %5274 = vmatpush3.bf16.msra.mxu1 %v4002_v4  ;;  %5891 = vpow2.f32 %v3907_v8  ;;  %v7721_v10 = vpop.eup %5883 }
 0xadf   : > { %5893 = vpow2.f32 %v3895_v11  ;;  %v5241_v55 = vpop.f32.mrf.mxu1  ;;  %v3933_v43 = vsel %vm1919_vm1, %v7721_v10, 0.0 }
 0xae0   : > { %v7713_v2 = vadd.f32 %v5241_v55, %v2999_v56  ;;  %3925 = vadd.xlane.f32.xlu0 %v3924_v25  ;;  %5895 = vpow2.f32 %v3903_v58 }
 0xae1   : > { %v3609_v57 = vpop.f32.mrf.mxu1 }
 0xae2   : > { %v7717_v33 = vadd.f32 %v3609_v57, %v2991_v27 }
 0xae3   : > { %v5242_v15 = vpop.f32.mrf.mxu1 }
 0xae4   : > { %v7725_v37 = vadd.f32 %v5242_v15, %v3002_v21  ;;  %3940 = vadd.xlane.f32.xlu0 %v3939_v49 }
 0xae5   : > { %v3612_v48 = vpop.f32.mrf.mxu1 }
 0xae6   : > { %v7727_v17 = vpop.eup %5885  ;;  %v7731_v52 = vadd.f32 %v3612_v48, %v2994_v9 }
 0xae7   : > { %v3945_v39 = vsel %vm1919_vm1, %v7727_v17, 0.0  ;;  %v7735_v16 = vpop.eup %5887  ;;  %v5245_v30 = vpop.f32.mrf.mxu1 }
 0xae8   : > { %3946 = vadd.xlane.f32.xlu1 %v3945_v39  ;;  %v7739_v7 = vpop.eup %5889  ;;  %v7743_v14 = vadd.f32 %v5245_v30, %v3015_v20  ;;  %3934 = vadd.xlane.f32.xlu0 %v3933_v43  ;;  %v3951_v23 = vsel %vm1919_vm1, %v7735_v16, 0.0 }
 0xae9   : > { %v3625_v35 = vpop.f32.mrf.mxu1  ;;  %v3942_v28 = vsel %vm1919_vm1, %v7739_v7, 0.0 }
 0xaea   : > { %v7747_v46 = vadd.f32 %v3625_v35, %v3007_v45 }
 0xaeb   : > { %v7751_v19 = vpop.eup %5891  ;;  %v5246_v53 = vpop.f32.mrf.mxu1 }
 0xaec   : > { %3952 = vadd.xlane.f32.xlu1 %v3951_v23  ;;  %v7755_v36 = vpop.eup %5893  ;;  %v7757_v0 = vadd.f32 %v5246_v53, %v3018_v13  ;;  %3943 = vadd.xlane.f32.xlu0 %v3942_v28  ;;  %v3954_v41 = vsel %vm1919_vm1, %v7751_v19, 0.0 }
 0xaed   : > { %v3936_v24 = vsel %vm1919_vm1, %v7755_v36, 0.0  ;;  %v7769_v26 = vpop.eup %5895 }
 0xaee   : > { %v3948_v51 = vsel %vm1919_vm1, %v7769_v26, 0.0 }
 0xaf0   : > { %3955 = vadd.xlane.f32.xlu1 %v3954_v41  ;;  %3937 = vadd.xlane.f32.xlu0 %v3936_v24 }
 0xb01   : > { %3997 = vrot.lane.b32.xlu1 %v7395_v63, %s6183_s24 }
 0xb06   : > { %3999 = vrot.lane.b32.xlu0 %v7399_v42, %s6183_s24  ;;  %s6184_s24 = smov [#allocation12]  }
 0xb07   : > { %s6047_s13 = sshll.u32 %s6184_s24, 4  ;;  %s6048_s13 = int_to_ptr.vmem [resolvable:$false] %s6047_s13 }
 0xb08   : > { %s6049_s12 = scalar_lea.vmem %s6048_s13, 4096  ;;  %p6050_p6 = scmp.lt.s32.totalorder %s7867_s17, %s6048_s13 }
 0xb09   : > { %p6051_p13 = scmp.lt.s32.totalorder %s6049_s12, %s6043_s9 }
 0xb0b   : > { %p6052_p12 = por %p6051_p13, %p6050_p6 }
 0xb0d   : > { %p6053_p0 = pnand %p6052_p12, %p6046_p11 }
 0xb25   : > { %3949 = vadd.xlane.f32.xlu0 %v3948_v51 }
 0xb52   : > { %v3917_v11 = vpop.xlane.xlu1 %3916 }
 0xb56   : > { %v3911_v8 = vpop.xlane.xlu1 %3910 }
 0xb57   : > { %5897 = vrcp.f32 %v3911_v8 }
 0xb5a   : > { %v3920_v5 = vpop.xlane.xlu0 %3919 }
 0xb5c   : > { %v3929_v56 = vpop.xlane.xlu1 %3928 }
 0xb5e   : > { %v3914_v4 = vpop.xlane.xlu0 %3913 }
 0xb5f   : > { %5899 = vrcp.f32 %v3914_v4 }
 0xb60   : > { %v3923_v44 = vpop.xlane.xlu1 %3922  ;;  %5901 = vrcp.f32 %v3920_v5 }
 0xb64   : > { %v5898_v55 = vpop.eup %5897 }
 0xb65   : > { %v3932_v63 = vpop.xlane.xlu0 %3931  ;;  %v3973_v57 = vmul.f32 %v5898_v55, %v7648_v1 }
 0xb69   : > { %v3926_v42 = vpop.xlane.xlu0 %3925 }
 0xb6a   : > { %5903 = vrcp.f32 %v3926_v42 }
 0xb6b   : > { %5905 = vrcp.f32 %v3917_v11 }
 0xb6c   : > { %v5900_v25 = vpop.eup %5899  ;;  %5907 = vrcp.f32 %v3923_v44 }
 0xb6d   : > { %v3941_v27 = vpop.xlane.xlu0 %3940  ;;  %v3974_v21 = vmul.f32 %v5900_v25, %v7664_v54  ;;  %5909 = vrcp.f32 %v3932_v63  ;;  %v5902_v1 = vpop.eup %5901 }
 0xb6e   : > { %5911 = vrcp.f32 %v3929_v56  ;;  %v3976_v23 = vmul.f32 %v5902_v1, %v7661_v22 }
 0xb6f   : > { %v3989_v15 = vpack.c.bf16 %v3974_v21, %v3973_v57 }
 0xb71   : > { %v3947_v49 = vpop.xlane.xlu1 %3946  ;;  %v3935_v9 = vpop.xlane.xlu0 %3934  ;;  %5279 = vmatprep.mubr.msk.bf16.mxu1 %vm1919_vm1, %v3989_v15  ;;  %v5671_v15 = vld [vmem:[#allocation10 + $0x38] sm:$0xff]  }
 0xb72   : > { %5295 = vmatprep.subr.bf16.mxu0 %v5671_v15 }
 0xb73   : > { %5296 = vmatpush3.bf16.msra.mxu0 %v5671_v15 }
 0xb75   : > { %v3953_v48 = vpop.xlane.xlu1 %3952  ;;  %v3944_v20 = vpop.xlane.xlu0 %3943 }
 0xb77   : > { %v5904_v45 = vpop.eup %5903 }
 0xb78   : > { %v5906_v35 = vpop.eup %5905  ;;  %v3978_v53 = vmul.f32 %v5904_v45, %v7703_v3 }
 0xb79   : > { %v3956_v39 = vpop.xlane.xlu1 %3955  ;;  %v3938_v30 = vpop.xlane.xlu0 %3937  ;;  %v3975_v28 = vmul.f32 %v5906_v35, %v7634_v61 }
 0xb7a   : > { %5913 = vrcp.f32 %v3938_v30  ;;  %v5908_v13 = vpop.eup %5907 }
 0xb7b   : > { %5915 = vrcp.f32 %v3935_v9  ;;  %v3977_v41 = vmul.f32 %v5908_v13, %v7691_v40  ;;  %v3990_v24 = vpack.c.bf16 %v3976_v23, %v3975_v28  ;;  %v5910_v29 = vpop.eup %5909  ;;  %v7797_v9 = vpop.f32.mrf.mxu1 }
 0xb7c   : > { %5917 = vrcp.f32 %v3944_v20  ;;  %v5912_v58 = vpop.eup %5911  ;;  %v3980_v11 = vmul.f32 %v5910_v29, %v7699_v47 }
 0xb7d   : > { %v4000_v43 = vpop.permute.xlu0 %3999  ;;  %v3998_v54 = vpop.permute.xlu1 %3997  ;;  %5919 = vrcp.f32 %v3941_v27  ;;  %v3991_v60 = vpack.c.bf16 %v3978_v53, %v3977_v41  ;;  %v3979_v61 = vmul.f32 %v5912_v58, %v7672_v18 }
 0xb7e   : > { %5275 = vmatprep.subr.bf16.mxu1 %v4000_v43  ;;  %5921 = vrcp.f32 %v3956_v39 }
 0xb7f   : > { %5276 = vmatpush3.bf16.msra.mxu1 %v4000_v43  ;;  %v3992_v5 = vpack.c.bf16 %v3980_v11, %v3979_v61  ;;  %5923 = vrcp.f32 %v3947_v49  ;;  %v5672_v49 = vld [vmem:[#allocation10 + $0x30] sm:$0xff]  }
 0xb80   : > { %5277 = vmatprep.subr.bf16.mxu1 %v3998_v54  ;;  %5925 = vrcp.f32 %v3953_v48  ;;  %5297 = vmatprep.subr.bf16.mxu0 %v5672_v49 }
 0xb81   : > { %5298 = vmatpush3.bf16.msra.mxu0 %v5672_v49 }
 0xb83   : > { %5278 = vmatpush3.bf16.msra.mxu1 %v3998_v54 }
 0xb86   : > { %5280 = vmatmul.mubr.msk.bf16.vlgmr.msra.gmra.mxu1 %vm1919_vm1, %v3990_v24 }
 0xb87   : > { %v5914_v51 = vpop.eup %5913  ;;  %5283 = vmatprep.mubr.msk.bf16.mxu1 %vm1919_vm1, %v3991_v60 }
 0xb88   : > { %v5916_v22 = vpop.eup %5915  ;;  %v3982_v3 = vmul.f32 %v5914_v51, %v7755_v36 }
 0xb89   : > { %v3981_v8 = vmul.f32 %v5916_v22, %v7721_v10  ;;  %v5918_v40 = vpop.eup %5917 }
 0xb8a   : > { %v5920_v63 = vpop.eup %5919  ;;  %v3984_v56 = vmul.f32 %v5918_v40, %v7739_v7 }
 0xb8b   : > { %v3993_v4 = vpack.c.bf16 %v3982_v3, %v3981_v8  ;;  %v3983_v42 = vmul.f32 %v5920_v63, %v7709_v31  ;;  %v5922_v47 = vpop.eup %5921  ;;  %v7810_v3 = vld [vmem:[%s7940_s6] ss:$0 sm:$0xff] }
 0xb8c   : > { %v5924_v10 = vpop.eup %5923  ;;  %v3988_v44 = vmul.f32 %v5922_v47, %v7751_v19 }
 0xb8d   : > { %v3994_v55 = vpack.c.bf16 %v3984_v56, %v3983_v42  ;;  %v5926_v36 = vpop.eup %5925  ;;  %v3985_v27 = vmul.f32 %v5924_v10, %v7727_v17 }
 0xb8e   : > { %5284 = vmatmul.mubr.msk.bf16.gmra.mxu1 %vm1919_vm1, %v3992_v5  ;;  %v3987_v31 = vmul.f32 %v5926_v36, %v7735_v16 }
 0xb8f   : > { %5287 = vmatprep.mubr.msk.bf16.mxu1 %vm1919_vm1, %v3993_v4 }
 0xb90   : > { %v3996_v21 = vpack.c.bf16 %v3988_v44, %v3987_v31 }
 0xb96   : > { %5288 = vmatmul.mubr.msk.bf16.gmra.mxu1 %vm1919_vm1, %v3994_v55 }
 0xbae   : > { %v3950_v18 = vpop.xlane.xlu0 %3949 }
 0xbaf   : > { %5927 = vrcp.f32 %v3950_v18 }
 0xbbc   : > { %v5928_v25 = vpop.eup %5927 }
 0xbbd   : > { %v3986_v7 = vmul.f32 %v5928_v25, %v7769_v26 }
 0xbbf   : > { %v3995_v57 = vpack.c.bf16 %v3986_v7, %v3985_v27 }
 0xbc1   : > { %5291 = vmatprep.mubr.msk.bf16.mxu1 %vm1919_vm1, %v3995_v57 }
 0xbc2   : > { %5292 = vmatmul.mubr.msk.bf16.gmra.mxu1 %vm1919_vm1, %v3996_v21 }
 0xc46   : > { %v5281_v19 = vpop.f32.mrf.mxu1 }
 0xc48   : > { %v4067_v17 = vpop.f32.mrf.mxu1 }
 0xc4a   : > { %v5282_v48 = vpop.f32.mrf.mxu1 }
 0xc4b   : > { %v4131_v16 = vpack.c.bf16 %v5282_v48, %v5281_v19 }
 0xc4c   : > { %v4070_v26 = vpop.f32.mrf.mxu1 }
 0xc4d   : > { %v4130_v20 = vpack.c.bf16 %v4070_v26, %v4067_v17 }
 0xc4e   : > { %v5285_v39 = vpop.f32.mrf.mxu1 }
 0xc4f   : > { %5299 = vmatprep.mubr.msk.bf16.mxu0 %vm1785_vm0, %v4130_v20 }
 0xc50   : > { %v4083_v30 = vpop.f32.mrf.mxu1  ;;  %5300 = vmatmul.mubr.msk.bf16.vlgmr.msra.gmra.mxu0 %vm1785_vm0, %v4131_v16 }
 0xc52   : > { %v5286_v1 = vpop.f32.mrf.mxu1 }
 0xc53   : > { %v4133_v45 = vpack.c.bf16 %v5286_v1, %v5285_v39  ;;  %v7985_v39 = vld [vmem:[#allocation25_spill] sm:$0xff] }
 0xc54   : > { %v4086_v43 = vpop.f32.mrf.mxu1 }
 0xc55   : > { %v4132_v54 = vpack.c.bf16 %v4086_v43, %v4083_v30 }
 0xc56   : > { %v5289_v35 = vpop.f32.mrf.mxu1 }
 0xc57   : > { %5303 = vmatprep.mubr.msk.bf16.mxu0 %vm1785_vm0, %v4132_v54 }
 0xc58   : > { %v4099_v13 = vpop.f32.mrf.mxu1  ;;  %5304 = vmatmul.mubr.msk.bf16.gmra.mxu0 %vm1785_vm0, %v4133_v45 }
 0xc5a   : > { %v5290_v23 = vpop.f32.mrf.mxu1 }
 0xc5b   : > { %v4135_v41 = vpack.c.bf16 %v5290_v23, %v5289_v35 }
 0xc5c   : > { %v4102_v53 = vpop.f32.mrf.mxu1 }
 0xc5d   : > { %v4134_v28 = vpack.c.bf16 %v4102_v53, %v4099_v13 }
 0xc5f   : > { %5307 = vmatprep.mubr.msk.bf16.mxu0 %vm1785_vm0, %v4134_v28 }
 0xc60   : > { %5308 = vmatmul.mubr.msk.bf16.gmra.mxu0 %vm1785_vm0, %v4135_v41 }
 0xc82   : > { %v5293_v24 = vpop.f32.mrf.mxu1 }
 0xc84   : > { %v4115_v29 = vpop.f32.mrf.mxu1 }
 0xc86   : > { %v5294_v60 = vpop.f32.mrf.mxu1 }
 0xc87   : > { %v4137_v22 = vpack.c.bf16 %v5294_v60, %v5293_v24 }
 0xc88   : > { %v4118_v58 = vpop.f32.mrf.mxu1 }
 0xc89   : > { %v4136_v51 = vpack.c.bf16 %v4118_v58, %v4115_v29 }
 0xc8b   : > { %5311 = vmatprep.mubr.msk.bf16.mxu0 %vm1785_vm0, %v4136_v51 }
 0xc8c   : > { %5312 = vmatmul.mubr.msk.bf16.gmra.mxu0 %vm1785_vm0, %v4137_v22 }
 0xd10   : > { %v5301_v11 = vpop.f32.mrf.mxu0 }
 0xd11   : > { %v4277_v61 = vadd.f32 %v5301_v11, %v7639_v12 }
 0xd12   : > { %v4212_v8 = vpop.f32.mrf.mxu0 }
 0xd13   : > { %v4300_v5 = vadd.f32 %v7810_v3, %v4277_v61  ;;  %v4275_v40 = vadd.f32 %v4212_v8, %v7646_v62 }
 0xd14   : > { %v5302_v4 = vpop.f32.mrf.mxu0 }
 0xd15   : > { %4316 = vst [vmem:[%s6417_s7 + $0x10] sm:$0xff] %v4300_v5  ;;  %v4298_v63 = vadd.f32 %v7810_v3, %v4275_v40  ;;  %v4278_v56 = vadd.f32 %v5302_v4, %v7653_v6 }
 0xd16   : > { %v4215_v42 = vpop.f32.mrf.mxu0 }
 0xd17   : > { %4314 = vst [vmem:[%s6417_s7] sm:$0xff] %v4298_v63  ;;  %v4301_v55 = vadd.f32 %v7810_v3, %v4278_v56  ;;  %v4276_v12 = vadd.f32 %v4215_v42, %v7659_v34 }
 0xd18   : > { %v5305_v18 = vpop.f32.mrf.mxu0 }
 0xd19   : > { %4317 = vst [vmem:[%s6417_s7 + $0x18] sm:$0xff] %v4301_v55  ;;  %v4299_v47 = vadd.f32 %v7810_v3, %v4276_v12  ;;  %v4281_v62 = vadd.f32 %v5305_v18, %v7668_v32 }
 0xd1a   : > { %v4228_v10 = vpop.f32.mrf.mxu0 }
 0xd1b   : > { %4315 = vst [vmem:[%s6417_s7 + $0x8] sm:$0xff] %v4299_v47  ;;  %v4304_v36 = vadd.f32 %v7810_v3, %v4281_v62  ;;  %v4279_v6 = vadd.f32 %v4228_v10, %v7677_v59 }
 0xd1c   : > { %v5306_v25 = vpop.f32.mrf.mxu0 }
 0xd1d   : > { %4320 = vst [vmem:[%s6417_s7 + $0x30] sm:$0xff] %v4304_v36  ;;  %v4302_v44 = vadd.f32 %v7810_v3, %v4279_v6  ;;  %v4282_v34 = vadd.f32 %v5306_v25, %v7684_v50 }
 0xd1e   : > { %v4231_v27 = vpop.f32.mrf.mxu0 }
 0xd1f   : > { %4318 = vst [vmem:[%s6417_s7 + $0x20] sm:$0xff] %v4302_v44  ;;  %v4305_v7 = vadd.f32 %v7810_v3, %v4282_v34  ;;  %v4280_v32 = vadd.f32 %v4231_v27, %v7693_v38 }
 0xd20   : > { %v5309_v31 = vpop.f32.mrf.mxu0 }
 0xd21   : > { %4321 = vst [vmem:[%s6417_s7 + $0x38] sm:$0xff] %v4305_v7  ;;  %v4303_v57 = vadd.f32 %v7810_v3, %v4280_v32  ;;  %v4285_v59 = vadd.f32 %v5309_v31, %v7713_v2 }
 0xd22   : > { %v4244_v21 = vpop.f32.mrf.mxu0 }
 0xd23   : > { %4319 = vst [vmem:[%s6417_s7 + $0x28] sm:$0xff] %v4303_v57  ;;  %v4308_v50 = vadd.f32 %v7810_v3, %v4285_v59  ;;  %v4283_v15 = vadd.f32 %v4244_v21, %v7717_v33 }
 0xd24   : > { %v5310_v49 = vpop.f32.mrf.mxu0 }
 0xd25   : > { %4324 = vst [vmem:[%s6417_s7 + $0x50] sm:$0xff] %v4308_v50  ;;  %v4306_v38 = vadd.f32 %v7810_v3, %v4283_v15  ;;  %v4286_v19 = vadd.f32 %v5310_v49, %v7725_v37  ;;  %v7984_v37 = vld [vmem:[#allocation24_spill] sm:$0xff] }
 0xd26   : > { %v4247_v17 = vpop.f32.mrf.mxu0  ;;  %v3010_v30 = vadd.f32 %v7985_v39, %v7984_v37 }
 0xd27   : > { %4322 = vst [vmem:[%s6417_s7 + $0x40] sm:$0xff] %v4306_v38  ;;  %v4309_v48 = vadd.f32 %v7810_v3, %v4286_v19  ;;  %v4284_v2 = vadd.f32 %v4247_v17, %v7731_v52 }
 0xd28   : > { %v3653_v54 = vadd.f32 %v7797_v9, %v3010_v30 }
 0xd29   : > { %4325 = vst [vmem:[%s6417_s7 + $0x58] sm:$0xff] %v4309_v48  ;;  %v4307_v26 = vadd.f32 %v7810_v3, %v4284_v2 }
 0xd2b   : > { %4323 = vst [vmem:[%s6417_s7 + $0x48] sm:$0xff] %v4307_v26 }
 0xd4c   : > { %v5313_v33 = vpop.f32.mrf.mxu0 }
 0xd4d   : > { %v4289_v20 = vadd.f32 %v5313_v33, %v7743_v14 }
 0xd4e   : > { %v4260_v16 = vpop.f32.mrf.mxu0 }
 0xd4f   : > { %v4312_v1 = vadd.f32 %v7810_v3, %v4289_v20  ;;  %v4287_v52 = vadd.f32 %v4260_v16, %v7747_v46 }
 0xd50   : > { %v5314_v43 = vpop.f32.mrf.mxu0 }
 0xd51   : > { %4328 = vst [vmem:[%s6417_s7 + $0x70] sm:$0xff] %v4312_v1  ;;  %v4310_v45 = vadd.f32 %v7810_v3, %v4287_v52  ;;  %v4290_v14 = vadd.f32 %v5314_v43, %v7757_v0 }
 0xd52   : > { %v4263_v35 = vpop.f32.mrf.mxu0 }
 0xd53   : > { %4326 = vst [vmem:[%s6417_s7 + $0x60] sm:$0xff] %v4310_v45  ;;  %v4313_v13 = vadd.f32 %v7810_v3, %v4290_v14  ;;  %v4288_v23 = vadd.f32 %v4263_v35, %v3653_v54 }
 0xd55   : > { %4329 = vst [vmem:[%s6417_s7 + $0x78] sm:$0xff] %v4313_v13  ;;  %v4311_v46 = vadd.f32 %v7810_v3, %v4288_v23 }
 0xd57   : > { %4327 = vst [vmem:[%s6417_s7 + $0x68] sm:$0xff] %v4311_v46 }
 0xd58   : > { %6056 = shalt.err (!%p6053_p0)
}
 0xd59   : > { %s6057_s8 = scalar_lea.hbm %s7865_s3, 2048  ;;  %s6061_s21 = scalar_lea.hbm %s7988_s20, 8192 }
 0xd5a   : > { %p6058_p2 = scmp.ne.s32.totalorder %s7865_s3, %s6057_s8  ;;  %p6062_p8 = scmp.lt.s32.totalorder %s7865_s3, %s7988_s20 }
 0xd5b   : > { %p6063_p10 = scmp.lt.s32.totalorder %s6061_s21, %s6057_s8 }
 0xd5c   : > { %p6059_p4 = pnand %p6058_p2, %p7989_p7 }
 0xd5d   : > { %p6064_p3 = por %p6063_p10, %p6062_p8 }
 0xd5e   : > { %p6060_p5 = pneg %p6059_p4 }
 0xd60   : > { %p6065_p1 = pnand %p6064_p3, %p6060_p5 }
 0xd62   : > { %6068 = shalt.err (!%p6065_p1)
}
 0xd63   : > { %s6185_s16 = smov 128   ;;  %s6186_s23 = smov 8  }
 0xd64   : > { %5353 = dma.vmem_to_hbm [thread:$0]  (%p7989_p7), %s7867_s17, 2048, %s7865_s3, %s7874_s5, %s6185_s16, %s6185_s16, %s6186_s23  }
 0xd65 PF: > { %s7990_s22 = sld [smem:[#allocation17_spill]]  ;;  %p5380_p9 = scmp.ge.s32.totalorder %s6171_s11, 2 }
 0xd66   : > { %s7991_s27 = sld [smem:[#allocation21_spill]] }
 0xd6b   : > { %s4361_s9 = sand.u32 1, %s7990_s22  }
 0xd6c   : > { %p7992_p11 = scmp.ne.s32.totalorder %s7991_s27, 0  ;;  %s4362_s24 = scalar_lea.sflag [#allocation6], %s4361_s9 }
 0xd6e   : > { %p5370_p6 = pnand %p5380_p9, %p7992_p11 }
 0xd70   : > { %p5371_p13 = pneg %p5370_p6 }
 0xd72   : > { %6126 = dma.done.wait (%p5371_p13), %s4362_s24, 2048  }
 0xd73   : > { %6128 = vsyncadd (%p5371_p13), %s4362_s24, 4294965248  ;;  %s25_s11 = sadd.s32 1, %s6171_s11   ;;  %s7993_s30 = sld [smem:[#allocation19_spill]] }
 0xd74   : > { %p22_p12 = scmp.ge.s32.totalorder %s25_s11, 6   ;;  %s7994_s9 = sld [smem:[#allocation22_spill]] }
 0xd75   : > { %s7995_s17 = sld [smem:[#allocation23_spill]]  ;;  %s7996_s24 = smov %s6135_s25 }
 0xd76   : > { %s7997_s25 = smov %s6139_s26  ;;  %s7998_s26 = smov %s6377_s1 }
 0xd77   : > { %s7999_s27 = smov %s6147_s28  ;;  %s8000_s28 = smov %s6151_s29 }
 0xd78   : > { %s8001_s29 = smov %s6372_s18  ;;  %s8002_s8 = smov %s6167_s10 }
 0xd79   :  { %24 = sbr.rel (!%p22_p12) target bundleno = 16 (0x10), region = 110 }
 0xd7b   : > { %s8003_s10 = smov %s7995_s17 }
 0xd7e   :  { %4367 = vsyncpa [#allocation5], 1 }
 0xd7f   :  { %4369 = vsyncpa [#allocation5 + $0x1], 1 }
 0xd80   :  { %4370 = vsyncpa [#allocation8], 1 }
 0xd81   :  { %4371 = vsyncpa [#allocation11], 1 }
 0xd82   :  { %4372 = vsyncpa [#allocation6], 1 }
 0xd83   :  { %4374 = vsyncpa [#allocation6 + $0x1], 1 }

</bundles_post_ra>
